<compile_context>
chip_gen: v5e
topology: v5e:2x2
jax: 0.10.0
libtpu: 0.0.40
codegen_flags: <defaults>
</compile_context>

<pallas_src>
import functools

import numpy as np
import jax
import jax.numpy as jnp
from jax.experimental import pallas as pl
from jax.experimental.pallas import tpu as pltpu

DT_MM = jnp.bfloat16        # MXU operand dtype
BN_EPS = 1e-5

_COMPILER_PARAMS = pltpu.CompilerParams(
    dimension_semantics=("arbitrary",),
    vmem_limit_bytes=32 * 1024 * 1024,
)


# ----------------------------------------------------------------------------
# Pallas kernels
# ----------------------------------------------------------------------------
def _conv_bn_act_kernel(x_ref, w_ref, g_ref, b_ref, m_ref, o_ref, acc_ref, *,
                        taps, r_out, use_bn, act, inv_count):
    """Fused conv-as-shift-and-add -> BatchNorm(batch stats)/bias -> activation.

    x_ref : (P, K, R_in)    bf16  flattened transposed activation (P planes/phases)
    w_ref : (T, N, K)       bf16  per-tap weight matrices
    g_ref : (N, 1)          f32   gamma (BN) or bias (no BN)
    b_ref : (N, 1)          f32   beta  (BN) or unused
    m_ref : (1, n_blk*R)    f32   validity mask for the BN batch statistics
    o_ref : (N, n_blk*R)          output (channels x flattened positions)
    acc_ref: (N, n_blk*R)   f32   VMEM scratch accumulator
    `taps` is a static tuple (one entry per output block) of
    (weight_index, plane_index, lane_offset) triples.
    """
    planes = {}

    def _plane(p):
        if p not in planes:
            planes[p] = x_ref[p]
        return planes[p]

    for blk, blk_taps in enumerate(taps):
        acc = None
        for (w_idx, p, off) in blk_taps:
            xs = _plane(p)[:, off:off + r_out]
            part = jnp.dot(w_ref[w_idx], xs,
                           preferred_element_type=jnp.float32)
            acc = part if acc is None else acc + part
        acc_ref[:, blk * r_out:(blk + 1) * r_out] = acc

    y = acc_ref[...]
    if use_bn:
        msk = m_ref[...]
        ym = y * msk
        mean = jnp.sum(ym, axis=1, keepdims=True) * inv_count
        var = jnp.sum(ym * ym, axis=1, keepdims=True) * inv_count - mean * mean
        y = (y - mean) * jax.lax.rsqrt(var + BN_EPS) * g_ref[...] + b_ref[...]
    else:
        y = y + g_ref[...]                     # plain bias (no BN)
    if act == "relu":
        y = jnp.maximum(y, 0.0)
    elif act == "sigmoid":
        y = jax.nn.sigmoid(y)
    o_ref[...] = y.astype(o_ref.dtype)


def _latent_kernel(flat_ref, wh_ref, bh_ref, eps_ref, wd_ref, bd_ref,
                   mlv_ref, z_ref, x0_ref, *, latent):
    """Fused linear_means+linear_log_var -> reparameterize -> decoder_input."""
    y = jnp.dot(wh_ref[...], flat_ref[...],
                preferred_element_type=jnp.float32) + bh_ref[...]
    mu = y[:latent]
    lv = y[latent:]
    z = eps_ref[...] * jnp.exp(0.5 * lv) + mu
    x0 = jnp.dot(wd_ref[...], z.astype(DT_MM),
                 preferred_element_type=jnp.float32) + bd_ref[...]
    mlv_ref[...] = y
    z_ref[...] = z
    x0_ref[...] = x0


# ----------------------------------------------------------------------------
# pallas_call wrappers
# ----------------------------------------------------------------------------
def _pad_to(x, axis, mult):
    pad = (-x.shape[axis]) % mult
    if pad == 0:
        return x
    widths = [(0, 0)] * x.ndim
    widths[axis] = (0, pad)
    return jnp.pad(x, widths)


def _conv_call(x_flat, w_stack, g, b, mask, *, taps, r_out, use_bn, act,
               count, out_dtype):
    # pad the contraction (channel) dim to a multiple of 8 (zero contribution)
    x_flat = _pad_to(x_flat, 1, 8)
    w_stack = _pad_to(w_stack, 2, 8)
    P, K, R_in = x_flat.shape
    T, N, _ = w_stack.shape
    r_total = len(taps) * r_out

    kernel = functools.partial(_conv_bn_act_kernel, taps=taps, r_out=r_out,
                               use_bn=use_bn, act=act, inv_count=1.0 / count)
    return pl.pallas_call(
        kernel,
        out_shape=jax.ShapeDtypeStruct((N, r_total), out_dtype),
        grid=(1,),
        in_specs=[
            pl.BlockSpec((P, K, R_in), lambda i: (0, 0, 0)),
            pl.BlockSpec((T, N, K), lambda i: (0, 0, 0)),
            pl.BlockSpec((N, 1), lambda i: (0, 0)),
            pl.BlockSpec((N, 1), lambda i: (0, 0)),
            pl.BlockSpec((1, r_total), lambda i: (0, 0)),
        ],
        out_specs=pl.BlockSpec((N, r_total), lambda i: (0, 0)),
        scratch_shapes=[pltpu.VMEM((N, r_total), jnp.float32)],
        compiler_params=_COMPILER_PARAMS,
    )(x_flat, w_stack, g, b, mask)


def _conv2d_s2_bn_relu(h_nhwc, w, gamma, beta):
    """Conv2d(k=3, s=2, p=1) -> BN(batch stats) -> ReLU, NHWC in/out."""
    B, H, W, C = h_nhwc.shape
    Cout = w.shape[0]
    Ho, Wo = H // 2, W // 2
    Hc, Wc = Ho + 1, Wo + 1                       # phase-cell extents of padded img
    Rp = B * Hc * Wc
    r_out = Rp - Wc - 1

    # pad by 1 and split padded coords into 2x2 phases; flatten (B, cy, cx) on lanes
    xp = jnp.pad(h_nhwc, ((0, 0), (1, 1), (1, 1), (0, 0)))
    xp = xp.reshape(B, Hc, 2, Wc, 2, C).transpose(2, 4, 5, 0, 1, 3)
    x_flat = xp.reshape(4, C, Rp).astype(DT_MM)

    # per-tap (di,dj) weight matrices, index = di*3+dj
    w_stack = jnp.transpose(w, (2, 3, 0, 1)).reshape(9, Cout, C).astype(DT_MM)
    taps = (tuple((di * 3 + dj,
                   (di % 2) * 2 + (dj % 2),               # phase plane
                   (di // 2) * Wc + (dj // 2))            # static lane offset
                  for di in range(3) for dj in range(3)),)

    q = np.arange(r_out) % (Hc * Wc)
    mask = (((q // Wc) < Ho) & ((q % Wc) < Wo)).astype(np.float32)
    mask = jnp.asarray(mask).reshape(1, r_out)

    out = _conv_call(x_flat, w_stack,
                     gamma.reshape(-1, 1).astype(jnp.float32),
                     beta.reshape(-1, 1).astype(jnp.float32), mask,
                     taps=taps, r_out=r_out, use_bn=True, act="relu",
                     count=B * Ho * Wo, out_dtype=DT_MM)

    o = jnp.pad(out, ((0, 0), (0, Rp - r_out)))
    o = o.reshape(Cout, B, Hc, Wc)[:, :, :Ho, :Wo]
    return o.transpose(1, 2, 3, 0)                          # (B, Ho, Wo, Cout)


# parity-bit -> ((kernel_index, input_cell_offset), ...) for ConvT(k=3,s=2,p=1,op=1)
_CT_TAPS_1D = {0: ((1, 0),), 1: ((0, 1), (2, 0))}


def _convT_s2_bn_relu(h_nhwc, w, gamma, beta):
    """ConvTranspose2d(k=3, s=2, p=1, output_padding=1) -> BN -> ReLU (sub-pixel)."""
    B, Hi, Wi, Cin = h_nhwc.shape
    Cout = w.shape[1]
    Rp = B * (Hi + 1) * (Wi + 1)
    r_out = Rp - Wi - 2

    xp = jnp.pad(h_nhwc, ((0, 0), (0, 1), (0, 1), (0, 0)))   # one zero row/col
    x_flat = xp.transpose(3, 0, 1, 2).reshape(1, Cin, Rp).astype(DT_MM)

    w_slabs, taps = [], []
    for pi in range(2):                                      # output row parity
        for pj in range(2):                                  # output col parity
            blk = []
            for (ui, di) in _CT_TAPS_1D[pi]:
                for (uj, dj) in _CT_TAPS_1D[pj]:
                    blk.append((len(w_slabs), 0, di * (Wi + 1) + dj))
                    w_slabs.append(w[:, :, ui, uj].T)        # (Cout, Cin)
            taps.append(tuple(blk))
    taps = tuple(taps)                                       # 4 parity blocks, 9 taps
    w_stack = jnp.stack(w_slabs, axis=0).astype(DT_MM)

    q = np.arange(r_out) % ((Hi + 1) * (Wi + 1))
    m1 = (((q // (Wi + 1)) < Hi) & ((q % (Wi + 1)) < Wi)).astype(np.float32)
    mask = jnp.asarray(np.tile(m1, 4)).reshape(1, 4 * r_out)

    out = _conv_call(x_flat, w_stack,
                     gamma.reshape(-1, 1).astype(jnp.float32),
                     beta.reshape(-1, 1).astype(jnp.float32), mask,
                     taps=taps, r_out=r_out, use_bn=True, act="relu",
                     count=B * (2 * Hi) * (2 * Wi), out_dtype=DT_MM)

    # interleave the 4 parity blocks back into (B, 2H, 2W, Cout)
    o = out.reshape(Cout, 4, r_out)
    o = jnp.pad(o, ((0, 0), (0, 0), (0, Rp - r_out)))
    o = o.reshape(Cout, 2, 2, B, Hi + 1, Wi + 1)[:, :, :, :, :Hi, :Wi]
    o = o.transpose(3, 4, 1, 5, 2, 0).reshape(B, 2 * Hi, 2 * Wi, Cout)
    return o


def _conv2d_s1_bias_sigmoid(h_nhwc, w, bias):
    """Final Conv2d(k=3, s=1, p=1) + bias + Sigmoid; returns NCHW."""
    B, H, W, Cin = h_nhwc.shape
    Cout = w.shape[0]
    Hp, Wp = H + 2, W + 2
    Rp = B * Hp * Wp
    r_out = Rp - 2 * Wp - 2

    xp = jnp.pad(h_nhwc, ((0, 0), (1, 1), (1, 1), (0, 0)))
    x_flat = xp.transpose(3, 0, 1, 2).reshape(1, Cin, Rp).astype(DT_MM)

    w_stack = jnp.transpose(w, (2, 3, 0, 1)).reshape(9, Cout, Cin).astype(DT_MM)
    taps = (tuple((di * 3 + dj, 0, di * Wp + dj)
                  for di in range(3) for dj in range(3)),)
    mask = jnp.ones((1, r_out), jnp.float32)                 # unused (no BN)

    out = _conv_call(x_flat, w_stack,
                     bias.reshape(-1, 1).astype(jnp.float32),
                     jnp.zeros((Cout, 1), jnp.float32), mask,
                     taps=taps, r_out=r_out, use_bn=False, act="sigmoid",
                     count=1, out_dtype=jnp.float32)

    o = jnp.pad(out, ((0, 0), (0, Rp - r_out)))
    o = o.reshape(Cout, B, Hp, Wp)[:, :, :H, :W]
    return o.transpose(1, 0, 2, 3)                           # NCHW


def _latent_call(flat_t, wh, bh, eps_t, wd, bd, latent):
    Kf, B = flat_t.shape
    Df = wd.shape[0]
    return pl.pallas_call(
        functools.partial(_latent_kernel, latent=latent),
        out_shape=(jax.ShapeDtypeStruct((2 * latent, B), jnp.float32),
                   jax.ShapeDtypeStruct((latent, B), jnp.float32),
                   jax.ShapeDtypeStruct((Df, B), jnp.float32)),
        grid=(1,),
        in_specs=[
            pl.BlockSpec((Kf, B), lambda i: (0, 0)),
            pl.BlockSpec((2 * latent, Kf), lambda i: (0, 0)),
            pl.BlockSpec((2 * latent, 1), lambda i: (0, 0)),
            pl.BlockSpec((latent, B), lambda i: (0, 0)),
            pl.BlockSpec((Df, latent), lambda i: (0, 0)),
            pl.BlockSpec((Df, 1), lambda i: (0, 0)),
        ],
        out_specs=(pl.BlockSpec((2 * latent, B), lambda i: (0, 0)),
                   pl.BlockSpec((latent, B), lambda i: (0, 0)),
                   pl.BlockSpec((Df, B), lambda i: (0, 0))),
        compiler_params=_COMPILER_PARAMS,
    )(flat_t, wh, bh, eps_t, wd, bd)


# ----------------------------------------------------------------------------
# Full VAE forward (Pallas path)
# ----------------------------------------------------------------------------
def vae_forward(params, x_nchw, eps):
    B = x_nchw.shape[0]
    latent = params["lin_means"]["w"].shape[0]
    c0 = params["dec_input"]["w"].shape[0] // 4

    # ----- encoder conv stack -----
    h = jnp.transpose(x_nchw, (0, 2, 3, 1))                  # NHWC
    for layer in params["enc_convs"]:
        h = _conv2d_s2_bn_relu(h, layer["w"], layer["gamma"], layer["beta"])

    # torch.flatten(start_dim=1) on NCHW == channel-major flatten
    flat_t = jnp.transpose(h, (0, 3, 1, 2)).reshape(B, -1).T.astype(DT_MM)

    # ----- fused heads + reparameterization + decoder_input -----
    wh = jnp.concatenate([params["lin_means"]["w"],
                          params["lin_logvar"]["w"]], axis=0).astype(DT_MM)
    bh = jnp.concatenate([params["lin_means"]["b"],
                          params["lin_logvar"]["b"]]).reshape(-1, 1).astype(jnp.float32)
    wd = params["dec_input"]["w"].astype(DT_MM)
    bd = params["dec_input"]["b"].reshape(-1, 1).astype(jnp.float32)
    mlv, z_t, x0 = _latent_call(flat_t, wh, bh,
                                eps.T.astype(jnp.float32), wd, bd, latent)
    means, log_var, z = mlv[:latent].T, mlv[latent:].T, z_t.T

    # ----- decoder -----
    h = x0.T.reshape(B, c0, 2, 2).transpose(0, 2, 3, 1).astype(DT_MM)  # NHWC
    for layer in params["dec_cts"]:
        h = _convT_s2_bn_relu(h, layer["w"], layer["gamma"], layer["beta"])
    recon_x = _conv2d_s1_bias_sigmoid(h, params["dec_final"]["w"],
                                      params["dec_final"]["b"])
    return recon_x, means, log_var, z


# ----------------------------------------------------------------------------
# Pure-JAX f32 reference (no Pallas) mirroring the PyTorch forward
# ----------------------------------------------------------------------------
def reference_forward(params, x_nchw, eps):
    dn = ("NHWC", "HWIO", "NHWC")

    def bn_relu(y, gamma, beta):
        mean = y.mean(axis=(0, 1, 2), keepdims=True)
        var = ((y - mean) ** 2).mean(axis=(0, 1, 2), keepdims=True)
        return jnp.maximum((y - mean) * jax.lax.rsqrt(var + BN_EPS)
                           * gamma + beta, 0.0)

    h = jnp.transpose(x_nchw, (0, 2, 3, 1))
    for layer in params["enc_convs"]:
        w_hwio = jnp.transpose(layer["w"], (2, 3, 1, 0))
        y = jax.lax.conv_general_dilated(h, w_hwio, (2, 2), ((1, 1), (1, 1)),
                                         dimension_numbers=dn)
        y = y + layer["b"].reshape(1, 1, 1, -1)
        h = bn_relu(y, layer["gamma"], layer["beta"])
    B = h.shape[0]
    flat = jnp.transpose(h, (0, 3, 1, 2)).reshape(B, -1)
    means = flat @ params["lin_means"]["w"].T + params["lin_means"]["b"]
    log_var = flat @ params["lin_logvar"]["w"].T + params["lin_logvar"]["b"]
    z = eps * jnp.exp(0.5 * log_var) + means
    x = z @ params["dec_input"]["w"].T + params["dec_input"]["b"]
    c0 = params["dec_input"]["w"].shape[0] // 4
    h = x.reshape(B, c0, 2, 2).transpose(0, 2, 3, 1)
    for layer in params["dec_cts"]:
        w_hwio = jnp.transpose(layer["w"][:, :, ::-1, ::-1], (2, 3, 0, 1))
        y = jax.lax.conv_general_dilated(h, w_hwio, (1, 1), ((1, 2), (1, 2)),
                                         lhs_dilation=(2, 2),
                                         dimension_numbers=dn)
        y = y + layer["b"].reshape(1, 1, 1, -1)
        h = bn_relu(y, layer["gamma"], layer["beta"])
    w_hwio = jnp.transpose(params["dec_final"]["w"], (2, 3, 1, 0))
    y = jax.lax.conv_general_dilated(h, w_hwio, (1, 1), ((1, 1), (1, 1)),
                                     dimension_numbers=dn)
    y = y + params["dec_final"]["b"].reshape(1, 1, 1, -1)
    recon = jax.nn.sigmoid(y).transpose(0, 3, 1, 2)
    return recon, means, log_var, z


# ----------------------------------------------------------------------------
# Deterministic parameter init (PyTorch weight layouts, synthetic values)
# ----------------------------------------------------------------------------
def _normal(key, shape, scale=0.1):
    return scale * jax.random.normal(key, shape, jnp.float32)


def init_params(key, enc_fs, latent, dec_fs, in_ch):
    keys = iter(jax.random.split(key, 64))
    params = {}

    enc_convs = []
    c = in_ch
    for f in enc_fs:
        enc_convs.append(dict(
            w=_normal(next(keys), (f, c, 3, 3)),          # Conv2d (Cout,Cin,k,k)
            b=_normal(next(keys), (f,)),
            gamma=jnp.ones((f,), jnp.float32),
            beta=jnp.zeros((f,), jnp.float32)))
        c = f
    params["enc_convs"] = enc_convs

    flat = enc_fs[-1] * 4
    params["lin_means"] = dict(w=_normal(next(keys), (latent, flat)),
                               b=_normal(next(keys), (latent,)))
    params["lin_logvar"] = dict(w=_normal(next(keys), (latent, flat)),
                                b=_normal(next(keys), (latent,)))

    params["dec_input"] = dict(w=_normal(next(keys), (dec_fs[0] * 4, latent)),
                               b=_normal(next(keys), (dec_fs[0] * 4,)))

    dec_cts = []
    outs = dec_fs[1:] + [dec_fs[-1]]
    for cin, cout in zip(dec_fs, outs):
        dec_cts.append(dict(
            w=_normal(next(keys), (cin, cout, 3, 3)),     # ConvT (Cin,Cout,k,k)
            b=_normal(next(keys), (cout,)),
            gamma=jnp.ones((cout,), jnp.float32),
            beta=jnp.zeros((cout,), jnp.float32)))
    params["dec_cts"] = dec_cts

    params["dec_final"] = dict(w=_normal(next(keys), (in_ch, outs[-1], 3, 3)),
                               b=_normal(next(keys), (in_ch,)))
    return params


# ----------------------------------------------------------------------------
if __name__ == "__main__":
    B, C_IN, H = 2, 3, 16
    ENC_FS = [8, 16, 32]          # 16 -> 8 -> 4 -> 2 spatial
    DEC_FS = [32, 16, 8]          # 2 -> 4 -> 8 -> 16 spatial
    LATENT = 16

    params = init_params(jax.random.PRNGKey(42), ENC_FS, LATENT, DEC_FS, C_IN)
    key_x, key_eps = jax.random.split(jax.random.PRNGKey(0))
    x = jax.random.normal(key_x, (B, C_IN, H, H), jnp.float32)
    eps = jax.random.normal(key_eps, (B, LATENT), jnp.float32)

    fwd = jax.jit(vae_forward)
    recon_x, means, log_var, z = fwd(params, x, eps)
    jax.block_until_ready((recon_x, means, log_var, z))

    assert recon_x.shape == (B, C_IN, H, H)
    assert means.shape == (B, LATENT) and log_var.shape == (B, LATENT)
    assert z.shape == (B, LATENT)
    assert bool(jnp.all(jnp.isfinite(recon_x)))

    # numerics check against the pure-JAX f32 reference (bf16 MXU tolerance)
    ref_recon, ref_means, ref_lv, ref_z = reference_forward(params, x, eps)
    for got, ref in ((recon_x, ref_recon), (means, ref_means),
                     (log_var, ref_lv), (z, ref_z)):
        err = float(jnp.max(jnp.abs(got - ref)))
        assert bool(jnp.allclose(got, ref, atol=8e-2, rtol=8e-2)), err

    print("KERNEL_OK")
</pallas_src>

<mosaic_0001>
module attributes {stable_mosaic.version = 11 : i64} {
  func.func @_conv_bn_act_kernel(%arg0: i32, %arg1: memref<4x8x162xbf16, #tpu.memory_space<vmem>>, %arg2: memref<9x8x8xbf16, #tpu.memory_space<vmem>>, %arg3: memref<8x1xf32, #tpu.memory_space<vmem>>, %arg4: memref<8x1xf32, #tpu.memory_space<vmem>>, %arg5: memref<1x152xf32, #tpu.memory_space<vmem>>, %arg6: memref<8x152xbf16, #tpu.memory_space<vmem>>, %arg7: memref<8x152xf32, #tpu.memory_space<vmem>>) attributes {dimension_semantics = [#tpu.dimension_semantics<arbitrary>], iteration_bounds = array<i64: 1>, scalar_prefetch = 0 : i64, scratch_operands = 1 : i64, tpu.core_type = #tpu.core_type<tc>, window_params = [{pipeline_mode = #tpu.pipeline_mode<synchronous>, transform_indices = @transform_0, window_bounds = array<i64: 4, 8, 162>}, {pipeline_mode = #tpu.pipeline_mode<synchronous>, transform_indices = @transform_1, window_bounds = array<i64: 9, 8, 8>}, {pipeline_mode = #tpu.pipeline_mode<synchronous>, transform_indices = @transform_2, window_bounds = array<i64: 8, 1>}, {pipeline_mode = #tpu.pipeline_mode<synchronous>, transform_indices = @transform_3, window_bounds = array<i64: 8, 1>}, {pipeline_mode = #tpu.pipeline_mode<synchronous>, transform_indices = @transform_4, window_bounds = array<i64: 1, 152>}, {pipeline_mode = #tpu.pipeline_mode<synchronous>, transform_indices = @transform_5, window_bounds = array<i64: 8, 152>}]} {
    %c0 = arith.constant 0 : index
    %c0_0 = arith.constant 0 : index
    %c0_1 = arith.constant 0 : index
    %0 = vector.load %arg1[%c0, %c0_0, %c0_1] : memref<4x8x162xbf16, #tpu.memory_space<vmem>>, vector<1x8x162xbf16>
    %1 = vector.shape_cast %0 : vector<1x8x162xbf16> to vector<8x162xbf16>
    %2 = vector.extract_strided_slice %1 {offsets = [0, 0], sizes = [8, 152], strides = [1, 1]} : vector<8x162xbf16> to vector<8x152xbf16>
    %c0_2 = arith.constant 0 : index
    %c0_3 = arith.constant 0 : index
    %c0_4 = arith.constant 0 : index
    %3 = vector.load %arg2[%c0_2, %c0_3, %c0_4] : memref<9x8x8xbf16, #tpu.memory_space<vmem>>, vector<1x8x8xbf16>
    %4 = vector.shape_cast %3 : vector<1x8x8xbf16> to vector<8x8xbf16>
    %cst = arith.constant dense<0.000000e+00> : vector<8x152xf32>
    %5 = tpu.matmul %4, %2, %cst {dimension_numbers = #tpu.dot_dimension_numbers<[1], [0], [0], [1], [0, 0, 1, 1], [], []>} : vector<8x8xbf16>, vector<8x152xbf16>, vector<8x152xf32> -> vector<8x152xf32>
    %c1 = arith.constant 1 : index
    %c0_5 = arith.constant 0 : index
    %c0_6 = arith.constant 0 : index
    %6 = vector.load %arg1[%c1, %c0_5, %c0_6] : memref<4x8x162xbf16, #tpu.memory_space<vmem>>, vector<1x8x162xbf16>
    %7 = vector.shape_cast %6 : vector<1x8x162xbf16> to vector<8x162xbf16>
    %8 = vector.extract_strided_slice %7 {offsets = [0, 0], sizes = [8, 152], strides = [1, 1]} : vector<8x162xbf16> to vector<8x152xbf16>
    %c1_7 = arith.constant 1 : index
    %c0_8 = arith.constant 0 : index
    %c0_9 = arith.constant 0 : index
    %9 = vector.load %arg2[%c1_7, %c0_8, %c0_9] : memref<9x8x8xbf16, #tpu.memory_space<vmem>>, vector<1x8x8xbf16>
    %10 = vector.shape_cast %9 : vector<1x8x8xbf16> to vector<8x8xbf16>
    %cst_10 = arith.constant dense<0.000000e+00> : vector<8x152xf32>
    %11 = tpu.matmul %10, %8, %cst_10 {dimension_numbers = #tpu.dot_dimension_numbers<[1], [0], [0], [1], [0, 0, 1, 1], [], []>} : vector<8x8xbf16>, vector<8x152xbf16>, vector<8x152xf32> -> vector<8x152xf32>
    %12 = arith.addf %5, %11 : vector<8x152xf32>
    %13 = vector.extract_strided_slice %1 {offsets = [0, 1], sizes = [8, 152], strides = [1, 1]} : vector<8x162xbf16> to vector<8x152xbf16>
    %c2 = arith.constant 2 : index
    %c0_11 = arith.constant 0 : index
    %c0_12 = arith.constant 0 : index
    %14 = vector.load %arg2[%c2, %c0_11, %c0_12] : memref<9x8x8xbf16, #tpu.memory_space<vmem>>, vector<1x8x8xbf16>
    %15 = vector.shape_cast %14 : vector<1x8x8xbf16> to vector<8x8xbf16>
    %cst_13 = arith.constant dense<0.000000e+00> : vector<8x152xf32>
    %16 = tpu.matmul %15, %13, %cst_13 {dimension_numbers = #tpu.dot_dimension_numbers<[1], [0], [0], [1], [0, 0, 1, 1], [], []>} : vector<8x8xbf16>, vector<8x152xbf16>, vector<8x152xf32> -> vector<8x152xf32>
    %17 = arith.addf %12, %16 : vector<8x152xf32>
    %c2_14 = arith.constant 2 : index
    %c0_15 = arith.constant 0 : index
    %c0_16 = arith.constant 0 : index
    %18 = vector.load %arg1[%c2_14, %c0_15, %c0_16] : memref<4x8x162xbf16, #tpu.memory_space<vmem>>, vector<1x8x162xbf16>
    %19 = vector.shape_cast %18 : vector<1x8x162xbf16> to vector<8x162xbf16>
    %20 = vector.extract_strided_slice %19 {offsets = [0, 0], sizes = [8, 152], strides = [1, 1]} : vector<8x162xbf16> to vector<8x152xbf16>
    %c3 = arith.constant 3 : index
    %c0_17 = arith.constant 0 : index
    %c0_18 = arith.constant 0 : index
    %21 = vector.load %arg2[%c3, %c0_17, %c0_18] : memref<9x8x8xbf16, #tpu.memory_space<vmem>>, vector<1x8x8xbf16>
    %22 = vector.shape_cast %21 : vector<1x8x8xbf16> to vector<8x8xbf16>
    %cst_19 = arith.constant dense<0.000000e+00> : vector<8x152xf32>
    %23 = tpu.matmul %22, %20, %cst_19 {dimension_numbers = #tpu.dot_dimension_numbers<[1], [0], [0], [1], [0, 0, 1, 1], [], []>} : vector<8x8xbf16>, vector<8x152xbf16>, vector<8x152xf32> -> vector<8x152xf32>
    %24 = arith.addf %17, %23 : vector<8x152xf32>
    %c3_20 = arith.constant 3 : index
    %c0_21 = arith.constant 0 : index
    %c0_22 = arith.constant 0 : index
    %25 = vector.load %arg1[%c3_20, %c0_21, %c0_22] : memref<4x8x162xbf16, #tpu.memory_space<vmem>>, vector<1x8x162xbf16>
    %26 = vector.shape_cast %25 : vector<1x8x162xbf16> to vector<8x162xbf16>
    %27 = vector.extract_strided_slice %26 {offsets = [0, 0], sizes = [8, 152], strides = [1, 1]} : vector<8x162xbf16> to vector<8x152xbf16>
    %c4 = arith.constant 4 : index
    %c0_23 = arith.constant 0 : index
    %c0_24 = arith.constant 0 : index
    %28 = vector.load %arg2[%c4, %c0_23, %c0_24] : memref<9x8x8xbf16, #tpu.memory_space<vmem>>, vector<1x8x8xbf16>
    %29 = vector.shape_cast %28 : vector<1x8x8xbf16> to vector<8x8xbf16>
    %cst_25 = arith.constant dense<0.000000e+00> : vector<8x152xf32>
    %30 = tpu.matmul %29, %27, %cst_25 {dimension_numbers = #tpu.dot_dimension_numbers<[1], [0], [0], [1], [0, 0, 1, 1], [], []>} : vector<8x8xbf16>, vector<8x152xbf16>, vector<8x152xf32> -> vector<8x152xf32>
    %31 = arith.addf %24, %30 : vector<8x152xf32>
    %32 = vector.extract_strided_slice %19 {offsets = [0, 1], sizes = [8, 152], strides = [1, 1]} : vector<8x162xbf16> to vector<8x152xbf16>
    %c5 = arith.constant 5 : index
    %c0_26 = arith.constant 0 : index
    %c0_27 = arith.constant 0 : index
    %33 = vector.load %arg2[%c5, %c0_26, %c0_27] : memref<9x8x8xbf16, #tpu.memory_space<vmem>>, vector<1x8x8xbf16>
    %34 = vector.shape_cast %33 : vector<1x8x8xbf16> to vector<8x8xbf16>
    %cst_28 = arith.constant dense<0.000000e+00> : vector<8x152xf32>
    %35 = tpu.matmul %34, %32, %cst_28 {dimension_numbers = #tpu.dot_dimension_numbers<[1], [0], [0], [1], [0, 0, 1, 1], [], []>} : vector<8x8xbf16>, vector<8x152xbf16>, vector<8x152xf32> -> vector<8x152xf32>
    %36 = arith.addf %31, %35 : vector<8x152xf32>
    %37 = vector.extract_strided_slice %1 {offsets = [0, 9], sizes = [8, 152], strides = [1, 1]} : vector<8x162xbf16> to vector<8x152xbf16>
    %c6 = arith.constant 6 : index
    %c0_29 = arith.constant 0 : index
    %c0_30 = arith.constant 0 : index
    %38 = vector.load %arg2[%c6, %c0_29, %c0_30] : memref<9x8x8xbf16, #tpu.memory_space<vmem>>, vector<1x8x8xbf16>
    %39 = vector.shape_cast %38 : vector<1x8x8xbf16> to vector<8x8xbf16>
    %cst_31 = arith.constant dense<0.000000e+00> : vector<8x152xf32>
    %40 = tpu.matmul %39, %37, %cst_31 {dimension_numbers = #tpu.dot_dimension_numbers<[1], [0], [0], [1], [0, 0, 1, 1], [], []>} : vector<8x8xbf16>, vector<8x152xbf16>, vector<8x152xf32> -> vector<8x152xf32>
    %41 = arith.addf %36, %40 : vector<8x152xf32>
    %42 = vector.extract_strided_slice %7 {offsets = [0, 9], sizes = [8, 152], strides = [1, 1]} : vector<8x162xbf16> to vector<8x152xbf16>
    %c7 = arith.constant 7 : index
    %c0_32 = arith.constant 0 : index
    %c0_33 = arith.constant 0 : index
    %43 = vector.load %arg2[%c7, %c0_32, %c0_33] : memref<9x8x8xbf16, #tpu.memory_space<vmem>>, vector<1x8x8xbf16>
    %44 = vector.shape_cast %43 : vector<1x8x8xbf16> to vector<8x8xbf16>
    %cst_34 = arith.constant dense<0.000000e+00> : vector<8x152xf32>
    %45 = tpu.matmul %44, %42, %cst_34 {dimension_numbers = #tpu.dot_dimension_numbers<[1], [0], [0], [1], [0, 0, 1, 1], [], []>} : vector<8x8xbf16>, vector<8x152xbf16>, vector<8x152xf32> -> vector<8x152xf32>
    %46 = arith.addf %41, %45 : vector<8x152xf32>
    %47 = vector.extract_strided_slice %1 {offsets = [0, 10], sizes = [8, 152], strides = [1, 1]} : vector<8x162xbf16> to vector<8x152xbf16>
    %c8 = arith.constant 8 : index
    %c0_35 = arith.constant 0 : index
    %c0_36 = arith.constant 0 : index
    %48 = vector.load %arg2[%c8, %c0_35, %c0_36] : memref<9x8x8xbf16, #tpu.memory_space<vmem>>, vector<1x8x8xbf16>
    %49 = vector.shape_cast %48 : vector<1x8x8xbf16> to vector<8x8xbf16>
    %cst_37 = arith.constant dense<0.000000e+00> : vector<8x152xf32>
    %50 = tpu.matmul %49, %47, %cst_37 {dimension_numbers = #tpu.dot_dimension_numbers<[1], [0], [0], [1], [0, 0, 1, 1], [], []>} : vector<8x8xbf16>, vector<8x152xbf16>, vector<8x152xf32> -> vector<8x152xf32>
    %51 = arith.addf %46, %50 : vector<8x152xf32>
    %c0_38 = arith.constant 0 : index
    %c0_39 = arith.constant 0 : index
    %52 = vector.load %arg7[%c0_38, %c0_39] : memref<8x152xf32, #tpu.memory_space<vmem>>, vector<8x152xf32>
    tpu.vector_store %arg7[%c0_38, %c0_39], %51 {strides = array<i32>} : memref<8x152xf32, #tpu.memory_space<vmem>>, vector<8x152xf32>,
    %c0_40 = arith.constant 0 : index
    %c0_41 = arith.constant 0 : index
    %53 = vector.load %arg7[%c0_40, %c0_41] : memref<8x152xf32, #tpu.memory_space<vmem>>, vector<8x152xf32>
    %c0_42 = arith.constant 0 : index
    %c0_43 = arith.constant 0 : index
    %54 = vector.load %arg5[%c0_42, %c0_43] : memref<1x152xf32, #tpu.memory_space<vmem>>, vector<1x152xf32>
    %55 = vector.broadcast %54 : vector<1x152xf32> to vector<8x152xf32>
    %56 = arith.mulf %53, %55 : vector<8x152xf32>
    %cst_44 = arith.constant dense<0.000000e+00> : vector<8xf32>
    %57 = vector.multi_reduction <add>, %56, %cst_44 [1] : vector<8x152xf32> to vector<8xf32>
    %58 = vector.shape_cast %57 : vector<8xf32> to vector<8x1xf32>
    %cst_45 = arith.constant 7.812500e-03 : f32
    %59 = vector.broadcast %cst_45 : f32 to vector<8x1xf32>
    %60 = arith.mulf %58, %59 : vector<8x1xf32>
    %61 = arith.mulf %56, %56 : vector<8x152xf32>
    %cst_46 = arith.constant dense<0.000000e+00> : vector<8xf32>
    %62 = vector.multi_reduction <add>, %61, %cst_46 [1] : vector<8x152xf32> to vector<8xf32>
    %63 = vector.shape_cast %62 : vector<8xf32> to vector<8x1xf32>
    %cst_47 = arith.constant 7.812500e-03 : f32
    %64 = vector.broadcast %cst_47 : f32 to vector<8x1xf32>
    %65 = arith.mulf %63, %64 : vector<8x1xf32>
    %66 = arith.mulf %60, %60 : vector<8x1xf32>
    %67 = arith.subf %65, %66 : vector<8x1xf32>
    %68 = vector.broadcast %60 : vector<8x1xf32> to vector<8x152xf32>
    %69 = arith.subf %53, %68 : vector<8x152xf32>
    %cst_48 = arith.constant 9.99999974E-6 : f32
    %70 = vector.broadcast %cst_48 : f32 to vector<8x1xf32>
    %71 = arith.addf %67, %70 : vector<8x1xf32>
    %72 = math.rsqrt %71 : vector<8x1xf32>
    %73 = vector.broadcast %72 : vector<8x1xf32> to vector<8x152xf32>
    %74 = arith.mulf %69, %73 : vector<8x152xf32>
    %c0_49 = arith.constant 0 : index
    %c0_50 = arith.constant 0 : index
    %75 = vector.load %arg3[%c0_49, %c0_50] : memref<8x1xf32, #tpu.memory_space<vmem>>, vector<8x1xf32>
    %76 = vector.broadcast %75 : vector<8x1xf32> to vector<8x152xf32>
    %77 = arith.mulf %74, %76 : vector<8x152xf32>
    %c0_51 = arith.constant 0 : index
    %c0_52 = arith.constant 0 : index
    %78 = vector.load %arg4[%c0_51, %c0_52] : memref<8x1xf32, #tpu.memory_space<vmem>>, vector<8x1xf32>
    %79 = vector.broadcast %78 : vector<8x1xf32> to vector<8x152xf32>
    %80 = arith.addf %77, %79 : vector<8x152xf32>
    %cst_53 = arith.constant 0.000000e+00 : f32
    %81 = vector.broadcast %cst_53 : f32 to vector<8x152xf32>
    %82 = arith.maximumf %80, %81 : vector<8x152xf32>
    %83 = arith.truncf %82 : vector<8x152xf32> to vector<8x152xbf16>
    %c0_54 = arith.constant 0 : index
    %c0_55 = arith.constant 0 : index
    %84 = vector.load %arg6[%c0_54, %c0_55] : memref<8x152xbf16, #tpu.memory_space<vmem>>, vector<8x152xbf16>
    tpu.vector_store %arg6[%c0_54, %c0_55], %83 {strides = array<i32>} : memref<8x152xbf16, #tpu.memory_space<vmem>>, vector<8x152xbf16>,
    return
  }
  func.func @transform_0(%arg0: i32) -> (i32, i32, i32) {
    %c0_i32 = arith.constant 0 : i32
    %c0_i32_0 = arith.constant 0 : i32
    %c0_i32_1 = arith.constant 0 : i32
    %c0_i32_2 = arith.constant 0 : i32
    return %c0_i32, %c0_i32_0, %c0_i32_1 : i32, i32, i32
  }
  func.func @transform_1(%arg0: i32) -> (i32, i32, i32) {
    %c0_i32 = arith.constant 0 : i32
    %c0_i32_0 = arith.constant 0 : i32
    %c0_i32_1 = arith.constant 0 : i32
    %c0_i32_2 = arith.constant 0 : i32
    return %c0_i32, %c0_i32_0, %c0_i32_1 : i32, i32, i32
  }
  func.func @transform_2(%arg0: i32) -> (i32, i32) {
    %c0_i32 = arith.constant 0 : i32
    %c0_i32_0 = arith.constant 0 : i32
    %c0_i32_1 = arith.constant 0 : i32
    return %c0_i32, %c0_i32_0 : i32, i32
  }
  func.func @transform_3(%arg0: i32) -> (i32, i32) {
    %c0_i32 = arith.constant 0 : i32
    %c0_i32_0 = arith.constant 0 : i32
    %c0_i32_1 = arith.constant 0 : i32
    return %c0_i32, %c0_i32_0 : i32, i32
  }
  func.func @transform_4(%arg0: i32) -> (i32, i32) {
    %c0_i32 = arith.constant 0 : i32
    %c0_i32_0 = arith.constant 0 : i32
    %c0_i32_1 = arith.constant 0 : i32
    return %c0_i32, %c0_i32_0 : i32, i32
  }
  func.func @transform_5(%arg0: i32) -> (i32, i32) {
    %c0_i32 = arith.constant 0 : i32
    %c0_i32_0 = arith.constant 0 : i32
    %c0_i32_1 = arith.constant 0 : i32
    return %c0_i32, %c0_i32_0 : i32, i32
  }
}

module attributes {stable_mosaic.version = 11 : i64} {
  func.func @_conv_bn_act_kernel(%arg0: i32, %arg1: memref<4x8x50xbf16, #tpu.memory_space<vmem>>, %arg2: memref<9x16x8xbf16, #tpu.memory_space<vmem>>, %arg3: memref<16x1xf32, #tpu.memory_space<vmem>>, %arg4: memref<16x1xf32, #tpu.memory_space<vmem>>, %arg5: memref<1x44xf32, #tpu.memory_space<vmem>>, %arg6: memref<16x44xbf16, #tpu.memory_space<vmem>>, %arg7: memref<16x44xf32, #tpu.memory_space<vmem>>) attributes {dimension_semantics = [#tpu.dimension_semantics<arbitrary>], iteration_bounds = array<i64: 1>, scalar_prefetch = 0 : i64, scratch_operands = 1 : i64, tpu.core_type = #tpu.core_type<tc>, window_params = [{pipeline_mode = #tpu.pipeline_mode<synchronous>, transform_indices = @transform_0, window_bounds = array<i64: 4, 8, 50>}, {pipeline_mode = #tpu.pipeline_mode<synchronous>, transform_indices = @transform_1, window_bounds = array<i64: 9, 16, 8>}, {pipeline_mode = #tpu.pipeline_mode<synchronous>, transform_indices = @transform_2, window_bounds = array<i64: 16, 1>}, {pipeline_mode = #tpu.pipeline_mode<synchronous>, transform_indices = @transform_3, window_bounds = array<i64: 16, 1>}, {pipeline_mode = #tpu.pipeline_mode<synchronous>, transform_indices = @transform_4, window_bounds = array<i64: 1, 44>}, {pipeline_mode = #tpu.pipeline_mode<synchronous>, transform_indices = @transform_5, window_bounds = array<i64: 16, 44>}]} {
    %c0 = arith.constant 0 : index
    %c0_0 = arith.constant 0 : index
    %c0_1 = arith.constant 0 : index
    %0 = vector.load %arg1[%c0, %c0_0, %c0_1] : memref<4x8x50xbf16, #tpu.memory_space<vmem>>, vector<1x8x50xbf16>
    %1 = vector.shape_cast %0 : vector<1x8x50xbf16> to vector<8x50xbf16>
    %2 = vector.extract_strided_slice %1 {offsets = [0, 0], sizes = [8, 44], strides = [1, 1]} : vector<8x50xbf16> to vector<8x44xbf16>
    %c0_2 = arith.constant 0 : index
    %c0_3 = arith.constant 0 : index
    %c0_4 = arith.constant 0 : index
    %3 = vector.load %arg2[%c0_2, %c0_3, %c0_4] : memref<9x16x8xbf16, #tpu.memory_space<vmem>>, vector<1x16x8xbf16>
    %4 = vector.shape_cast %3 : vector<1x16x8xbf16> to vector<16x8xbf16>
    %cst = arith.constant dense<0.000000e+00> : vector<16x44xf32>
    %5 = tpu.matmul %4, %2, %cst {dimension_numbers = #tpu.dot_dimension_numbers<[1], [0], [0], [1], [0, 0, 1, 1], [], []>} : vector<16x8xbf16>, vector<8x44xbf16>, vector<16x44xf32> -> vector<16x44xf32>
    %c1 = arith.constant 1 : index
    %c0_5 = arith.constant 0 : index
    %c0_6 = arith.constant 0 : index
    %6 = vector.load %arg1[%c1, %c0_5, %c0_6] : memref<4x8x50xbf16, #tpu.memory_space<vmem>>, vector<1x8x50xbf16>
    %7 = vector.shape_cast %6 : vector<1x8x50xbf16> to vector<8x50xbf16>
    %8 = vector.extract_strided_slice %7 {offsets = [0, 0], sizes = [8, 44], strides = [1, 1]} : vector<8x50xbf16> to vector<8x44xbf16>
    %c1_7 = arith.constant 1 : index
    %c0_8 = arith.constant 0 : index
    %c0_9 = arith.constant 0 : index
    %9 = vector.load %arg2[%c1_7, %c0_8, %c0_9] : memref<9x16x8xbf16, #tpu.memory_space<vmem>>, vector<1x16x8xbf16>
    %10 = vector.shape_cast %9 : vector<1x16x8xbf16> to vector<16x8xbf16>
    %cst_10 = arith.constant dense<0.000000e+00> : vector<16x44xf32>
    %11 = tpu.matmul %10, %8, %cst_10 {dimension_numbers = #tpu.dot_dimension_numbers<[1], [0], [0], [1], [0, 0, 1, 1], [], []>} : vector<16x8xbf16>, vector<8x44xbf16>, vector<16x44xf32> -> vector<16x44xf32>
    %12 = arith.addf %5, %11 : vector<16x44xf32>
    %13 = vector.extract_strided_slice %1 {offsets = [0, 1], sizes = [8, 44], strides = [1, 1]} : vector<8x50xbf16> to vector<8x44xbf16>
    %c2 = arith.constant 2 : index
    %c0_11 = arith.constant 0 : index
    %c0_12 = arith.constant 0 : index
    %14 = vector.load %arg2[%c2, %c0_11, %c0_12] : memref<9x16x8xbf16, #tpu.memory_space<vmem>>, vector<1x16x8xbf16>
    %15 = vector.shape_cast %14 : vector<1x16x8xbf16> to vector<16x8xbf16>
    %cst_13 = arith.constant dense<0.000000e+00> : vector<16x44xf32>
    %16 = tpu.matmul %15, %13, %cst_13 {dimension_numbers = #tpu.dot_dimension_numbers<[1], [0], [0], [1], [0, 0, 1, 1], [], []>} : vector<16x8xbf16>, vector<8x44xbf16>, vector<16x44xf32> -> vector<16x44xf32>
    %17 = arith.addf %12, %16 : vector<16x44xf32>
    %c2_14 = arith.constant 2 : index
    %c0_15 = arith.constant 0 : index
    %c0_16 = arith.constant 0 : index
    %18 = vector.load %arg1[%c2_14, %c0_15, %c0_16] : memref<4x8x50xbf16, #tpu.memory_space<vmem>>, vector<1x8x50xbf16>
    %19 = vector.shape_cast %18 : vector<1x8x50xbf16> to vector<8x50xbf16>
    %20 = vector.extract_strided_slice %19 {offsets = [0, 0], sizes = [8, 44], strides = [1, 1]} : vector<8x50xbf16> to vector<8x44xbf16>
    %c3 = arith.constant 3 : index
    %c0_17 = arith.constant 0 : index
    %c0_18 = arith.constant 0 : index
    %21 = vector.load %arg2[%c3, %c0_17, %c0_18] : memref<9x16x8xbf16, #tpu.memory_space<vmem>>, vector<1x16x8xbf16>
    %22 = vector.shape_cast %21 : vector<1x16x8xbf16> to vector<16x8xbf16>
    %cst_19 = arith.constant dense<0.000000e+00> : vector<16x44xf32>
    %23 = tpu.matmul %22, %20, %cst_19 {dimension_numbers = #tpu.dot_dimension_numbers<[1], [0], [0], [1], [0, 0, 1, 1], [], []>} : vector<16x8xbf16>, vector<8x44xbf16>, vector<16x44xf32> -> vector<16x44xf32>
    %24 = arith.addf %17, %23 : vector<16x44xf32>
    %c3_20 = arith.constant 3 : index
    %c0_21 = arith.constant 0 : index
    %c0_22 = arith.constant 0 : index
    %25 = vector.load %arg1[%c3_20, %c0_21, %c0_22] : memref<4x8x50xbf16, #tpu.memory_space<vmem>>, vector<1x8x50xbf16>
    %26 = vector.shape_cast %25 : vector<1x8x50xbf16> to vector<8x50xbf16>
    %27 = vector.extract_strided_slice %26 {offsets = [0, 0], sizes = [8, 44], strides = [1, 1]} : vector<8x50xbf16> to vector<8x44xbf16>
    %c4 = arith.constant 4 : index
    %c0_23 = arith.constant 0 : index
    %c0_24 = arith.constant 0 : index
    %28 = vector.load %arg2[%c4, %c0_23, %c0_24] : memref<9x16x8xbf16, #tpu.memory_space<vmem>>, vector<1x16x8xbf16>
    %29 = vector.shape_cast %28 : vector<1x16x8xbf16> to vector<16x8xbf16>
    %cst_25 = arith.constant dense<0.000000e+00> : vector<16x44xf32>
    %30 = tpu.matmul %29, %27, %cst_25 {dimension_numbers = #tpu.dot_dimension_numbers<[1], [0], [0], [1], [0, 0, 1, 1], [], []>} : vector<16x8xbf16>, vector<8x44xbf16>, vector<16x44xf32> -> vector<16x44xf32>
    %31 = arith.addf %24, %30 : vector<16x44xf32>
    %32 = vector.extract_strided_slice %19 {offsets = [0, 1], sizes = [8, 44], strides = [1, 1]} : vector<8x50xbf16> to vector<8x44xbf16>
    %c5 = arith.constant 5 : index
    %c0_26 = arith.constant 0 : index
    %c0_27 = arith.constant 0 : index
    %33 = vector.load %arg2[%c5, %c0_26, %c0_27] : memref<9x16x8xbf16, #tpu.memory_space<vmem>>, vector<1x16x8xbf16>
    %34 = vector.shape_cast %33 : vector<1x16x8xbf16> to vector<16x8xbf16>
    %cst_28 = arith.constant dense<0.000000e+00> : vector<16x44xf32>
    %35 = tpu.matmul %34, %32, %cst_28 {dimension_numbers = #tpu.dot_dimension_numbers<[1], [0], [0], [1], [0, 0, 1, 1], [], []>} : vector<16x8xbf16>, vector<8x44xbf16>, vector<16x44xf32> -> vector<16x44xf32>
    %36 = arith.addf %31, %35 : vector<16x44xf32>
    %37 = vector.extract_strided_slice %1 {offsets = [0, 5], sizes = [8, 44], strides = [1, 1]} : vector<8x50xbf16> to vector<8x44xbf16>
    %c6 = arith.constant 6 : index
    %c0_29 = arith.constant 0 : index
    %c0_30 = arith.constant 0 : index
    %38 = vector.load %arg2[%c6, %c0_29, %c0_30] : memref<9x16x8xbf16, #tpu.memory_space<vmem>>, vector<1x16x8xbf16>
    %39 = vector.shape_cast %38 : vector<1x16x8xbf16> to vector<16x8xbf16>
    %cst_31 = arith.constant dense<0.000000e+00> : vector<16x44xf32>
    %40 = tpu.matmul %39, %37, %cst_31 {dimension_numbers = #tpu.dot_dimension_numbers<[1], [0], [0], [1], [0, 0, 1, 1], [], []>} : vector<16x8xbf16>, vector<8x44xbf16>, vector<16x44xf32> -> vector<16x44xf32>
    %41 = arith.addf %36, %40 : vector<16x44xf32>
    %42 = vector.extract_strided_slice %7 {offsets = [0, 5], sizes = [8, 44], strides = [1, 1]} : vector<8x50xbf16> to vector<8x44xbf16>
    %c7 = arith.constant 7 : index
    %c0_32 = arith.constant 0 : index
    %c0_33 = arith.constant 0 : index
    %43 = vector.load %arg2[%c7, %c0_32, %c0_33] : memref<9x16x8xbf16, #tpu.memory_space<vmem>>, vector<1x16x8xbf16>
    %44 = vector.shape_cast %43 : vector<1x16x8xbf16> to vector<16x8xbf16>
    %cst_34 = arith.constant dense<0.000000e+00> : vector<16x44xf32>
    %45 = tpu.matmul %44, %42, %cst_34 {dimension_numbers = #tpu.dot_dimension_numbers<[1], [0], [0], [1], [0, 0, 1, 1], [], []>} : vector<16x8xbf16>, vector<8x44xbf16>, vector<16x44xf32> -> vector<16x44xf32>
    %46 = arith.addf %41, %45 : vector<16x44xf32>
    %47 = vector.extract_strided_slice %1 {offsets = [0, 6], sizes = [8, 44], strides = [1, 1]} : vector<8x50xbf16> to vector<8x44xbf16>
    %c8 = arith.constant 8 : index
    %c0_35 = arith.constant 0 : index
    %c0_36 = arith.constant 0 : index
    %48 = vector.load %arg2[%c8, %c0_35, %c0_36] : memref<9x16x8xbf16, #tpu.memory_space<vmem>>, vector<1x16x8xbf16>
    %49 = vector.shape_cast %48 : vector<1x16x8xbf16> to vector<16x8xbf16>
    %cst_37 = arith.constant dense<0.000000e+00> : vector<16x44xf32>
    %50 = tpu.matmul %49, %47, %cst_37 {dimension_numbers = #tpu.dot_dimension_numbers<[1], [0], [0], [1], [0, 0, 1, 1], [], []>} : vector<16x8xbf16>, vector<8x44xbf16>, vector<16x44xf32> -> vector<16x44xf32>
    %51 = arith.addf %46, %50 : vector<16x44xf32>
    %c0_38 = arith.constant 0 : index
    %c0_39 = arith.constant 0 : index
    %52 = vector.load %arg7[%c0_38, %c0_39] : memref<16x44xf32, #tpu.memory_space<vmem>>, vector<16x44xf32>
    tpu.vector_store %arg7[%c0_38, %c0_39], %51 {strides = array<i32>} : memref<16x44xf32, #tpu.memory_space<vmem>>, vector<16x44xf32>,
    %c0_40 = arith.constant 0 : index
    %c0_41 = arith.constant 0 : index
    %53 = vector.load %arg7[%c0_40, %c0_41] : memref<16x44xf32, #tpu.memory_space<vmem>>, vector<16x44xf32>
    %c0_42 = arith.constant 0 : index
    %c0_43 = arith.constant 0 : index
    %54 = vector.load %arg5[%c0_42, %c0_43] : memref<1x44xf32, #tpu.memory_space<vmem>>, vector<1x44xf32>
    %55 = vector.broadcast %54 : vector<1x44xf32> to vector<16x44xf32>
    %56 = arith.mulf %53, %55 : vector<16x44xf32>
    %cst_44 = arith.constant dense<0.000000e+00> : vector<16xf32>
    %57 = vector.multi_reduction <add>, %56, %cst_44 [1] : vector<16x44xf32> to vector<16xf32>
    %58 = vector.shape_cast %57 : vector<16xf32> to vector<16x1xf32>
    %cst_45 = arith.constant 3.125000e-02 : f32
    %59 = vector.broadcast %cst_45 : f32 to vector<16x1xf32>
    %60 = arith.mulf %58, %59 : vector<16x1xf32>
    %61 = arith.mulf %56, %56 : vector<16x44xf32>
    %cst_46 = arith.constant dense<0.000000e+00> : vector<16xf32>
    %62 = vector.multi_reduction <add>, %61, %cst_46 [1] : vector<16x44xf32> to vector<16xf32>
    %63 = vector.shape_cast %62 : vector<16xf32> to vector<16x1xf32>
    %cst_47 = arith.constant 3.125000e-02 : f32
    %64 = vector.broadcast %cst_47 : f32 to vector<16x1xf32>
    %65 = arith.mulf %63, %64 : vector<16x1xf32>
    %66 = arith.mulf %60, %60 : vector<16x1xf32>
    %67 = arith.subf %65, %66 : vector<16x1xf32>
    %68 = vector.broadcast %60 : vector<16x1xf32> to vector<16x44xf32>
    %69 = arith.subf %53, %68 : vector<16x44xf32>
    %cst_48 = arith.constant 9.99999974E-6 : f32
    %70 = vector.broadcast %cst_48 : f32 to vector<16x1xf32>
    %71 = arith.addf %67, %70 : vector<16x1xf32>
    %72 = math.rsqrt %71 : vector<16x1xf32>
    %73 = vector.broadcast %72 : vector<16x1xf32> to vector<16x44xf32>
    %74 = arith.mulf %69, %73 : vector<16x44xf32>
    %c0_49 = arith.constant 0 : index
    %c0_50 = arith.constant 0 : index
    %75 = vector.load %arg3[%c0_49, %c0_50] : memref<16x1xf32, #tpu.memory_space<vmem>>, vector<16x1xf32>
    %76 = vector.broadcast %75 : vector<16x1xf32> to vector<16x44xf32>
    %77 = arith.mulf %74, %76 : vector<16x44xf32>
    %c0_51 = arith.constant 0 : index
    %c0_52 = arith.constant 0 : index
    %78 = vector.load %arg4[%c0_51, %c0_52] : memref<16x1xf32, #tpu.memory_space<vmem>>, vector<16x1xf32>
    %79 = vector.broadcast %78 : vector<16x1xf32> to vector<16x44xf32>
    %80 = arith.addf %77, %79 : vector<16x44xf32>
    %cst_53 = arith.constant 0.000000e+00 : f32
    %81 = vector.broadcast %cst_53 : f32 to vector<16x44xf32>
    %82 = arith.maximumf %80, %81 : vector<16x44xf32>
    %83 = arith.truncf %82 : vector<16x44xf32> to vector<16x44xbf16>
    %c0_54 = arith.constant 0 : index
    %c0_55 = arith.constant 0 : index
    %84 = vector.load %arg6[%c0_54, %c0_55] : memref<16x44xbf16, #tpu.memory_space<vmem>>, vector<16x44xbf16>
    tpu.vector_store %arg6[%c0_54, %c0_55], %83 {strides = array<i32>} : memref<16x44xbf16, #tpu.memory_space<vmem>>, vector<16x44xbf16>,
    return
  }
  func.func @transform_0(%arg0: i32) -> (i32, i32, i32) {
    %c0_i32 = arith.constant 0 : i32
    %c0_i32_0 = arith.constant 0 : i32
    %c0_i32_1 = arith.constant 0 : i32
    %c0_i32_2 = arith.constant 0 : i32
    return %c0_i32, %c0_i32_0, %c0_i32_1 : i32, i32, i32
  }
  func.func @transform_1(%arg0: i32) -> (i32, i32, i32) {
    %c0_i32 = arith.constant 0 : i32
    %c0_i32_0 = arith.constant 0 : i32
    %c0_i32_1 = arith.constant 0 : i32
    %c0_i32_2 = arith.constant 0 : i32
    return %c0_i32, %c0_i32_0, %c0_i32_1 : i32, i32, i32
  }
  func.func @transform_2(%arg0: i32) -> (i32, i32) {
    %c0_i32 = arith.constant 0 : i32
    %c0_i32_0 = arith.constant 0 : i32
    %c0_i32_1 = arith.constant 0 : i32
    return %c0_i32, %c0_i32_0 : i32, i32
  }
  func.func @transform_3(%arg0: i32) -> (i32, i32) {
    %c0_i32 = arith.constant 0 : i32
    %c0_i32_0 = arith.constant 0 : i32
    %c0_i32_1 = arith.constant 0 : i32
    return %c0_i32, %c0_i32_0 : i32, i32
  }
  func.func @transform_4(%arg0: i32) -> (i32, i32) {
    %c0_i32 = arith.constant 0 : i32
    %c0_i32_0 = arith.constant 0 : i32
    %c0_i32_1 = arith.constant 0 : i32
    return %c0_i32, %c0_i32_0 : i32, i32
  }
  func.func @transform_5(%arg0: i32) -> (i32, i32) {
    %c0_i32 = arith.constant 0 : i32
    %c0_i32_0 = arith.constant 0 : i32
    %c0_i32_1 = arith.constant 0 : i32
    return %c0_i32, %c0_i32_0 : i32, i32
  }
}

module attributes {stable_mosaic.version = 11 : i64} {
  func.func @_conv_bn_act_kernel(%arg0: i32, %arg1: memref<4x16x18xbf16, #tpu.memory_space<vmem>>, %arg2: memref<9x32x16xbf16, #tpu.memory_space<vmem>>, %arg3: memref<32x1xf32, #tpu.memory_space<vmem>>, %arg4: memref<32x1xf32, #tpu.memory_space<vmem>>, %arg5: memref<1x14xf32, #tpu.memory_space<vmem>>, %arg6: memref<32x14xbf16, #tpu.memory_space<vmem>>, %arg7: memref<32x14xf32, #tpu.memory_space<vmem>>) attributes {dimension_semantics = [#tpu.dimension_semantics<arbitrary>], iteration_bounds = array<i64: 1>, scalar_prefetch = 0 : i64, scratch_operands = 1 : i64, tpu.core_type = #tpu.core_type<tc>, window_params = [{pipeline_mode = #tpu.pipeline_mode<synchronous>, transform_indices = @transform_0, window_bounds = array<i64: 4, 16, 18>}, {pipeline_mode = #tpu.pipeline_mode<synchronous>, transform_indices = @transform_1, window_bounds = array<i64: 9, 32, 16>}, {pipeline_mode = #tpu.pipeline_mode<synchronous>, transform_indices = @transform_2, window_bounds = array<i64: 32, 1>}, {pipeline_mode = #tpu.pipeline_mode<synchronous>, transform_indices = @transform_3, window_bounds = array<i64: 32, 1>}, {pipeline_mode = #tpu.pipeline_mode<synchronous>, transform_indices = @transform_4, window_bounds = array<i64: 1, 14>}, {pipeline_mode = #tpu.pipeline_mode<synchronous>, transform_indices = @transform_5, window_bounds = array<i64: 32, 14>}]} {
    %c0 = arith.constant 0 : index
    %c0_0 = arith.constant 0 : index
    %c0_1 = arith.constant 0 : index
    %0 = vector.load %arg1[%c0, %c0_0, %c0_1] : memref<4x16x18xbf16, #tpu.memory_space<vmem>>, vector<1x16x18xbf16>
    %1 = vector.shape_cast %0 : vector<1x16x18xbf16> to vector<16x18xbf16>
    %2 = vector.extract_strided_slice %1 {offsets = [0, 0], sizes = [16, 14], strides = [1, 1]} : vector<16x18xbf16> to vector<16x14xbf16>
    %c0_2 = arith.constant 0 : index
    %c0_3 = arith.constant 0 : index
    %c0_4 = arith.constant 0 : index
    %3 = vector.load %arg2[%c0_2, %c0_3, %c0_4] : memref<9x32x16xbf16, #tpu.memory_space<vmem>>, vector<1x32x16xbf16>
    %4 = vector.shape_cast %3 : vector<1x32x16xbf16> to vector<32x16xbf16>
    %cst = arith.constant dense<0.000000e+00> : vector<32x14xf32>
    %5 = tpu.matmul %4, %2, %cst {dimension_numbers = #tpu.dot_dimension_numbers<[1], [0], [0], [1], [0, 0, 1, 1], [], []>} : vector<32x16xbf16>, vector<16x14xbf16>, vector<32x14xf32> -> vector<32x14xf32>
    %c1 = arith.constant 1 : index
    %c0_5 = arith.constant 0 : index
    %c0_6 = arith.constant 0 : index
    %6 = vector.load %arg1[%c1, %c0_5, %c0_6] : memref<4x16x18xbf16, #tpu.memory_space<vmem>>, vector<1x16x18xbf16>
    %7 = vector.shape_cast %6 : vector<1x16x18xbf16> to vector<16x18xbf16>
    %8 = vector.extract_strided_slice %7 {offsets = [0, 0], sizes = [16, 14], strides = [1, 1]} : vector<16x18xbf16> to vector<16x14xbf16>
    %c1_7 = arith.constant 1 : index
    %c0_8 = arith.constant 0 : index
    %c0_9 = arith.constant 0 : index
    %9 = vector.load %arg2[%c1_7, %c0_8, %c0_9] : memref<9x32x16xbf16, #tpu.memory_space<vmem>>, vector<1x32x16xbf16>
    %10 = vector.shape_cast %9 : vector<1x32x16xbf16> to vector<32x16xbf16>
    %cst_10 = arith.constant dense<0.000000e+00> : vector<32x14xf32>
    %11 = tpu.matmul %10, %8, %cst_10 {dimension_numbers = #tpu.dot_dimension_numbers<[1], [0], [0], [1], [0, 0, 1, 1], [], []>} : vector<32x16xbf16>, vector<16x14xbf16>, vector<32x14xf32> -> vector<32x14xf32>
    %12 = arith.addf %5, %11 : vector<32x14xf32>
    %13 = vector.extract_strided_slice %1 {offsets = [0, 1], sizes = [16, 14], strides = [1, 1]} : vector<16x18xbf16> to vector<16x14xbf16>
    %c2 = arith.constant 2 : index
    %c0_11 = arith.constant 0 : index
    %c0_12 = arith.constant 0 : index
    %14 = vector.load %arg2[%c2, %c0_11, %c0_12] : memref<9x32x16xbf16, #tpu.memory_space<vmem>>, vector<1x32x16xbf16>
    %15 = vector.shape_cast %14 : vector<1x32x16xbf16> to vector<32x16xbf16>
    %cst_13 = arith.constant dense<0.000000e+00> : vector<32x14xf32>
    %16 = tpu.matmul %15, %13, %cst_13 {dimension_numbers = #tpu.dot_dimension_numbers<[1], [0], [0], [1], [0, 0, 1, 1], [], []>} : vector<32x16xbf16>, vector<16x14xbf16>, vector<32x14xf32> -> vector<32x14xf32>
    %17 = arith.addf %12, %16 : vector<32x14xf32>
    %c2_14 = arith.constant 2 : index
    %c0_15 = arith.constant 0 : index
    %c0_16 = arith.constant 0 : index
    %18 = vector.load %arg1[%c2_14, %c0_15, %c0_16] : memref<4x16x18xbf16, #tpu.memory_space<vmem>>, vector<1x16x18xbf16>
    %19 = vector.shape_cast %18 : vector<1x16x18xbf16> to vector<16x18xbf16>
    %20 = vector.extract_strided_slice %19 {offsets = [0, 0], sizes = [16, 14], strides = [1, 1]} : vector<16x18xbf16> to vector<16x14xbf16>
    %c3 = arith.constant 3 : index
    %c0_17 = arith.constant 0 : index
    %c0_18 = arith.constant 0 : index
    %21 = vector.load %arg2[%c3, %c0_17, %c0_18] : memref<9x32x16xbf16, #tpu.memory_space<vmem>>, vector<1x32x16xbf16>
    %22 = vector.shape_cast %21 : vector<1x32x16xbf16> to vector<32x16xbf16>
    %cst_19 = arith.constant dense<0.000000e+00> : vector<32x14xf32>
    %23 = tpu.matmul %22, %20, %cst_19 {dimension_numbers = #tpu.dot_dimension_numbers<[1], [0], [0], [1], [0, 0, 1, 1], [], []>} : vector<32x16xbf16>, vector<16x14xbf16>, vector<32x14xf32> -> vector<32x14xf32>
    %24 = arith.addf %17, %23 : vector<32x14xf32>
    %c3_20 = arith.constant 3 : index
    %c0_21 = arith.constant 0 : index
    %c0_22 = arith.constant 0 : index
    %25 = vector.load %arg1[%c3_20, %c0_21, %c0_22] : memref<4x16x18xbf16, #tpu.memory_space<vmem>>, vector<1x16x18xbf16>
    %26 = vector.shape_cast %25 : vector<1x16x18xbf16> to vector<16x18xbf16>
    %27 = vector.extract_strided_slice %26 {offsets = [0, 0], sizes = [16, 14], strides = [1, 1]} : vector<16x18xbf16> to vector<16x14xbf16>
    %c4 = arith.constant 4 : index
    %c0_23 = arith.constant 0 : index
    %c0_24 = arith.constant 0 : index
    %28 = vector.load %arg2[%c4, %c0_23, %c0_24] : memref<9x32x16xbf16, #tpu.memory_space<vmem>>, vector<1x32x16xbf16>
    %29 = vector.shape_cast %28 : vector<1x32x16xbf16> to vector<32x16xbf16>
    %cst_25 = arith.constant dense<0.000000e+00> : vector<32x14xf32>
    %30 = tpu.matmul %29, %27, %cst_25 {dimension_numbers = #tpu.dot_dimension_numbers<[1], [0], [0], [1], [0, 0, 1, 1], [], []>} : vector<32x16xbf16>, vector<16x14xbf16>, vector<32x14xf32> -> vector<32x14xf32>
    %31 = arith.addf %24, %30 : vector<32x14xf32>
    %32 = vector.extract_strided_slice %19 {offsets = [0, 1], sizes = [16, 14], strides = [1, 1]} : vector<16x18xbf16> to vector<16x14xbf16>
    %c5 = arith.constant 5 : index
    %c0_26 = arith.constant 0 : index
    %c0_27 = arith.constant 0 : index
    %33 = vector.load %arg2[%c5, %c0_26, %c0_27] : memref<9x32x16xbf16, #tpu.memory_space<vmem>>, vector<1x32x16xbf16>
    %34 = vector.shape_cast %33 : vector<1x32x16xbf16> to vector<32x16xbf16>
    %cst_28 = arith.constant dense<0.000000e+00> : vector<32x14xf32>
    %35 = tpu.matmul %34, %32, %cst_28 {dimension_numbers = #tpu.dot_dimension_numbers<[1], [0], [0], [1], [0, 0, 1, 1], [], []>} : vector<32x16xbf16>, vector<16x14xbf16>, vector<32x14xf32> -> vector<32x14xf32>
    %36 = arith.addf %31, %35 : vector<32x14xf32>
    %37 = vector.extract_strided_slice %1 {offsets = [0, 3], sizes = [16, 14], strides = [1, 1]} : vector<16x18xbf16> to vector<16x14xbf16>
    %c6 = arith.constant 6 : index
    %c0_29 = arith.constant 0 : index
    %c0_30 = arith.constant 0 : index
    %38 = vector.load %arg2[%c6, %c0_29, %c0_30] : memref<9x32x16xbf16, #tpu.memory_space<vmem>>, vector<1x32x16xbf16>
    %39 = vector.shape_cast %38 : vector<1x32x16xbf16> to vector<32x16xbf16>
    %cst_31 = arith.constant dense<0.000000e+00> : vector<32x14xf32>
    %40 = tpu.matmul %39, %37, %cst_31 {dimension_numbers = #tpu.dot_dimension_numbers<[1], [0], [0], [1], [0, 0, 1, 1], [], []>} : vector<32x16xbf16>, vector<16x14xbf16>, vector<32x14xf32> -> vector<32x14xf32>
    %41 = arith.addf %36, %40 : vector<32x14xf32>
    %42 = vector.extract_strided_slice %7 {offsets = [0, 3], sizes = [16, 14], strides = [1, 1]} : vector<16x18xbf16> to vector<16x14xbf16>
    %c7 = arith.constant 7 : index
    %c0_32 = arith.constant 0 : index
    %c0_33 = arith.constant 0 : index
    %43 = vector.load %arg2[%c7, %c0_32, %c0_33] : memref<9x32x16xbf16, #tpu.memory_space<vmem>>, vector<1x32x16xbf16>
    %44 = vector.shape_cast %43 : vector<1x32x16xbf16> to vector<32x16xbf16>
    %cst_34 = arith.constant dense<0.000000e+00> : vector<32x14xf32>
    %45 = tpu.matmul %44, %42, %cst_34 {dimension_numbers = #tpu.dot_dimension_numbers<[1], [0], [0], [1], [0, 0, 1, 1], [], []>} : vector<32x16xbf16>, vector<16x14xbf16>, vector<32x14xf32> -> vector<32x14xf32>
    %46 = arith.addf %41, %45 : vector<32x14xf32>
    %47 = vector.extract_strided_slice %1 {offsets = [0, 4], sizes = [16, 14], strides = [1, 1]} : vector<16x18xbf16> to vector<16x14xbf16>
    %c8 = arith.constant 8 : index
    %c0_35 = arith.constant 0 : index
    %c0_36 = arith.constant 0 : index
    %48 = vector.load %arg2[%c8, %c0_35, %c0_36] : memref<9x32x16xbf16, #tpu.memory_space<vmem>>, vector<1x32x16xbf16>
    %49 = vector.shape_cast %48 : vector<1x32x16xbf16> to vector<32x16xbf16>
    %cst_37 = arith.constant dense<0.000000e+00> : vector<32x14xf32>
    %50 = tpu.matmul %49, %47, %cst_37 {dimension_numbers = #tpu.dot_dimension_numbers<[1], [0], [0], [1], [0, 0, 1, 1], [], []>} : vector<32x16xbf16>, vector<16x14xbf16>, vector<32x14xf32> -> vector<32x14xf32>
    %51 = arith.addf %46, %50 : vector<32x14xf32>
    %c0_38 = arith.constant 0 : index
    %c0_39 = arith.constant 0 : index
    %52 = vector.load %arg7[%c0_38, %c0_39] : memref<32x14xf32, #tpu.memory_space<vmem>>, vector<32x14xf32>
    tpu.vector_store %arg7[%c0_38, %c0_39], %51 {strides = array<i32>} : memref<32x14xf32, #tpu.memory_space<vmem>>, vector<32x14xf32>,
    %c0_40 = arith.constant 0 : index
    %c0_41 = arith.constant 0 : index
    %53 = vector.load %arg7[%c0_40, %c0_41] : memref<32x14xf32, #tpu.memory_space<vmem>>, vector<32x14xf32>
    %c0_42 = arith.constant 0 : index
    %c0_43 = arith.constant 0 : index
    %54 = vector.load %arg5[%c0_42, %c0_43] : memref<1x14xf32, #tpu.memory_space<vmem>>, vector<1x14xf32>
    %55 = vector.broadcast %54 : vector<1x14xf32> to vector<32x14xf32>
    %56 = arith.mulf %53, %55 : vector<32x14xf32>
    %cst_44 = arith.constant dense<0.000000e+00> : vector<32xf32>
    %57 = vector.multi_reduction <add>, %56, %cst_44 [1] : vector<32x14xf32> to vector<32xf32>
    %58 = vector.shape_cast %57 : vector<32xf32> to vector<32x1xf32>
    %cst_45 = arith.constant 1.250000e-01 : f32
    %59 = vector.broadcast %cst_45 : f32 to vector<32x1xf32>
    %60 = arith.mulf %58, %59 : vector<32x1xf32>
    %61 = arith.mulf %56, %56 : vector<32x14xf32>
    %cst_46 = arith.constant dense<0.000000e+00> : vector<32xf32>
    %62 = vector.multi_reduction <add>, %61, %cst_46 [1] : vector<32x14xf32> to vector<32xf32>
    %63 = vector.shape_cast %62 : vector<32xf32> to vector<32x1xf32>
    %cst_47 = arith.constant 1.250000e-01 : f32
    %64 = vector.broadcast %cst_47 : f32 to vector<32x1xf32>
    %65 = arith.mulf %63, %64 : vector<32x1xf32>
    %66 = arith.mulf %60, %60 : vector<32x1xf32>
    %67 = arith.subf %65, %66 : vector<32x1xf32>
    %68 = vector.broadcast %60 : vector<32x1xf32> to vector<32x14xf32>
    %69 = arith.subf %53, %68 : vector<32x14xf32>
    %cst_48 = arith.constant 9.99999974E-6 : f32
    %70 = vector.broadcast %cst_48 : f32 to vector<32x1xf32>
    %71 = arith.addf %67, %70 : vector<32x1xf32>
    %72 = math.rsqrt %71 : vector<32x1xf32>
    %73 = vector.broadcast %72 : vector<32x1xf32> to vector<32x14xf32>
    %74 = arith.mulf %69, %73 : vector<32x14xf32>
    %c0_49 = arith.constant 0 : index
    %c0_50 = arith.constant 0 : index
    %75 = vector.load %arg3[%c0_49, %c0_50] : memref<32x1xf32, #tpu.memory_space<vmem>>, vector<32x1xf32>
    %76 = vector.broadcast %75 : vector<32x1xf32> to vector<32x14xf32>
    %77 = arith.mulf %74, %76 : vector<32x14xf32>
    %c0_51 = arith.constant 0 : index
    %c0_52 = arith.constant 0 : index
    %78 = vector.load %arg4[%c0_51, %c0_52] : memref<32x1xf32, #tpu.memory_space<vmem>>, vector<32x1xf32>
    %79 = vector.broadcast %78 : vector<32x1xf32> to vector<32x14xf32>
    %80 = arith.addf %77, %79 : vector<32x14xf32>
    %cst_53 = arith.constant 0.000000e+00 : f32
    %81 = vector.broadcast %cst_53 : f32 to vector<32x14xf32>
    %82 = arith.maximumf %80, %81 : vector<32x14xf32>
    %83 = arith.truncf %82 : vector<32x14xf32> to vector<32x14xbf16>
    %c0_54 = arith.constant 0 : index
    %c0_55 = arith.constant 0 : index
    %84 = vector.load %arg6[%c0_54, %c0_55] : memref<32x14xbf16, #tpu.memory_space<vmem>>, vector<32x14xbf16>
    tpu.vector_store %arg6[%c0_54, %c0_55], %83 {strides = array<i32>} : memref<32x14xbf16, #tpu.memory_space<vmem>>, vector<32x14xbf16>,
    return
  }
  func.func @transform_0(%arg0: i32) -> (i32, i32, i32) {
    %c0_i32 = arith.constant 0 : i32
    %c0_i32_0 = arith.constant 0 : i32
    %c0_i32_1 = arith.constant 0 : i32
    %c0_i32_2 = arith.constant 0 : i32
    return %c0_i32, %c0_i32_0, %c0_i32_1 : i32, i32, i32
  }
  func.func @transform_1(%arg0: i32) -> (i32, i32, i32) {
    %c0_i32 = arith.constant 0 : i32
    %c0_i32_0 = arith.constant 0 : i32
    %c0_i32_1 = arith.constant 0 : i32
    %c0_i32_2 = arith.constant 0 : i32
    return %c0_i32, %c0_i32_0, %c0_i32_1 : i32, i32, i32
  }
  func.func @transform_2(%arg0: i32) -> (i32, i32) {
    %c0_i32 = arith.constant 0 : i32
    %c0_i32_0 = arith.constant 0 : i32
    %c0_i32_1 = arith.constant 0 : i32
    return %c0_i32, %c0_i32_0 : i32, i32
  }
  func.func @transform_3(%arg0: i32) -> (i32, i32) {
    %c0_i32 = arith.constant 0 : i32
    %c0_i32_0 = arith.constant 0 : i32
    %c0_i32_1 = arith.constant 0 : i32
    return %c0_i32, %c0_i32_0 : i32, i32
  }
  func.func @transform_4(%arg0: i32) -> (i32, i32) {
    %c0_i32 = arith.constant 0 : i32
    %c0_i32_0 = arith.constant 0 : i32
    %c0_i32_1 = arith.constant 0 : i32
    return %c0_i32, %c0_i32_0 : i32, i32
  }
  func.func @transform_5(%arg0: i32) -> (i32, i32) {
    %c0_i32 = arith.constant 0 : i32
    %c0_i32_0 = arith.constant 0 : i32
    %c0_i32_1 = arith.constant 0 : i32
    return %c0_i32, %c0_i32_0 : i32, i32
  }
}

module attributes {stable_mosaic.version = 11 : i64} {
  func.func @_latent_kernel(%arg0: i32, %arg1: memref<128x2xbf16, #tpu.memory_space<vmem>>, %arg2: memref<32x128xbf16, #tpu.memory_space<vmem>>, %arg3: memref<32x1xf32, #tpu.memory_space<vmem>>, %arg4: memref<16x2xf32, #tpu.memory_space<vmem>>, %arg5: memref<128x16xbf16, #tpu.memory_space<vmem>>, %arg6: memref<128x1xf32, #tpu.memory_space<vmem>>, %arg7: memref<32x2xf32, #tpu.memory_space<vmem>>, %arg8: memref<16x2xf32, #tpu.memory_space<vmem>>, %arg9: memref<128x2xf32, #tpu.memory_space<vmem>>) attributes {dimension_semantics = [#tpu.dimension_semantics<arbitrary>], iteration_bounds = array<i64: 1>, scalar_prefetch = 0 : i64, scratch_operands = 0 : i64, tpu.core_type = #tpu.core_type<tc>, window_params = [{pipeline_mode = #tpu.pipeline_mode<synchronous>, transform_indices = @transform_0, window_bounds = array<i64: 128, 2>}, {pipeline_mode = #tpu.pipeline_mode<synchronous>, transform_indices = @transform_1, window_bounds = array<i64: 32, 128>}, {pipeline_mode = #tpu.pipeline_mode<synchronous>, transform_indices = @transform_2, window_bounds = array<i64: 32, 1>}, {pipeline_mode = #tpu.pipeline_mode<synchronous>, transform_indices = @transform_3, window_bounds = array<i64: 16, 2>}, {pipeline_mode = #tpu.pipeline_mode<synchronous>, transform_indices = @transform_4, window_bounds = array<i64: 128, 16>}, {pipeline_mode = #tpu.pipeline_mode<synchronous>, transform_indices = @transform_5, window_bounds = array<i64: 128, 1>}, {pipeline_mode = #tpu.pipeline_mode<synchronous>, transform_indices = @transform_6, window_bounds = array<i64: 32, 2>}, {pipeline_mode = #tpu.pipeline_mode<synchronous>, transform_indices = @transform_7, window_bounds = array<i64: 16, 2>}, {pipeline_mode = #tpu.pipeline_mode<synchronous>, transform_indices = @transform_8, window_bounds = array<i64: 128, 2>}]} {
    %c0 = arith.constant 0 : index
    %c0_0 = arith.constant 0 : index
    %0 = vector.load %arg2[%c0, %c0_0] : memref<32x128xbf16, #tpu.memory_space<vmem>>, vector<32x128xbf16>
    %c0_1 = arith.constant 0 : index
    %c0_2 = arith.constant 0 : index
    %1 = vector.load %arg1[%c0_1, %c0_2] : memref<128x2xbf16, #tpu.memory_space<vmem>>, vector<128x2xbf16>
    %cst = arith.constant dense<0.000000e+00> : vector<32x2xf32>
    %2 = tpu.matmul %0, %1, %cst {dimension_numbers = #tpu.dot_dimension_numbers<[1], [0], [0], [1], [0, 0, 1, 1], [], []>} : vector<32x128xbf16>, vector<128x2xbf16>, vector<32x2xf32> -> vector<32x2xf32>
    %c0_3 = arith.constant 0 : index
    %c0_4 = arith.constant 0 : index
    %3 = vector.load %arg3[%c0_3, %c0_4] : memref<32x1xf32, #tpu.memory_space<vmem>>, vector<32x1xf32>
    %4 = vector.broadcast %3 : vector<32x1xf32> to vector<32x2xf32>
    %5 = arith.addf %2, %4 : vector<32x2xf32>
    %6 = vector.extract_strided_slice %5 {offsets = [0, 0], sizes = [16, 2], strides = [1, 1]} : vector<32x2xf32> to vector<16x2xf32>
    %7 = vector.extract_strided_slice %5 {offsets = [16, 0], sizes = [16, 2], strides = [1, 1]} : vector<32x2xf32> to vector<16x2xf32>
    %c0_5 = arith.constant 0 : index
    %c0_6 = arith.constant 0 : index
    %8 = vector.load %arg4[%c0_5, %c0_6] : memref<16x2xf32, #tpu.memory_space<vmem>>, vector<16x2xf32>
    %cst_7 = arith.constant 5.000000e-01 : f32
    %9 = vector.broadcast %cst_7 : f32 to vector<16x2xf32>
    %10 = arith.mulf %9, %7 : vector<16x2xf32>
    %11 = math.exp %10 : vector<16x2xf32>
    %12 = arith.mulf %8, %11 : vector<16x2xf32>
    %13 = arith.addf %12, %6 : vector<16x2xf32>
    %c0_8 = arith.constant 0 : index
    %c0_9 = arith.constant 0 : index
    %14 = vector.load %arg5[%c0_8, %c0_9] : memref<128x16xbf16, #tpu.memory_space<vmem>>, vector<128x16xbf16>
    %15 = arith.truncf %13 : vector<16x2xf32> to vector<16x2xbf16>
    %cst_10 = arith.constant dense<0.000000e+00> : vector<128x2xf32>
    %16 = tpu.matmul %14, %15, %cst_10 {dimension_numbers = #tpu.dot_dimension_numbers<[1], [0], [0], [1], [0, 0, 1, 1], [], []>} : vector<128x16xbf16>, vector<16x2xbf16>, vector<128x2xf32> -> vector<128x2xf32>
    %c0_11 = arith.constant 0 : index
    %c0_12 = arith.constant 0 : index
    %17 = vector.load %arg6[%c0_11, %c0_12] : memref<128x1xf32, #tpu.memory_space<vmem>>, vector<128x1xf32>
    %18 = vector.broadcast %17 : vector<128x1xf32> to vector<128x2xf32>
    %19 = arith.addf %16, %18 : vector<128x2xf32>
    %c0_13 = arith.constant 0 : index
    %c0_14 = arith.constant 0 : index
    %20 = vector.load %arg7[%c0_13, %c0_14] : memref<32x2xf32, #tpu.memory_space<vmem>>, vector<32x2xf32>
    tpu.vector_store %arg7[%c0_13, %c0_14], %5 {strides = array<i32>} : memref<32x2xf32, #tpu.memory_space<vmem>>, vector<32x2xf32>,
    %c0_15 = arith.constant 0 : index
    %c0_16 = arith.constant 0 : index
    %21 = vector.load %arg8[%c0_15, %c0_16] : memref<16x2xf32, #tpu.memory_space<vmem>>, vector<16x2xf32>
    tpu.vector_store %arg8[%c0_15, %c0_16], %13 {strides = array<i32>} : memref<16x2xf32, #tpu.memory_space<vmem>>, vector<16x2xf32>,
    %c0_17 = arith.constant 0 : index
    %c0_18 = arith.constant 0 : index
    %22 = vector.load %arg9[%c0_17, %c0_18] : memref<128x2xf32, #tpu.memory_space<vmem>>, vector<128x2xf32>
    tpu.vector_store %arg9[%c0_17, %c0_18], %19 {strides = array<i32>} : memref<128x2xf32, #tpu.memory_space<vmem>>, vector<128x2xf32>,
    return
  }
  func.func @transform_0(%arg0: i32) -> (i32, i32) {
    %c0_i32 = arith.constant 0 : i32
    %c0_i32_0 = arith.constant 0 : i32
    %c0_i32_1 = arith.constant 0 : i32
    return %c0_i32, %c0_i32_0 : i32, i32
  }
  func.func @transform_1(%arg0: i32) -> (i32, i32) {
    %c0_i32 = arith.constant 0 : i32
    %c0_i32_0 = arith.constant 0 : i32
    %c0_i32_1 = arith.constant 0 : i32
    return %c0_i32, %c0_i32_0 : i32, i32
  }
  func.func @transform_2(%arg0: i32) -> (i32, i32) {
    %c0_i32 = arith.constant 0 : i32
    %c0_i32_0 = arith.constant 0 : i32
    %c0_i32_1 = arith.constant 0 : i32
    return %c0_i32, %c0_i32_0 : i32, i32
  }
  func.func @transform_3(%arg0: i32) -> (i32, i32) {
    %c0_i32 = arith.constant 0 : i32
    %c0_i32_0 = arith.constant 0 : i32
    %c0_i32_1 = arith.constant 0 : i32
    return %c0_i32, %c0_i32_0 : i32, i32
  }
  func.func @transform_4(%arg0: i32) -> (i32, i32) {
    %c0_i32 = arith.constant 0 : i32
    %c0_i32_0 = arith.constant 0 : i32
    %c0_i32_1 = arith.constant 0 : i32
    return %c0_i32, %c0_i32_0 : i32, i32
  }
  func.func @transform_5(%arg0: i32) -> (i32, i32) {
    %c0_i32 = arith.constant 0 : i32
    %c0_i32_0 = arith.constant 0 : i32
    %c0_i32_1 = arith.constant 0 : i32
    return %c0_i32, %c0_i32_0 : i32, i32
  }
  func.func @transform_6(%arg0: i32) -> (i32, i32) {
    %c0_i32 = arith.constant 0 : i32
    %c0_i32_0 = arith.constant 0 : i32
    %c0_i32_1 = arith.constant 0 : i32
    return %c0_i32, %c0_i32_0 : i32, i32
  }
  func.func @transform_7(%arg0: i32) -> (i32, i32) {
    %c0_i32 = arith.constant 0 : i32
    %c0_i32_0 = arith.constant 0 : i32
    %c0_i32_1 = arith.constant 0 : i32
    return %c0_i32, %c0_i32_0 : i32, i32
  }
  func.func @transform_8(%arg0: i32) -> (i32, i32) {
    %c0_i32 = arith.constant 0 : i32
    %c0_i32_0 = arith.constant 0 : i32
    %c0_i32_1 = arith.constant 0 : i32
    return %c0_i32, %c0_i32_0 : i32, i32
  }
}

module attributes {stable_mosaic.version = 11 : i64} {
  func.func @_conv_bn_act_kernel(%arg0: i32, %arg1: memref<1x32x18xbf16, #tpu.memory_space<vmem>>, %arg2: memref<9x16x32xbf16, #tpu.memory_space<vmem>>, %arg3: memref<16x1xf32, #tpu.memory_space<vmem>>, %arg4: memref<16x1xf32, #tpu.memory_space<vmem>>, %arg5: memref<1x56xf32, #tpu.memory_space<vmem>>, %arg6: memref<16x56xbf16, #tpu.memory_space<vmem>>, %arg7: memref<16x56xf32, #tpu.memory_space<vmem>>) attributes {dimension_semantics = [#tpu.dimension_semantics<arbitrary>], iteration_bounds = array<i64: 1>, scalar_prefetch = 0 : i64, scratch_operands = 1 : i64, tpu.core_type = #tpu.core_type<tc>, window_params = [{pipeline_mode = #tpu.pipeline_mode<synchronous>, transform_indices = @transform_0, window_bounds = array<i64: 1, 32, 18>}, {pipeline_mode = #tpu.pipeline_mode<synchronous>, transform_indices = @transform_1, window_bounds = array<i64: 9, 16, 32>}, {pipeline_mode = #tpu.pipeline_mode<synchronous>, transform_indices = @transform_2, window_bounds = array<i64: 16, 1>}, {pipeline_mode = #tpu.pipeline_mode<synchronous>, transform_indices = @transform_3, window_bounds = array<i64: 16, 1>}, {pipeline_mode = #tpu.pipeline_mode<synchronous>, transform_indices = @transform_4, window_bounds = array<i64: 1, 56>}, {pipeline_mode = #tpu.pipeline_mode<synchronous>, transform_indices = @transform_5, window_bounds = array<i64: 16, 56>}]} {
    %c0 = arith.constant 0 : index
    %c0_0 = arith.constant 0 : index
    %c0_1 = arith.constant 0 : index
    %0 = vector.load %arg1[%c0, %c0_0, %c0_1] : memref<1x32x18xbf16, #tpu.memory_space<vmem>>, vector<1x32x18xbf16>
    %1 = vector.shape_cast %0 : vector<1x32x18xbf16> to vector<32x18xbf16>
    %2 = vector.extract_strided_slice %1 {offsets = [0, 0], sizes = [32, 14], strides = [1, 1]} : vector<32x18xbf16> to vector<32x14xbf16>
    %c0_2 = arith.constant 0 : index
    %c0_3 = arith.constant 0 : index
    %c0_4 = arith.constant 0 : index
    %3 = vector.load %arg2[%c0_2, %c0_3, %c0_4] : memref<9x16x32xbf16, #tpu.memory_space<vmem>>, vector<1x16x32xbf16>
    %4 = vector.shape_cast %3 : vector<1x16x32xbf16> to vector<16x32xbf16>
    %cst = arith.constant dense<0.000000e+00> : vector<16x14xf32>
    %5 = tpu.matmul %4, %2, %cst {dimension_numbers = #tpu.dot_dimension_numbers<[1], [0], [0], [1], [0, 0, 1, 1], [], []>} : vector<16x32xbf16>, vector<32x14xbf16>, vector<16x14xf32> -> vector<16x14xf32>
    %c0_5 = arith.constant 0 : index
    %c0_6 = arith.constant 0 : index
    %6 = vector.load %arg7[%c0_5, %c0_6] : memref<16x56xf32, #tpu.memory_space<vmem>>, vector<16x14xf32>
    tpu.vector_store %arg7[%c0_5, %c0_6], %5 {strides = array<i32>} : memref<16x56xf32, #tpu.memory_space<vmem>>, vector<16x14xf32>,
    %7 = vector.extract_strided_slice %1 {offsets = [0, 1], sizes = [32, 14], strides = [1, 1]} : vector<32x18xbf16> to vector<32x14xbf16>
    %c1 = arith.constant 1 : index
    %c0_7 = arith.constant 0 : index
    %c0_8 = arith.constant 0 : index
    %8 = vector.load %arg2[%c1, %c0_7, %c0_8] : memref<9x16x32xbf16, #tpu.memory_space<vmem>>, vector<1x16x32xbf16>
    %9 = vector.shape_cast %8 : vector<1x16x32xbf16> to vector<16x32xbf16>
    %cst_9 = arith.constant dense<0.000000e+00> : vector<16x14xf32>
    %10 = tpu.matmul %9, %7, %cst_9 {dimension_numbers = #tpu.dot_dimension_numbers<[1], [0], [0], [1], [0, 0, 1, 1], [], []>} : vector<16x32xbf16>, vector<32x14xbf16>, vector<16x14xf32> -> vector<16x14xf32>
    %11 = vector.extract_strided_slice %1 {offsets = [0, 0], sizes = [32, 14], strides = [1, 1]} : vector<32x18xbf16> to vector<32x14xbf16>
    %c2 = arith.constant 2 : index
    %c0_10 = arith.constant 0 : index
    %c0_11 = arith.constant 0 : index
    %12 = vector.load %arg2[%c2, %c0_10, %c0_11] : memref<9x16x32xbf16, #tpu.memory_space<vmem>>, vector<1x16x32xbf16>
    %13 = vector.shape_cast %12 : vector<1x16x32xbf16> to vector<16x32xbf16>
    %cst_12 = arith.constant dense<0.000000e+00> : vector<16x14xf32>
    %14 = tpu.matmul %13, %11, %cst_12 {dimension_numbers = #tpu.dot_dimension_numbers<[1], [0], [0], [1], [0, 0, 1, 1], [], []>} : vector<16x32xbf16>, vector<32x14xbf16>, vector<16x14xf32> -> vector<16x14xf32>
    %15 = arith.addf %10, %14 : vector<16x14xf32>
    %c0_13 = arith.constant 0 : index
    %c14 = arith.constant 14 : index
    %16 = vector.load %arg7[%c0_13, %c14] : memref<16x56xf32, #tpu.memory_space<vmem>>, vector<16x14xf32>
    tpu.vector_store %arg7[%c0_13, %c14], %15 {strides = array<i32>} : memref<16x56xf32, #tpu.memory_space<vmem>>, vector<16x14xf32>,
    %17 = vector.extract_strided_slice %1 {offsets = [0, 3], sizes = [32, 14], strides = [1, 1]} : vector<32x18xbf16> to vector<32x14xbf16>
    %c3 = arith.constant 3 : index
    %c0_14 = arith.constant 0 : index
    %c0_15 = arith.constant 0 : index
    %18 = vector.load %arg2[%c3, %c0_14, %c0_15] : memref<9x16x32xbf16, #tpu.memory_space<vmem>>, vector<1x16x32xbf16>
    %19 = vector.shape_cast %18 : vector<1x16x32xbf16> to vector<16x32xbf16>
    %cst_16 = arith.constant dense<0.000000e+00> : vector<16x14xf32>
    %20 = tpu.matmul %19, %17, %cst_16 {dimension_numbers = #tpu.dot_dimension_numbers<[1], [0], [0], [1], [0, 0, 1, 1], [], []>} : vector<16x32xbf16>, vector<32x14xbf16>, vector<16x14xf32> -> vector<16x14xf32>
    %21 = vector.extract_strided_slice %1 {offsets = [0, 0], sizes = [32, 14], strides = [1, 1]} : vector<32x18xbf16> to vector<32x14xbf16>
    %c4 = arith.constant 4 : index
    %c0_17 = arith.constant 0 : index
    %c0_18 = arith.constant 0 : index
    %22 = vector.load %arg2[%c4, %c0_17, %c0_18] : memref<9x16x32xbf16, #tpu.memory_space<vmem>>, vector<1x16x32xbf16>
    %23 = vector.shape_cast %22 : vector<1x16x32xbf16> to vector<16x32xbf16>
    %cst_19 = arith.constant dense<0.000000e+00> : vector<16x14xf32>
    %24 = tpu.matmul %23, %21, %cst_19 {dimension_numbers = #tpu.dot_dimension_numbers<[1], [0], [0], [1], [0, 0, 1, 1], [], []>} : vector<16x32xbf16>, vector<32x14xbf16>, vector<16x14xf32> -> vector<16x14xf32>
    %25 = arith.addf %20, %24 : vector<16x14xf32>
    %c0_20 = arith.constant 0 : index
    %c28 = arith.constant 28 : index
    %26 = vector.load %arg7[%c0_20, %c28] : memref<16x56xf32, #tpu.memory_space<vmem>>, vector<16x14xf32>
    tpu.vector_store %arg7[%c0_20, %c28], %25 {strides = array<i32>} : memref<16x56xf32, #tpu.memory_space<vmem>>, vector<16x14xf32>,
    %27 = vector.extract_strided_slice %1 {offsets = [0, 4], sizes = [32, 14], strides = [1, 1]} : vector<32x18xbf16> to vector<32x14xbf16>
    %c5 = arith.constant 5 : index
    %c0_21 = arith.constant 0 : index
    %c0_22 = arith.constant 0 : index
    %28 = vector.load %arg2[%c5, %c0_21, %c0_22] : memref<9x16x32xbf16, #tpu.memory_space<vmem>>, vector<1x16x32xbf16>
    %29 = vector.shape_cast %28 : vector<1x16x32xbf16> to vector<16x32xbf16>
    %cst_23 = arith.constant dense<0.000000e+00> : vector<16x14xf32>
    %30 = tpu.matmul %29, %27, %cst_23 {dimension_numbers = #tpu.dot_dimension_numbers<[1], [0], [0], [1], [0, 0, 1, 1], [], []>} : vector<16x32xbf16>, vector<32x14xbf16>, vector<16x14xf32> -> vector<16x14xf32>
    %31 = vector.extract_strided_slice %1 {offsets = [0, 3], sizes = [32, 14], strides = [1, 1]} : vector<32x18xbf16> to vector<32x14xbf16>
    %c6 = arith.constant 6 : index
    %c0_24 = arith.constant 0 : index
    %c0_25 = arith.constant 0 : index
    %32 = vector.load %arg2[%c6, %c0_24, %c0_25] : memref<9x16x32xbf16, #tpu.memory_space<vmem>>, vector<1x16x32xbf16>
    %33 = vector.shape_cast %32 : vector<1x16x32xbf16> to vector<16x32xbf16>
    %cst_26 = arith.constant dense<0.000000e+00> : vector<16x14xf32>
    %34 = tpu.matmul %33, %31, %cst_26 {dimension_numbers = #tpu.dot_dimension_numbers<[1], [0], [0], [1], [0, 0, 1, 1], [], []>} : vector<16x32xbf16>, vector<32x14xbf16>, vector<16x14xf32> -> vector<16x14xf32>
    %35 = arith.addf %30, %34 : vector<16x14xf32>
    %36 = vector.extract_strided_slice %1 {offsets = [0, 1], sizes = [32, 14], strides = [1, 1]} : vector<32x18xbf16> to vector<32x14xbf16>
    %c7 = arith.constant 7 : index
    %c0_27 = arith.constant 0 : index
    %c0_28 = arith.constant 0 : index
    %37 = vector.load %arg2[%c7, %c0_27, %c0_28] : memref<9x16x32xbf16, #tpu.memory_space<vmem>>, vector<1x16x32xbf16>
    %38 = vector.shape_cast %37 : vector<1x16x32xbf16> to vector<16x32xbf16>
    %cst_29 = arith.constant dense<0.000000e+00> : vector<16x14xf32>
    %39 = tpu.matmul %38, %36, %cst_29 {dimension_numbers = #tpu.dot_dimension_numbers<[1], [0], [0], [1], [0, 0, 1, 1], [], []>} : vector<16x32xbf16>, vector<32x14xbf16>, vector<16x14xf32> -> vector<16x14xf32>
    %40 = arith.addf %35, %39 : vector<16x14xf32>
    %41 = vector.extract_strided_slice %1 {offsets = [0, 0], sizes = [32, 14], strides = [1, 1]} : vector<32x18xbf16> to vector<32x14xbf16>
    %c8 = arith.constant 8 : index
    %c0_30 = arith.constant 0 : index
    %c0_31 = arith.constant 0 : index
    %42 = vector.load %arg2[%c8, %c0_30, %c0_31] : memref<9x16x32xbf16, #tpu.memory_space<vmem>>, vector<1x16x32xbf16>
    %43 = vector.shape_cast %42 : vector<1x16x32xbf16> to vector<16x32xbf16>
    %cst_32 = arith.constant dense<0.000000e+00> : vector<16x14xf32>
    %44 = tpu.matmul %43, %41, %cst_32 {dimension_numbers = #tpu.dot_dimension_numbers<[1], [0], [0], [1], [0, 0, 1, 1], [], []>} : vector<16x32xbf16>, vector<32x14xbf16>, vector<16x14xf32> -> vector<16x14xf32>
    %45 = arith.addf %40, %44 : vector<16x14xf32>
    %c0_33 = arith.constant 0 : index
    %c42 = arith.constant 42 : index
    %46 = vector.load %arg7[%c0_33, %c42] : memref<16x56xf32, #tpu.memory_space<vmem>>, vector<16x14xf32>
    tpu.vector_store %arg7[%c0_33, %c42], %45 {strides = array<i32>} : memref<16x56xf32, #tpu.memory_space<vmem>>, vector<16x14xf32>,
    %c0_34 = arith.constant 0 : index
    %c0_35 = arith.constant 0 : index
    %47 = vector.load %arg7[%c0_34, %c0_35] : memref<16x56xf32, #tpu.memory_space<vmem>>, vector<16x56xf32>
    %c0_36 = arith.constant 0 : index
    %c0_37 = arith.constant 0 : index
    %48 = vector.load %arg5[%c0_36, %c0_37] : memref<1x56xf32, #tpu.memory_space<vmem>>, vector<1x56xf32>
    %49 = vector.broadcast %48 : vector<1x56xf32> to vector<16x56xf32>
    %50 = arith.mulf %47, %49 : vector<16x56xf32>
    %cst_38 = arith.constant dense<0.000000e+00> : vector<16xf32>
    %51 = vector.multi_reduction <add>, %50, %cst_38 [1] : vector<16x56xf32> to vector<16xf32>
    %52 = vector.shape_cast %51 : vector<16xf32> to vector<16x1xf32>
    %cst_39 = arith.constant 3.125000e-02 : f32
    %53 = vector.broadcast %cst_39 : f32 to vector<16x1xf32>
    %54 = arith.mulf %52, %53 : vector<16x1xf32>
    %55 = arith.mulf %50, %50 : vector<16x56xf32>
    %cst_40 = arith.constant dense<0.000000e+00> : vector<16xf32>
    %56 = vector.multi_reduction <add>, %55, %cst_40 [1] : vector<16x56xf32> to vector<16xf32>
    %57 = vector.shape_cast %56 : vector<16xf32> to vector<16x1xf32>
    %cst_41 = arith.constant 3.125000e-02 : f32
    %58 = vector.broadcast %cst_41 : f32 to vector<16x1xf32>
    %59 = arith.mulf %57, %58 : vector<16x1xf32>
    %60 = arith.mulf %54, %54 : vector<16x1xf32>
    %61 = arith.subf %59, %60 : vector<16x1xf32>
    %62 = vector.broadcast %54 : vector<16x1xf32> to vector<16x56xf32>
    %63 = arith.subf %47, %62 : vector<16x56xf32>
    %cst_42 = arith.constant 9.99999974E-6 : f32
    %64 = vector.broadcast %cst_42 : f32 to vector<16x1xf32>
    %65 = arith.addf %61, %64 : vector<16x1xf32>
    %66 = math.rsqrt %65 : vector<16x1xf32>
    %67 = vector.broadcast %66 : vector<16x1xf32> to vector<16x56xf32>
    %68 = arith.mulf %63, %67 : vector<16x56xf32>
    %c0_43 = arith.constant 0 : index
    %c0_44 = arith.constant 0 : index
    %69 = vector.load %arg3[%c0_43, %c0_44] : memref<16x1xf32, #tpu.memory_space<vmem>>, vector<16x1xf32>
    %70 = vector.broadcast %69 : vector<16x1xf32> to vector<16x56xf32>
    %71 = arith.mulf %68, %70 : vector<16x56xf32>
    %c0_45 = arith.constant 0 : index
    %c0_46 = arith.constant 0 : index
    %72 = vector.load %arg4[%c0_45, %c0_46] : memref<16x1xf32, #tpu.memory_space<vmem>>, vector<16x1xf32>
    %73 = vector.broadcast %72 : vector<16x1xf32> to vector<16x56xf32>
    %74 = arith.addf %71, %73 : vector<16x56xf32>
    %cst_47 = arith.constant 0.000000e+00 : f32
    %75 = vector.broadcast %cst_47 : f32 to vector<16x56xf32>
    %76 = arith.maximumf %74, %75 : vector<16x56xf32>
    %77 = arith.truncf %76 : vector<16x56xf32> to vector<16x56xbf16>
    %c0_48 = arith.constant 0 : index
    %c0_49 = arith.constant 0 : index
    %78 = vector.load %arg6[%c0_48, %c0_49] : memref<16x56xbf16, #tpu.memory_space<vmem>>, vector<16x56xbf16>
    tpu.vector_store %arg6[%c0_48, %c0_49], %77 {strides = array<i32>} : memref<16x56xbf16, #tpu.memory_space<vmem>>, vector<16x56xbf16>,
    return
  }
  func.func @transform_0(%arg0: i32) -> (i32, i32, i32) {
    %c0_i32 = arith.constant 0 : i32
    %c0_i32_0 = arith.constant 0 : i32
    %c0_i32_1 = arith.constant 0 : i32
    %c0_i32_2 = arith.constant 0 : i32
    return %c0_i32, %c0_i32_0, %c0_i32_1 : i32, i32, i32
  }
  func.func @transform_1(%arg0: i32) -> (i32, i32, i32) {
    %c0_i32 = arith.constant 0 : i32
    %c0_i32_0 = arith.constant 0 : i32
    %c0_i32_1 = arith.constant 0 : i32
    %c0_i32_2 = arith.constant 0 : i32
    return %c0_i32, %c0_i32_0, %c0_i32_1 : i32, i32, i32
  }
  func.func @transform_2(%arg0: i32) -> (i32, i32) {
    %c0_i32 = arith.constant 0 : i32
    %c0_i32_0 = arith.constant 0 : i32
    %c0_i32_1 = arith.constant 0 : i32
    return %c0_i32, %c0_i32_0 : i32, i32
  }
  func.func @transform_3(%arg0: i32) -> (i32, i32) {
    %c0_i32 = arith.constant 0 : i32
    %c0_i32_0 = arith.constant 0 : i32
    %c0_i32_1 = arith.constant 0 : i32
    return %c0_i32, %c0_i32_0 : i32, i32
  }
  func.func @transform_4(%arg0: i32) -> (i32, i32) {
    %c0_i32 = arith.constant 0 : i32
    %c0_i32_0 = arith.constant 0 : i32
    %c0_i32_1 = arith.constant 0 : i32
    return %c0_i32, %c0_i32_0 : i32, i32
  }
  func.func @transform_5(%arg0: i32) -> (i32, i32) {
    %c0_i32 = arith.constant 0 : i32
    %c0_i32_0 = arith.constant 0 : i32
    %c0_i32_1 = arith.constant 0 : i32
    return %c0_i32, %c0_i32_0 : i32, i32
  }
}

module attributes {stable_mosaic.version = 11 : i64} {
  func.func @_conv_bn_act_kernel(%arg0: i32, %arg1: memref<1x16x50xbf16, #tpu.memory_space<vmem>>, %arg2: memref<9x8x16xbf16, #tpu.memory_space<vmem>>, %arg3: memref<8x1xf32, #tpu.memory_space<vmem>>, %arg4: memref<8x1xf32, #tpu.memory_space<vmem>>, %arg5: memref<1x176xf32, #tpu.memory_space<vmem>>, %arg6: memref<8x176xbf16, #tpu.memory_space<vmem>>, %arg7: memref<8x176xf32, #tpu.memory_space<vmem>>) attributes {dimension_semantics = [#tpu.dimension_semantics<arbitrary>], iteration_bounds = array<i64: 1>, scalar_prefetch = 0 : i64, scratch_operands = 1 : i64, tpu.core_type = #tpu.core_type<tc>, window_params = [{pipeline_mode = #tpu.pipeline_mode<synchronous>, transform_indices = @transform_0, window_bounds = array<i64: 1, 16, 50>}, {pipeline_mode = #tpu.pipeline_mode<synchronous>, transform_indices = @transform_1, window_bounds = array<i64: 9, 8, 16>}, {pipeline_mode = #tpu.pipeline_mode<synchronous>, transform_indices = @transform_2, window_bounds = array<i64: 8, 1>}, {pipeline_mode = #tpu.pipeline_mode<synchronous>, transform_indices = @transform_3, window_bounds = array<i64: 8, 1>}, {pipeline_mode = #tpu.pipeline_mode<synchronous>, transform_indices = @transform_4, window_bounds = array<i64: 1, 176>}, {pipeline_mode = #tpu.pipeline_mode<synchronous>, transform_indices = @transform_5, window_bounds = array<i64: 8, 176>}]} {
    %c0 = arith.constant 0 : index
    %c0_0 = arith.constant 0 : index
    %c0_1 = arith.constant 0 : index
    %0 = vector.load %arg1[%c0, %c0_0, %c0_1] : memref<1x16x50xbf16, #tpu.memory_space<vmem>>, vector<1x16x50xbf16>
    %1 = vector.shape_cast %0 : vector<1x16x50xbf16> to vector<16x50xbf16>
    %2 = vector.extract_strided_slice %1 {offsets = [0, 0], sizes = [16, 44], strides = [1, 1]} : vector<16x50xbf16> to vector<16x44xbf16>
    %c0_2 = arith.constant 0 : index
    %c0_3 = arith.constant 0 : index
    %c0_4 = arith.constant 0 : index
    %3 = vector.load %arg2[%c0_2, %c0_3, %c0_4] : memref<9x8x16xbf16, #tpu.memory_space<vmem>>, vector<1x8x16xbf16>
    %4 = vector.shape_cast %3 : vector<1x8x16xbf16> to vector<8x16xbf16>
    %cst = arith.constant dense<0.000000e+00> : vector<8x44xf32>
    %5 = tpu.matmul %4, %2, %cst {dimension_numbers = #tpu.dot_dimension_numbers<[1], [0], [0], [1], [0, 0, 1, 1], [], []>} : vector<8x16xbf16>, vector<16x44xbf16>, vector<8x44xf32> -> vector<8x44xf32>
    %c0_5 = arith.constant 0 : index
    %c0_6 = arith.constant 0 : index
    %6 = vector.load %arg7[%c0_5, %c0_6] : memref<8x176xf32, #tpu.memory_space<vmem>>, vector<8x44xf32>
    tpu.vector_store %arg7[%c0_5, %c0_6], %5 {strides = array<i32>} : memref<8x176xf32, #tpu.memory_space<vmem>>, vector<8x44xf32>,
    %7 = vector.extract_strided_slice %1 {offsets = [0, 1], sizes = [16, 44], strides = [1, 1]} : vector<16x50xbf16> to vector<16x44xbf16>
    %c1 = arith.constant 1 : index
    %c0_7 = arith.constant 0 : index
    %c0_8 = arith.constant 0 : index
    %8 = vector.load %arg2[%c1, %c0_7, %c0_8] : memref<9x8x16xbf16, #tpu.memory_space<vmem>>, vector<1x8x16xbf16>
    %9 = vector.shape_cast %8 : vector<1x8x16xbf16> to vector<8x16xbf16>
    %cst_9 = arith.constant dense<0.000000e+00> : vector<8x44xf32>
    %10 = tpu.matmul %9, %7, %cst_9 {dimension_numbers = #tpu.dot_dimension_numbers<[1], [0], [0], [1], [0, 0, 1, 1], [], []>} : vector<8x16xbf16>, vector<16x44xbf16>, vector<8x44xf32> -> vector<8x44xf32>
    %11 = vector.extract_strided_slice %1 {offsets = [0, 0], sizes = [16, 44], strides = [1, 1]} : vector<16x50xbf16> to vector<16x44xbf16>
    %c2 = arith.constant 2 : index
    %c0_10 = arith.constant 0 : index
    %c0_11 = arith.constant 0 : index
    %12 = vector.load %arg2[%c2, %c0_10, %c0_11] : memref<9x8x16xbf16, #tpu.memory_space<vmem>>, vector<1x8x16xbf16>
    %13 = vector.shape_cast %12 : vector<1x8x16xbf16> to vector<8x16xbf16>
    %cst_12 = arith.constant dense<0.000000e+00> : vector<8x44xf32>
    %14 = tpu.matmul %13, %11, %cst_12 {dimension_numbers = #tpu.dot_dimension_numbers<[1], [0], [0], [1], [0, 0, 1, 1], [], []>} : vector<8x16xbf16>, vector<16x44xbf16>, vector<8x44xf32> -> vector<8x44xf32>
    %15 = arith.addf %10, %14 : vector<8x44xf32>
    %c0_13 = arith.constant 0 : index
    %c44 = arith.constant 44 : index
    %16 = vector.load %arg7[%c0_13, %c44] : memref<8x176xf32, #tpu.memory_space<vmem>>, vector<8x44xf32>
    tpu.vector_store %arg7[%c0_13, %c44], %15 {strides = array<i32>} : memref<8x176xf32, #tpu.memory_space<vmem>>, vector<8x44xf32>,
    %17 = vector.extract_strided_slice %1 {offsets = [0, 5], sizes = [16, 44], strides = [1, 1]} : vector<16x50xbf16> to vector<16x44xbf16>
    %c3 = arith.constant 3 : index
    %c0_14 = arith.constant 0 : index
    %c0_15 = arith.constant 0 : index
    %18 = vector.load %arg2[%c3, %c0_14, %c0_15] : memref<9x8x16xbf16, #tpu.memory_space<vmem>>, vector<1x8x16xbf16>
    %19 = vector.shape_cast %18 : vector<1x8x16xbf16> to vector<8x16xbf16>
    %cst_16 = arith.constant dense<0.000000e+00> : vector<8x44xf32>
    %20 = tpu.matmul %19, %17, %cst_16 {dimension_numbers = #tpu.dot_dimension_numbers<[1], [0], [0], [1], [0, 0, 1, 1], [], []>} : vector<8x16xbf16>, vector<16x44xbf16>, vector<8x44xf32> -> vector<8x44xf32>
    %21 = vector.extract_strided_slice %1 {offsets = [0, 0], sizes = [16, 44], strides = [1, 1]} : vector<16x50xbf16> to vector<16x44xbf16>
    %c4 = arith.constant 4 : index
    %c0_17 = arith.constant 0 : index
    %c0_18 = arith.constant 0 : index
    %22 = vector.load %arg2[%c4, %c0_17, %c0_18] : memref<9x8x16xbf16, #tpu.memory_space<vmem>>, vector<1x8x16xbf16>
    %23 = vector.shape_cast %22 : vector<1x8x16xbf16> to vector<8x16xbf16>
    %cst_19 = arith.constant dense<0.000000e+00> : vector<8x44xf32>
    %24 = tpu.matmul %23, %21, %cst_19 {dimension_numbers = #tpu.dot_dimension_numbers<[1], [0], [0], [1], [0, 0, 1, 1], [], []>} : vector<8x16xbf16>, vector<16x44xbf16>, vector<8x44xf32> -> vector<8x44xf32>
    %25 = arith.addf %20, %24 : vector<8x44xf32>
    %c0_20 = arith.constant 0 : index
    %c88 = arith.constant 88 : index
    %26 = vector.load %arg7[%c0_20, %c88] : memref<8x176xf32, #tpu.memory_space<vmem>>, vector<8x44xf32>
    tpu.vector_store %arg7[%c0_20, %c88], %25 {strides = array<i32>} : memref<8x176xf32, #tpu.memory_space<vmem>>, vector<8x44xf32>,
    %27 = vector.extract_strided_slice %1 {offsets = [0, 6], sizes = [16, 44], strides = [1, 1]} : vector<16x50xbf16> to vector<16x44xbf16>
    %c5 = arith.constant 5 : index
    %c0_21 = arith.constant 0 : index
    %c0_22 = arith.constant 0 : index
    %28 = vector.load %arg2[%c5, %c0_21, %c0_22] : memref<9x8x16xbf16, #tpu.memory_space<vmem>>, vector<1x8x16xbf16>
    %29 = vector.shape_cast %28 : vector<1x8x16xbf16> to vector<8x16xbf16>
    %cst_23 = arith.constant dense<0.000000e+00> : vector<8x44xf32>
    %30 = tpu.matmul %29, %27, %cst_23 {dimension_numbers = #tpu.dot_dimension_numbers<[1], [0], [0], [1], [0, 0, 1, 1], [], []>} : vector<8x16xbf16>, vector<16x44xbf16>, vector<8x44xf32> -> vector<8x44xf32>
    %31 = vector.extract_strided_slice %1 {offsets = [0, 5], sizes = [16, 44], strides = [1, 1]} : vector<16x50xbf16> to vector<16x44xbf16>
    %c6 = arith.constant 6 : index
    %c0_24 = arith.constant 0 : index
    %c0_25 = arith.constant 0 : index
    %32 = vector.load %arg2[%c6, %c0_24, %c0_25] : memref<9x8x16xbf16, #tpu.memory_space<vmem>>, vector<1x8x16xbf16>
    %33 = vector.shape_cast %32 : vector<1x8x16xbf16> to vector<8x16xbf16>
    %cst_26 = arith.constant dense<0.000000e+00> : vector<8x44xf32>
    %34 = tpu.matmul %33, %31, %cst_26 {dimension_numbers = #tpu.dot_dimension_numbers<[1], [0], [0], [1], [0, 0, 1, 1], [], []>} : vector<8x16xbf16>, vector<16x44xbf16>, vector<8x44xf32> -> vector<8x44xf32>
    %35 = arith.addf %30, %34 : vector<8x44xf32>
    %36 = vector.extract_strided_slice %1 {offsets = [0, 1], sizes = [16, 44], strides = [1, 1]} : vector<16x50xbf16> to vector<16x44xbf16>
    %c7 = arith.constant 7 : index
    %c0_27 = arith.constant 0 : index
    %c0_28 = arith.constant 0 : index
    %37 = vector.load %arg2[%c7, %c0_27, %c0_28] : memref<9x8x16xbf16, #tpu.memory_space<vmem>>, vector<1x8x16xbf16>
    %38 = vector.shape_cast %37 : vector<1x8x16xbf16> to vector<8x16xbf16>
    %cst_29 = arith.constant dense<0.000000e+00> : vector<8x44xf32>
    %39 = tpu.matmul %38, %36, %cst_29 {dimension_numbers = #tpu.dot_dimension_numbers<[1], [0], [0], [1], [0, 0, 1, 1], [], []>} : vector<8x16xbf16>, vector<16x44xbf16>, vector<8x44xf32> -> vector<8x44xf32>
    %40 = arith.addf %35, %39 : vector<8x44xf32>
    %41 = vector.extract_strided_slice %1 {offsets = [0, 0], sizes = [16, 44], strides = [1, 1]} : vector<16x50xbf16> to vector<16x44xbf16>
    %c8 = arith.constant 8 : index
    %c0_30 = arith.constant 0 : index
    %c0_31 = arith.constant 0 : index
    %42 = vector.load %arg2[%c8, %c0_30, %c0_31] : memref<9x8x16xbf16, #tpu.memory_space<vmem>>, vector<1x8x16xbf16>
    %43 = vector.shape_cast %42 : vector<1x8x16xbf16> to vector<8x16xbf16>
    %cst_32 = arith.constant dense<0.000000e+00> : vector<8x44xf32>
    %44 = tpu.matmul %43, %41, %cst_32 {dimension_numbers = #tpu.dot_dimension_numbers<[1], [0], [0], [1], [0, 0, 1, 1], [], []>} : vector<8x16xbf16>, vector<16x44xbf16>, vector<8x44xf32> -> vector<8x44xf32>
    %45 = arith.addf %40, %44 : vector<8x44xf32>
    %c0_33 = arith.constant 0 : index
    %c132 = arith.constant 132 : index
    %46 = vector.load %arg7[%c0_33, %c132] : memref<8x176xf32, #tpu.memory_space<vmem>>, vector<8x44xf32>
    tpu.vector_store %arg7[%c0_33, %c132], %45 {strides = array<i32>} : memref<8x176xf32, #tpu.memory_space<vmem>>, vector<8x44xf32>,
    %c0_34 = arith.constant 0 : index
    %c0_35 = arith.constant 0 : index
    %47 = vector.load %arg7[%c0_34, %c0_35] : memref<8x176xf32, #tpu.memory_space<vmem>>, vector<8x176xf32>
    %c0_36 = arith.constant 0 : index
    %c0_37 = arith.constant 0 : index
    %48 = vector.load %arg5[%c0_36, %c0_37] : memref<1x176xf32, #tpu.memory_space<vmem>>, vector<1x176xf32>
    %49 = vector.broadcast %48 : vector<1x176xf32> to vector<8x176xf32>
    %50 = arith.mulf %47, %49 : vector<8x176xf32>
    %cst_38 = arith.constant dense<0.000000e+00> : vector<8xf32>
    %51 = vector.multi_reduction <add>, %50, %cst_38 [1] : vector<8x176xf32> to vector<8xf32>
    %52 = vector.shape_cast %51 : vector<8xf32> to vector<8x1xf32>
    %cst_39 = arith.constant 7.812500e-03 : f32
    %53 = vector.broadcast %cst_39 : f32 to vector<8x1xf32>
    %54 = arith.mulf %52, %53 : vector<8x1xf32>
    %55 = arith.mulf %50, %50 : vector<8x176xf32>
    %cst_40 = arith.constant dense<0.000000e+00> : vector<8xf32>
    %56 = vector.multi_reduction <add>, %55, %cst_40 [1] : vector<8x176xf32> to vector<8xf32>
    %57 = vector.shape_cast %56 : vector<8xf32> to vector<8x1xf32>
    %cst_41 = arith.constant 7.812500e-03 : f32
    %58 = vector.broadcast %cst_41 : f32 to vector<8x1xf32>
    %59 = arith.mulf %57, %58 : vector<8x1xf32>
    %60 = arith.mulf %54, %54 : vector<8x1xf32>
    %61 = arith.subf %59, %60 : vector<8x1xf32>
    %62 = vector.broadcast %54 : vector<8x1xf32> to vector<8x176xf32>
    %63 = arith.subf %47, %62 : vector<8x176xf32>
    %cst_42 = arith.constant 9.99999974E-6 : f32
    %64 = vector.broadcast %cst_42 : f32 to vector<8x1xf32>
    %65 = arith.addf %61, %64 : vector<8x1xf32>
    %66 = math.rsqrt %65 : vector<8x1xf32>
    %67 = vector.broadcast %66 : vector<8x1xf32> to vector<8x176xf32>
    %68 = arith.mulf %63, %67 : vector<8x176xf32>
    %c0_43 = arith.constant 0 : index
    %c0_44 = arith.constant 0 : index
    %69 = vector.load %arg3[%c0_43, %c0_44] : memref<8x1xf32, #tpu.memory_space<vmem>>, vector<8x1xf32>
    %70 = vector.broadcast %69 : vector<8x1xf32> to vector<8x176xf32>
    %71 = arith.mulf %68, %70 : vector<8x176xf32>
    %c0_45 = arith.constant 0 : index
    %c0_46 = arith.constant 0 : index
    %72 = vector.load %arg4[%c0_45, %c0_46] : memref<8x1xf32, #tpu.memory_space<vmem>>, vector<8x1xf32>
    %73 = vector.broadcast %72 : vector<8x1xf32> to vector<8x176xf32>
    %74 = arith.addf %71, %73 : vector<8x176xf32>
    %cst_47 = arith.constant 0.000000e+00 : f32
    %75 = vector.broadcast %cst_47 : f32 to vector<8x176xf32>
    %76 = arith.maximumf %74, %75 : vector<8x176xf32>
    %77 = arith.truncf %76 : vector<8x176xf32> to vector<8x176xbf16>
    %c0_48 = arith.constant 0 : index
    %c0_49 = arith.constant 0 : index
    %78 = vector.load %arg6[%c0_48, %c0_49] : memref<8x176xbf16, #tpu.memory_space<vmem>>, vector<8x176xbf16>
    tpu.vector_store %arg6[%c0_48, %c0_49], %77 {strides = array<i32>} : memref<8x176xbf16, #tpu.memory_space<vmem>>, vector<8x176xbf16>,
    return
  }
  func.func @transform_0(%arg0: i32) -> (i32, i32, i32) {
    %c0_i32 = arith.constant 0 : i32
    %c0_i32_0 = arith.constant 0 : i32
    %c0_i32_1 = arith.constant 0 : i32
    %c0_i32_2 = arith.constant 0 : i32
    return %c0_i32, %c0_i32_0, %c0_i32_1 : i32, i32, i32
  }
  func.func @transform_1(%arg0: i32) -> (i32, i32, i32) {
    %c0_i32 = arith.constant 0 : i32
    %c0_i32_0 = arith.constant 0 : i32
    %c0_i32_1 = arith.constant 0 : i32
    %c0_i32_2 = arith.constant 0 : i32
    return %c0_i32, %c0_i32_0, %c0_i32_1 : i32, i32, i32
  }
  func.func @transform_2(%arg0: i32) -> (i32, i32) {
    %c0_i32 = arith.constant 0 : i32
    %c0_i32_0 = arith.constant 0 : i32
    %c0_i32_1 = arith.constant 0 : i32
    return %c0_i32, %c0_i32_0 : i32, i32
  }
  func.func @transform_3(%arg0: i32) -> (i32, i32) {
    %c0_i32 = arith.constant 0 : i32
    %c0_i32_0 = arith.constant 0 : i32
    %c0_i32_1 = arith.constant 0 : i32
    return %c0_i32, %c0_i32_0 : i32, i32
  }
  func.func @transform_4(%arg0: i32) -> (i32, i32) {
    %c0_i32 = arith.constant 0 : i32
    %c0_i32_0 = arith.constant 0 : i32
    %c0_i32_1 = arith.constant 0 : i32
    return %c0_i32, %c0_i32_0 : i32, i32
  }
  func.func @transform_5(%arg0: i32) -> (i32, i32) {
    %c0_i32 = arith.constant 0 : i32
    %c0_i32_0 = arith.constant 0 : i32
    %c0_i32_1 = arith.constant 0 : i32
    return %c0_i32, %c0_i32_0 : i32, i32
  }
}

module attributes {stable_mosaic.version = 11 : i64} {
  func.func @_conv_bn_act_kernel(%arg0: i32, %arg1: memref<1x8x162xbf16, #tpu.memory_space<vmem>>, %arg2: memref<9x8x8xbf16, #tpu.memory_space<vmem>>, %arg3: memref<8x1xf32, #tpu.memory_space<vmem>>, %arg4: memref<8x1xf32, #tpu.memory_space<vmem>>, %arg5: memref<1x608xf32, #tpu.memory_space<vmem>>, %arg6: memref<8x608xbf16, #tpu.memory_space<vmem>>, %arg7: memref<8x608xf32, #tpu.memory_space<vmem>>) attributes {dimension_semantics = [#tpu.dimension_semantics<arbitrary>], iteration_bounds = array<i64: 1>, scalar_prefetch = 0 : i64, scratch_operands = 1 : i64, tpu.core_type = #tpu.core_type<tc>, window_params = [{pipeline_mode = #tpu.pipeline_mode<synchronous>, transform_indices = @transform_0, window_bounds = array<i64: 1, 8, 162>}, {pipeline_mode = #tpu.pipeline_mode<synchronous>, transform_indices = @transform_1, window_bounds = array<i64: 9, 8, 8>}, {pipeline_mode = #tpu.pipeline_mode<synchronous>, transform_indices = @transform_2, window_bounds = array<i64: 8, 1>}, {pipeline_mode = #tpu.pipeline_mode<synchronous>, transform_indices = @transform_3, window_bounds = array<i64: 8, 1>}, {pipeline_mode = #tpu.pipeline_mode<synchronous>, transform_indices = @transform_4, window_bounds = array<i64: 1, 608>}, {pipeline_mode = #tpu.pipeline_mode<synchronous>, transform_indices = @transform_5, window_bounds = array<i64: 8, 608>}]} {
    %c0 = arith.constant 0 : index
    %c0_0 = arith.constant 0 : index
    %c0_1 = arith.constant 0 : index
    %0 = vector.load %arg1[%c0, %c0_0, %c0_1] : memref<1x8x162xbf16, #tpu.memory_space<vmem>>, vector<1x8x162xbf16>
    %1 = vector.shape_cast %0 : vector<1x8x162xbf16> to vector<8x162xbf16>
    %2 = vector.extract_strided_slice %1 {offsets = [0, 0], sizes = [8, 152], strides = [1, 1]} : vector<8x162xbf16> to vector<8x152xbf16>
    %c0_2 = arith.constant 0 : index
    %c0_3 = arith.constant 0 : index
    %c0_4 = arith.constant 0 : index
    %3 = vector.load %arg2[%c0_2, %c0_3, %c0_4] : memref<9x8x8xbf16, #tpu.memory_space<vmem>>, vector<1x8x8xbf16>
    %4 = vector.shape_cast %3 : vector<1x8x8xbf16> to vector<8x8xbf16>
    %cst = arith.constant dense<0.000000e+00> : vector<8x152xf32>
    %5 = tpu.matmul %4, %2, %cst {dimension_numbers = #tpu.dot_dimension_numbers<[1], [0], [0], [1], [0, 0, 1, 1], [], []>} : vector<8x8xbf16>, vector<8x152xbf16>, vector<8x152xf32> -> vector<8x152xf32>
    %c0_5 = arith.constant 0 : index
    %c0_6 = arith.constant 0 : index
    %6 = vector.load %arg7[%c0_5, %c0_6] : memref<8x608xf32, #tpu.memory_space<vmem>>, vector<8x152xf32>
    tpu.vector_store %arg7[%c0_5, %c0_6], %5 {strides = array<i32>} : memref<8x608xf32, #tpu.memory_space<vmem>>, vector<8x152xf32>,
    %7 = vector.extract_strided_slice %1 {offsets = [0, 1], sizes = [8, 152], strides = [1, 1]} : vector<8x162xbf16> to vector<8x152xbf16>
    %c1 = arith.constant 1 : index
    %c0_7 = arith.constant 0 : index
    %c0_8 = arith.constant 0 : index
    %8 = vector.load %arg2[%c1, %c0_7, %c0_8] : memref<9x8x8xbf16, #tpu.memory_space<vmem>>, vector<1x8x8xbf16>
    %9 = vector.shape_cast %8 : vector<1x8x8xbf16> to vector<8x8xbf16>
    %cst_9 = arith.constant dense<0.000000e+00> : vector<8x152xf32>
    %10 = tpu.matmul %9, %7, %cst_9 {dimension_numbers = #tpu.dot_dimension_numbers<[1], [0], [0], [1], [0, 0, 1, 1], [], []>} : vector<8x8xbf16>, vector<8x152xbf16>, vector<8x152xf32> -> vector<8x152xf32>
    %11 = vector.extract_strided_slice %1 {offsets = [0, 0], sizes = [8, 152], strides = [1, 1]} : vector<8x162xbf16> to vector<8x152xbf16>
    %c2 = arith.constant 2 : index
    %c0_10 = arith.constant 0 : index
    %c0_11 = arith.constant 0 : index
    %12 = vector.load %arg2[%c2, %c0_10, %c0_11] : memref<9x8x8xbf16, #tpu.memory_space<vmem>>, vector<1x8x8xbf16>
    %13 = vector.shape_cast %12 : vector<1x8x8xbf16> to vector<8x8xbf16>
    %cst_12 = arith.constant dense<0.000000e+00> : vector<8x152xf32>
    %14 = tpu.matmul %13, %11, %cst_12 {dimension_numbers = #tpu.dot_dimension_numbers<[1], [0], [0], [1], [0, 0, 1, 1], [], []>} : vector<8x8xbf16>, vector<8x152xbf16>, vector<8x152xf32> -> vector<8x152xf32>
    %15 = arith.addf %10, %14 : vector<8x152xf32>
    %c0_13 = arith.constant 0 : index
    %c152 = arith.constant 152 : index
    %16 = vector.load %arg7[%c0_13, %c152] : memref<8x608xf32, #tpu.memory_space<vmem>>, vector<8x152xf32>
    tpu.vector_store %arg7[%c0_13, %c152], %15 {strides = array<i32>} : memref<8x608xf32, #tpu.memory_space<vmem>>, vector<8x152xf32>,
    %17 = vector.extract_strided_slice %1 {offsets = [0, 9], sizes = [8, 152], strides = [1, 1]} : vector<8x162xbf16> to vector<8x152xbf16>
    %c3 = arith.constant 3 : index
    %c0_14 = arith.constant 0 : index
    %c0_15 = arith.constant 0 : index
    %18 = vector.load %arg2[%c3, %c0_14, %c0_15] : memref<9x8x8xbf16, #tpu.memory_space<vmem>>, vector<1x8x8xbf16>
    %19 = vector.shape_cast %18 : vector<1x8x8xbf16> to vector<8x8xbf16>
    %cst_16 = arith.constant dense<0.000000e+00> : vector<8x152xf32>
    %20 = tpu.matmul %19, %17, %cst_16 {dimension_numbers = #tpu.dot_dimension_numbers<[1], [0], [0], [1], [0, 0, 1, 1], [], []>} : vector<8x8xbf16>, vector<8x152xbf16>, vector<8x152xf32> -> vector<8x152xf32>
    %21 = vector.extract_strided_slice %1 {offsets = [0, 0], sizes = [8, 152], strides = [1, 1]} : vector<8x162xbf16> to vector<8x152xbf16>
    %c4 = arith.constant 4 : index
    %c0_17 = arith.constant 0 : index
    %c0_18 = arith.constant 0 : index
    %22 = vector.load %arg2[%c4, %c0_17, %c0_18] : memref<9x8x8xbf16, #tpu.memory_space<vmem>>, vector<1x8x8xbf16>
    %23 = vector.shape_cast %22 : vector<1x8x8xbf16> to vector<8x8xbf16>
    %cst_19 = arith.constant dense<0.000000e+00> : vector<8x152xf32>
    %24 = tpu.matmul %23, %21, %cst_19 {dimension_numbers = #tpu.dot_dimension_numbers<[1], [0], [0], [1], [0, 0, 1, 1], [], []>} : vector<8x8xbf16>, vector<8x152xbf16>, vector<8x152xf32> -> vector<8x152xf32>
    %25 = arith.addf %20, %24 : vector<8x152xf32>
    %c0_20 = arith.constant 0 : index
    %c304 = arith.constant 304 : index
    %26 = vector.load %arg7[%c0_20, %c304] : memref<8x608xf32, #tpu.memory_space<vmem>>, vector<8x152xf32>
    tpu.vector_store %arg7[%c0_20, %c304], %25 {strides = array<i32>} : memref<8x608xf32, #tpu.memory_space<vmem>>, vector<8x152xf32>,
    %27 = vector.extract_strided_slice %1 {offsets = [0, 10], sizes = [8, 152], strides = [1, 1]} : vector<8x162xbf16> to vector<8x152xbf16>
    %c5 = arith.constant 5 : index
    %c0_21 = arith.constant 0 : index
    %c0_22 = arith.constant 0 : index
    %28 = vector.load %arg2[%c5, %c0_21, %c0_22] : memref<9x8x8xbf16, #tpu.memory_space<vmem>>, vector<1x8x8xbf16>
    %29 = vector.shape_cast %28 : vector<1x8x8xbf16> to vector<8x8xbf16>
    %cst_23 = arith.constant dense<0.000000e+00> : vector<8x152xf32>
    %30 = tpu.matmul %29, %27, %cst_23 {dimension_numbers = #tpu.dot_dimension_numbers<[1], [0], [0], [1], [0, 0, 1, 1], [], []>} : vector<8x8xbf16>, vector<8x152xbf16>, vector<8x152xf32> -> vector<8x152xf32>
    %31 = vector.extract_strided_slice %1 {offsets = [0, 9], sizes = [8, 152], strides = [1, 1]} : vector<8x162xbf16> to vector<8x152xbf16>
    %c6 = arith.constant 6 : index
    %c0_24 = arith.constant 0 : index
    %c0_25 = arith.constant 0 : index
    %32 = vector.load %arg2[%c6, %c0_24, %c0_25] : memref<9x8x8xbf16, #tpu.memory_space<vmem>>, vector<1x8x8xbf16>
    %33 = vector.shape_cast %32 : vector<1x8x8xbf16> to vector<8x8xbf16>
    %cst_26 = arith.constant dense<0.000000e+00> : vector<8x152xf32>
    %34 = tpu.matmul %33, %31, %cst_26 {dimension_numbers = #tpu.dot_dimension_numbers<[1], [0], [0], [1], [0, 0, 1, 1], [], []>} : vector<8x8xbf16>, vector<8x152xbf16>, vector<8x152xf32> -> vector<8x152xf32>
    %35 = arith.addf %30, %34 : vector<8x152xf32>
    %36 = vector.extract_strided_slice %1 {offsets = [0, 1], sizes = [8, 152], strides = [1, 1]} : vector<8x162xbf16> to vector<8x152xbf16>
    %c7 = arith.constant 7 : index
    %c0_27 = arith.constant 0 : index
    %c0_28 = arith.constant 0 : index
    %37 = vector.load %arg2[%c7, %c0_27, %c0_28] : memref<9x8x8xbf16, #tpu.memory_space<vmem>>, vector<1x8x8xbf16>
    %38 = vector.shape_cast %37 : vector<1x8x8xbf16> to vector<8x8xbf16>
    %cst_29 = arith.constant dense<0.000000e+00> : vector<8x152xf32>
    %39 = tpu.matmul %38, %36, %cst_29 {dimension_numbers = #tpu.dot_dimension_numbers<[1], [0], [0], [1], [0, 0, 1, 1], [], []>} : vector<8x8xbf16>, vector<8x152xbf16>, vector<8x152xf32> -> vector<8x152xf32>
    %40 = arith.addf %35, %39 : vector<8x152xf32>
    %41 = vector.extract_strided_slice %1 {offsets = [0, 0], sizes = [8, 152], strides = [1, 1]} : vector<8x162xbf16> to vector<8x152xbf16>
    %c8 = arith.constant 8 : index
    %c0_30 = arith.constant 0 : index
    %c0_31 = arith.constant 0 : index
    %42 = vector.load %arg2[%c8, %c0_30, %c0_31] : memref<9x8x8xbf16, #tpu.memory_space<vmem>>, vector<1x8x8xbf16>
    %43 = vector.shape_cast %42 : vector<1x8x8xbf16> to vector<8x8xbf16>
    %cst_32 = arith.constant dense<0.000000e+00> : vector<8x152xf32>
    %44 = tpu.matmul %43, %41, %cst_32 {dimension_numbers = #tpu.dot_dimension_numbers<[1], [0], [0], [1], [0, 0, 1, 1], [], []>} : vector<8x8xbf16>, vector<8x152xbf16>, vector<8x152xf32> -> vector<8x152xf32>
    %45 = arith.addf %40, %44 : vector<8x152xf32>
    %c0_33 = arith.constant 0 : index
    %c456 = arith.constant 456 : index
    %46 = vector.load %arg7[%c0_33, %c456] : memref<8x608xf32, #tpu.memory_space<vmem>>, vector<8x152xf32>
    tpu.vector_store %arg7[%c0_33, %c456], %45 {strides = array<i32>} : memref<8x608xf32, #tpu.memory_space<vmem>>, vector<8x152xf32>,
    %c0_34 = arith.constant 0 : index
    %c0_35 = arith.constant 0 : index
    %47 = vector.load %arg7[%c0_34, %c0_35] : memref<8x608xf32, #tpu.memory_space<vmem>>, vector<8x608xf32>
    %c0_36 = arith.constant 0 : index
    %c0_37 = arith.constant 0 : index
    %48 = vector.load %arg5[%c0_36, %c0_37] : memref<1x608xf32, #tpu.memory_space<vmem>>, vector<1x608xf32>
    %49 = vector.broadcast %48 : vector<1x608xf32> to vector<8x608xf32>
    %50 = arith.mulf %47, %49 : vector<8x608xf32>
    %cst_38 = arith.constant dense<0.000000e+00> : vector<8xf32>
    %51 = vector.multi_reduction <add>, %50, %cst_38 [1] : vector<8x608xf32> to vector<8xf32>
    %52 = vector.shape_cast %51 : vector<8xf32> to vector<8x1xf32>
    %cst_39 = arith.constant 0.001953125 : f32
    %53 = vector.broadcast %cst_39 : f32 to vector<8x1xf32>
    %54 = arith.mulf %52, %53 : vector<8x1xf32>
    %55 = arith.mulf %50, %50 : vector<8x608xf32>
    %cst_40 = arith.constant dense<0.000000e+00> : vector<8xf32>
    %56 = vector.multi_reduction <add>, %55, %cst_40 [1] : vector<8x608xf32> to vector<8xf32>
    %57 = vector.shape_cast %56 : vector<8xf32> to vector<8x1xf32>
    %cst_41 = arith.constant 0.001953125 : f32
    %58 = vector.broadcast %cst_41 : f32 to vector<8x1xf32>
    %59 = arith.mulf %57, %58 : vector<8x1xf32>
    %60 = arith.mulf %54, %54 : vector<8x1xf32>
    %61 = arith.subf %59, %60 : vector<8x1xf32>
    %62 = vector.broadcast %54 : vector<8x1xf32> to vector<8x608xf32>
    %63 = arith.subf %47, %62 : vector<8x608xf32>
    %cst_42 = arith.constant 9.99999974E-6 : f32
    %64 = vector.broadcast %cst_42 : f32 to vector<8x1xf32>
    %65 = arith.addf %61, %64 : vector<8x1xf32>
    %66 = math.rsqrt %65 : vector<8x1xf32>
    %67 = vector.broadcast %66 : vector<8x1xf32> to vector<8x608xf32>
    %68 = arith.mulf %63, %67 : vector<8x608xf32>
    %c0_43 = arith.constant 0 : index
    %c0_44 = arith.constant 0 : index
    %69 = vector.load %arg3[%c0_43, %c0_44] : memref<8x1xf32, #tpu.memory_space<vmem>>, vector<8x1xf32>
    %70 = vector.broadcast %69 : vector<8x1xf32> to vector<8x608xf32>
    %71 = arith.mulf %68, %70 : vector<8x608xf32>
    %c0_45 = arith.constant 0 : index
    %c0_46 = arith.constant 0 : index
    %72 = vector.load %arg4[%c0_45, %c0_46] : memref<8x1xf32, #tpu.memory_space<vmem>>, vector<8x1xf32>
    %73 = vector.broadcast %72 : vector<8x1xf32> to vector<8x608xf32>
    %74 = arith.addf %71, %73 : vector<8x608xf32>
    %cst_47 = arith.constant 0.000000e+00 : f32
    %75 = vector.broadcast %cst_47 : f32 to vector<8x608xf32>
    %76 = arith.maximumf %74, %75 : vector<8x608xf32>
    %77 = arith.truncf %76 : vector<8x608xf32> to vector<8x608xbf16>
    %c0_48 = arith.constant 0 : index
    %c0_49 = arith.constant 0 : index
    %78 = vector.load %arg6[%c0_48, %c0_49] : memref<8x608xbf16, #tpu.memory_space<vmem>>, vector<8x608xbf16>
    tpu.vector_store %arg6[%c0_48, %c0_49], %77 {strides = array<i32>} : memref<8x608xbf16, #tpu.memory_space<vmem>>, vector<8x608xbf16>,
    return
  }
  func.func @transform_0(%arg0: i32) -> (i32, i32, i32) {
    %c0_i32 = arith.constant 0 : i32
    %c0_i32_0 = arith.constant 0 : i32
    %c0_i32_1 = arith.constant 0 : i32
    %c0_i32_2 = arith.constant 0 : i32
    return %c0_i32, %c0_i32_0, %c0_i32_1 : i32, i32, i32
  }
  func.func @transform_1(%arg0: i32) -> (i32, i32, i32) {
    %c0_i32 = arith.constant 0 : i32
    %c0_i32_0 = arith.constant 0 : i32
    %c0_i32_1 = arith.constant 0 : i32
    %c0_i32_2 = arith.constant 0 : i32
    return %c0_i32, %c0_i32_0, %c0_i32_1 : i32, i32, i32
  }
  func.func @transform_2(%arg0: i32) -> (i32, i32) {
    %c0_i32 = arith.constant 0 : i32
    %c0_i32_0 = arith.constant 0 : i32
    %c0_i32_1 = arith.constant 0 : i32
    return %c0_i32, %c0_i32_0 : i32, i32
  }
  func.func @transform_3(%arg0: i32) -> (i32, i32) {
    %c0_i32 = arith.constant 0 : i32
    %c0_i32_0 = arith.constant 0 : i32
    %c0_i32_1 = arith.constant 0 : i32
    return %c0_i32, %c0_i32_0 : i32, i32
  }
  func.func @transform_4(%arg0: i32) -> (i32, i32) {
    %c0_i32 = arith.constant 0 : i32
    %c0_i32_0 = arith.constant 0 : i32
    %c0_i32_1 = arith.constant 0 : i32
    return %c0_i32, %c0_i32_0 : i32, i32
  }
  func.func @transform_5(%arg0: i32) -> (i32, i32) {
    %c0_i32 = arith.constant 0 : i32
    %c0_i32_0 = arith.constant 0 : i32
    %c0_i32_1 = arith.constant 0 : i32
    return %c0_i32, %c0_i32_0 : i32, i32
  }
}

module attributes {stable_mosaic.version = 11 : i64} {
  func.func @_conv_bn_act_kernel(%arg0: i32, %arg1: memref<1x8x648xbf16, #tpu.memory_space<vmem>>, %arg2: memref<9x3x8xbf16, #tpu.memory_space<vmem>>, %arg3: memref<3x1xf32, #tpu.memory_space<vmem>>, %arg4: memref<3x1xf32, #tpu.memory_space<vmem>>, %arg5: memref<1x610xf32, #tpu.memory_space<vmem>>, %arg6: memref<3x610xf32, #tpu.memory_space<vmem>>, %arg7: memref<3x610xf32, #tpu.memory_space<vmem>>) attributes {dimension_semantics = [#tpu.dimension_semantics<arbitrary>], iteration_bounds = array<i64: 1>, scalar_prefetch = 0 : i64, scratch_operands = 1 : i64, tpu.core_type = #tpu.core_type<tc>, window_params = [{pipeline_mode = #tpu.pipeline_mode<synchronous>, transform_indices = @transform_0, window_bounds = array<i64: 1, 8, 648>}, {pipeline_mode = #tpu.pipeline_mode<synchronous>, transform_indices = @transform_1, window_bounds = array<i64: 9, 3, 8>}, {pipeline_mode = #tpu.pipeline_mode<synchronous>, transform_indices = @transform_2, window_bounds = array<i64: 3, 1>}, {pipeline_mode = #tpu.pipeline_mode<synchronous>, transform_indices = @transform_3, window_bounds = array<i64: 3, 1>}, {pipeline_mode = #tpu.pipeline_mode<synchronous>, transform_indices = @transform_4, window_bounds = array<i64: 1, 610>}, {pipeline_mode = #tpu.pipeline_mode<synchronous>, transform_indices = @transform_5, window_bounds = array<i64: 3, 610>}]} {
    %c0 = arith.constant 0 : index
    %c0_0 = arith.constant 0 : index
    %c0_1 = arith.constant 0 : index
    %0 = vector.load %arg1[%c0, %c0_0, %c0_1] : memref<1x8x648xbf16, #tpu.memory_space<vmem>>, vector<1x8x648xbf16>
    %1 = vector.shape_cast %0 : vector<1x8x648xbf16> to vector<8x648xbf16>
    %2 = vector.extract_strided_slice %1 {offsets = [0, 0], sizes = [8, 610], strides = [1, 1]} : vector<8x648xbf16> to vector<8x610xbf16>
    %c0_2 = arith.constant 0 : index
    %c0_3 = arith.constant 0 : index
    %c0_4 = arith.constant 0 : index
    %3 = vector.load %arg2[%c0_2, %c0_3, %c0_4] : memref<9x3x8xbf16, #tpu.memory_space<vmem>>, vector<1x3x8xbf16>
    %4 = vector.shape_cast %3 : vector<1x3x8xbf16> to vector<3x8xbf16>
    %cst = arith.constant dense<0.000000e+00> : vector<3x610xf32>
    %5 = tpu.matmul %4, %2, %cst {dimension_numbers = #tpu.dot_dimension_numbers<[1], [0], [0], [1], [0, 0, 1, 1], [], []>} : vector<3x8xbf16>, vector<8x610xbf16>, vector<3x610xf32> -> vector<3x610xf32>
    %6 = vector.extract_strided_slice %1 {offsets = [0, 1], sizes = [8, 610], strides = [1, 1]} : vector<8x648xbf16> to vector<8x610xbf16>
    %c1 = arith.constant 1 : index
    %c0_5 = arith.constant 0 : index
    %c0_6 = arith.constant 0 : index
    %7 = vector.load %arg2[%c1, %c0_5, %c0_6] : memref<9x3x8xbf16, #tpu.memory_space<vmem>>, vector<1x3x8xbf16>
    %8 = vector.shape_cast %7 : vector<1x3x8xbf16> to vector<3x8xbf16>
    %cst_7 = arith.constant dense<0.000000e+00> : vector<3x610xf32>
    %9 = tpu.matmul %8, %6, %cst_7 {dimension_numbers = #tpu.dot_dimension_numbers<[1], [0], [0], [1], [0, 0, 1, 1], [], []>} : vector<3x8xbf16>, vector<8x610xbf16>, vector<3x610xf32> -> vector<3x610xf32>
    %10 = arith.addf %5, %9 : vector<3x610xf32>
    %11 = vector.extract_strided_slice %1 {offsets = [0, 2], sizes = [8, 610], strides = [1, 1]} : vector<8x648xbf16> to vector<8x610xbf16>
    %c2 = arith.constant 2 : index
    %c0_8 = arith.constant 0 : index
    %c0_9 = arith.constant 0 : index
    %12 = vector.load %arg2[%c2, %c0_8, %c0_9] : memref<9x3x8xbf16, #tpu.memory_space<vmem>>, vector<1x3x8xbf16>
    %13 = vector.shape_cast %12 : vector<1x3x8xbf16> to vector<3x8xbf16>
    %cst_10 = arith.constant dense<0.000000e+00> : vector<3x610xf32>
    %14 = tpu.matmul %13, %11, %cst_10 {dimension_numbers = #tpu.dot_dimension_numbers<[1], [0], [0], [1], [0, 0, 1, 1], [], []>} : vector<3x8xbf16>, vector<8x610xbf16>, vector<3x610xf32> -> vector<3x610xf32>
    %15 = arith.addf %10, %14 : vector<3x610xf32>
    %16 = vector.extract_strided_slice %1 {offsets = [0, 18], sizes = [8, 610], strides = [1, 1]} : vector<8x648xbf16> to vector<8x610xbf16>
    %c3 = arith.constant 3 : index
    %c0_11 = arith.constant 0 : index
    %c0_12 = arith.constant 0 : index
    %17 = vector.load %arg2[%c3, %c0_11, %c0_12] : memref<9x3x8xbf16, #tpu.memory_space<vmem>>, vector<1x3x8xbf16>
    %18 = vector.shape_cast %17 : vector<1x3x8xbf16> to vector<3x8xbf16>
    %cst_13 = arith.constant dense<0.000000e+00> : vector<3x610xf32>
    %19 = tpu.matmul %18, %16, %cst_13 {dimension_numbers = #tpu.dot_dimension_numbers<[1], [0], [0], [1], [0, 0, 1, 1], [], []>} : vector<3x8xbf16>, vector<8x610xbf16>, vector<3x610xf32> -> vector<3x610xf32>
    %20 = arith.addf %15, %19 : vector<3x610xf32>
    %21 = vector.extract_strided_slice %1 {offsets = [0, 19], sizes = [8, 610], strides = [1, 1]} : vector<8x648xbf16> to vector<8x610xbf16>
    %c4 = arith.constant 4 : index
    %c0_14 = arith.constant 0 : index
    %c0_15 = arith.constant 0 : index
    %22 = vector.load %arg2[%c4, %c0_14, %c0_15] : memref<9x3x8xbf16, #tpu.memory_space<vmem>>, vector<1x3x8xbf16>
    %23 = vector.shape_cast %22 : vector<1x3x8xbf16> to vector<3x8xbf16>
    %cst_16 = arith.constant dense<0.000000e+00> : vector<3x610xf32>
    %24 = tpu.matmul %23, %21, %cst_16 {dimension_numbers = #tpu.dot_dimension_numbers<[1], [0], [0], [1], [0, 0, 1, 1], [], []>} : vector<3x8xbf16>, vector<8x610xbf16>, vector<3x610xf32> -> vector<3x610xf32>
    %25 = arith.addf %20, %24 : vector<3x610xf32>
    %26 = vector.extract_strided_slice %1 {offsets = [0, 20], sizes = [8, 610], strides = [1, 1]} : vector<8x648xbf16> to vector<8x610xbf16>
    %c5 = arith.constant 5 : index
    %c0_17 = arith.constant 0 : index
    %c0_18 = arith.constant 0 : index
    %27 = vector.load %arg2[%c5, %c0_17, %c0_18] : memref<9x3x8xbf16, #tpu.memory_space<vmem>>, vector<1x3x8xbf16>
    %28 = vector.shape_cast %27 : vector<1x3x8xbf16> to vector<3x8xbf16>
    %cst_19 = arith.constant dense<0.000000e+00> : vector<3x610xf32>
    %29 = tpu.matmul %28, %26, %cst_19 {dimension_numbers = #tpu.dot_dimension_numbers<[1], [0], [0], [1], [0, 0, 1, 1], [], []>} : vector<3x8xbf16>, vector<8x610xbf16>, vector<3x610xf32> -> vector<3x610xf32>
    %30 = arith.addf %25, %29 : vector<3x610xf32>
    %31 = vector.extract_strided_slice %1 {offsets = [0, 36], sizes = [8, 610], strides = [1, 1]} : vector<8x648xbf16> to vector<8x610xbf16>
    %c6 = arith.constant 6 : index
    %c0_20 = arith.constant 0 : index
    %c0_21 = arith.constant 0 : index
    %32 = vector.load %arg2[%c6, %c0_20, %c0_21] : memref<9x3x8xbf16, #tpu.memory_space<vmem>>, vector<1x3x8xbf16>
    %33 = vector.shape_cast %32 : vector<1x3x8xbf16> to vector<3x8xbf16>
    %cst_22 = arith.constant dense<0.000000e+00> : vector<3x610xf32>
    %34 = tpu.matmul %33, %31, %cst_22 {dimension_numbers = #tpu.dot_dimension_numbers<[1], [0], [0], [1], [0, 0, 1, 1], [], []>} : vector<3x8xbf16>, vector<8x610xbf16>, vector<3x610xf32> -> vector<3x610xf32>
    %35 = arith.addf %30, %34 : vector<3x610xf32>
    %36 = vector.extract_strided_slice %1 {offsets = [0, 37], sizes = [8, 610], strides = [1, 1]} : vector<8x648xbf16> to vector<8x610xbf16>
    %c7 = arith.constant 7 : index
    %c0_23 = arith.constant 0 : index
    %c0_24 = arith.constant 0 : index
    %37 = vector.load %arg2[%c7, %c0_23, %c0_24] : memref<9x3x8xbf16, #tpu.memory_space<vmem>>, vector<1x3x8xbf16>
    %38 = vector.shape_cast %37 : vector<1x3x8xbf16> to vector<3x8xbf16>
    %cst_25 = arith.constant dense<0.000000e+00> : vector<3x610xf32>
    %39 = tpu.matmul %38, %36, %cst_25 {dimension_numbers = #tpu.dot_dimension_numbers<[1], [0], [0], [1], [0, 0, 1, 1], [], []>} : vector<3x8xbf16>, vector<8x610xbf16>, vector<3x610xf32> -> vector<3x610xf32>
    %40 = arith.addf %35, %39 : vector<3x610xf32>
    %41 = vector.extract_strided_slice %1 {offsets = [0, 38], sizes = [8, 610], strides = [1, 1]} : vector<8x648xbf16> to vector<8x610xbf16>
    %c8 = arith.constant 8 : index
    %c0_26 = arith.constant 0 : index
    %c0_27 = arith.constant 0 : index
    %42 = vector.load %arg2[%c8, %c0_26, %c0_27] : memref<9x3x8xbf16, #tpu.memory_space<vmem>>, vector<1x3x8xbf16>
    %43 = vector.shape_cast %42 : vector<1x3x8xbf16> to vector<3x8xbf16>
    %cst_28 = arith.constant dense<0.000000e+00> : vector<3x610xf32>
    %44 = tpu.matmul %43, %41, %cst_28 {dimension_numbers = #tpu.dot_dimension_numbers<[1], [0], [0], [1], [0, 0, 1, 1], [], []>} : vector<3x8xbf16>, vector<8x610xbf16>, vector<3x610xf32> -> vector<3x610xf32>
    %45 = arith.addf %40, %44 : vector<3x610xf32>
    %c0_29 = arith.constant 0 : index
    %c0_30 = arith.constant 0 : index
    %46 = vector.load %arg7[%c0_29, %c0_30] : memref<3x610xf32, #tpu.memory_space<vmem>>, vector<3x610xf32>
    tpu.vector_store %arg7[%c0_29, %c0_30], %45 {strides = array<i32>} : memref<3x610xf32, #tpu.memory_space<vmem>>, vector<3x610xf32>,
    %c0_31 = arith.constant 0 : index
    %c0_32 = arith.constant 0 : index
    %47 = vector.load %arg7[%c0_31, %c0_32] : memref<3x610xf32, #tpu.memory_space<vmem>>, vector<3x610xf32>
    %c0_33 = arith.constant 0 : index
    %c0_34 = arith.constant 0 : index
    %48 = vector.load %arg3[%c0_33, %c0_34] : memref<3x1xf32, #tpu.memory_space<vmem>>, vector<3x1xf32>
    %49 = vector.broadcast %48 : vector<3x1xf32> to vector<3x610xf32>
    %50 = arith.addf %47, %49 : vector<3x610xf32>
    %51 = arith.negf %50 : vector<3x610xf32>
    %52 = math.exp %51 : vector<3x610xf32>
    %cst_35 = arith.constant 1.000000e+00 : f32
    %53 = vector.broadcast %cst_35 : f32 to vector<3x610xf32>
    %54 = arith.addf %53, %52 : vector<3x610xf32>
    %55 = arith.divf %53, %54 : vector<3x610xf32>
    %c0_36 = arith.constant 0 : index
    %c0_37 = arith.constant 0 : index
    %56 = vector.load %arg6[%c0_36, %c0_37] : memref<3x610xf32, #tpu.memory_space<vmem>>, vector<3x610xf32>
    tpu.vector_store %arg6[%c0_36, %c0_37], %55 {strides = array<i32>} : memref<3x610xf32, #tpu.memory_space<vmem>>, vector<3x610xf32>,
    return
  }
  func.func @transform_0(%arg0: i32) -> (i32, i32, i32) {
    %c0_i32 = arith.constant 0 : i32
    %c0_i32_0 = arith.constant 0 : i32
    %c0_i32_1 = arith.constant 0 : i32
    %c0_i32_2 = arith.constant 0 : i32
    return %c0_i32, %c0_i32_0, %c0_i32_1 : i32, i32, i32
  }
  func.func @transform_1(%arg0: i32) -> (i32, i32, i32) {
    %c0_i32 = arith.constant 0 : i32
    %c0_i32_0 = arith.constant 0 : i32
    %c0_i32_1 = arith.constant 0 : i32
    %c0_i32_2 = arith.constant 0 : i32
    return %c0_i32, %c0_i32_0, %c0_i32_1 : i32, i32, i32
  }
  func.func @transform_2(%arg0: i32) -> (i32, i32) {
    %c0_i32 = arith.constant 0 : i32
    %c0_i32_0 = arith.constant 0 : i32
    %c0_i32_1 = arith.constant 0 : i32
    return %c0_i32, %c0_i32_0 : i32, i32
  }
  func.func @transform_3(%arg0: i32) -> (i32, i32) {
    %c0_i32 = arith.constant 0 : i32
    %c0_i32_0 = arith.constant 0 : i32
    %c0_i32_1 = arith.constant 0 : i32
    return %c0_i32, %c0_i32_0 : i32, i32
  }
  func.func @transform_4(%arg0: i32) -> (i32, i32) {
    %c0_i32 = arith.constant 0 : i32
    %c0_i32_0 = arith.constant 0 : i32
    %c0_i32_1 = arith.constant 0 : i32
    return %c0_i32, %c0_i32_0 : i32, i32
  }
  func.func @transform_5(%arg0: i32) -> (i32, i32) {
    %c0_i32 = arith.constant 0 : i32
    %c0_i32_0 = arith.constant 0 : i32
    %c0_i32_1 = arith.constant 0 : i32
    return %c0_i32, %c0_i32_0 : i32, i32
  }
}

</mosaic_0001>

<bundles_post_ra>
// kernel: vae_forward.8
= control target key start
LH: loop header
LB: loop body
LE: loop exit
PB: predicated region body
PF: predicated region fallthrough
CT: control target
= control target key end

     0   :  { %vm36_vm0 = vcmask 1043456   ;;  %s528_s24 = smov 127   ;;  %s529_s25 = smov 119   ;;  %vm32_vm1 = vcmask 64512   ;;  %vm296_vm2 = vcmask 973824   ;;  %vm115_vm3 = vcmask 1039360   ;;  %s655_s0 = inlined_call_operand.vmem [shape: bf16[4,8,162], index: 0, kind: input, shape index: {}]   ;;  %s656_s1 = inlined_call_operand.vmem [shape: bf16[9,8,8], index: 1, kind: input, shape index: {}]   ;;  %s657_s2 = inlined_call_operand.vmem [shape: f32[8,1], index: 2, kind: input, shape index: {}]   ;;  %s658_s3 = inlined_call_operand.vmem [shape: f32[8,1], index: 3, kind: input, shape index: {}]   ;;  %s659_s4 = inlined_call_operand.vmem [shape: f32[1,152], index: 4, kind: input, shape index: {}]   ;;  %s660_s5 = inlined_call_operand.vmem [shape: bf16[8,152], index: 5, kind: output, shape index: {}]  }
   0x1   :  { %v21_v0 = vld [vmem:[%s655_s0] sm:$0xff]  ;;  %v501_v1 = vld [vmem:[%s655_s0 + $0x10] sm:$0xff]  ;;  %v492_v2 = vld [vmem:[%s655_s0 + $0x8] sm:$0xff]  ;;  %s530_s30 = smov 118   ;;  %vm385_vm4 = vcmask 965632   ;;  %vm425_vm5 = vcmask 195584  }
   0x2   :  { %v70_v3 = vunpack.c.l.b16 %v21_v0  ;;  %v71_v4 = vunpack.c.h.b16 %v21_v0  ;;  %v159_v5 = vunpack.c.l.b16 %v501_v1  ;;  %v29_v6 = vunpack.c.h.b16 %v492_v2  ;;  %v22_v16 = vld [vmem:[%s656_s1] sm:$0xf]  ;;  %v493_v19 = vld [vmem:[%s656_s1 + $0x4] sm:$0xf]  ;;  %v502_v23 = vld [vmem:[%s656_s1 + $0xc] sm:$0xf] }
   0x3   :  { %v28_v7 = vunpack.c.l.b16 %v492_v2  ;;  %v160_v13 = vunpack.c.h.b16 %v501_v1  ;;  %v505_v25 = vld [vmem:[%s655_s0 + $0x18] sm:$0xff]  ;;  %v498_v43 = vld [vmem:[%s656_s1 + $0x8] sm:$0xf]  ;;  %v509_v45 = vld [vmem:[%s656_s1 + $0x14] sm:$0xf]  ;;  %vm485_vm9 = vcmask 195588  }
   0x4   :  { %v72_v8 = vpack.c.b16 %v70_v3, %v70_v3  ;;  %v73_v9 = vpack.c.b16 %v71_v4, %v71_v4  ;;  %v161_v10 = vpack.c.b16 %v159_v5, %v159_v5  ;;  %v31_v11 = vpack.c.b16 %v29_v6, %v29_v6  ;;  %v506_v56 = vld [vmem:[%s656_s1 + $0x10] sm:$0xf]  ;;  %v515_v57 = vld [vmem:[%s656_s1 + $0x1c] sm:$0xf]  ;;  %v512_v6 = vld [vmem:[%s656_s1 + $0x18] sm:$0xf] }
   0x5   :  { %v30_v12 = vpack.c.b16 %v28_v7, %v28_v7  ;;  %v162_v20 = vpack.c.b16 %v160_v13, %v160_v13  ;;  %v206_v28 = vunpack.c.h.b16 %v505_v25  ;;  %v205_v29 = vunpack.c.l.b16 %v505_v25  ;;  %v518_v7 = vld [vmem:[%s656_s1 + $0x20] sm:$0xf]  ;;  %vm486_vm10 = vmor %vm485_vm9, %vm36_vm0 }
   0x6   :  { %111 = vrot.lane.b32.xlu0 %v72_v8, %s528_s24  ;;  %248 = vrot.lane.b32.xlu1 %v161_v10, %s528_s24  ;;  %v81_v14 = vsel %vm36_vm0, %v73_v9, 0  ;;  %v78_v15 = vsel %vm36_vm0, %v72_v8, 0  ;;  %v41_v17 = vsel %vm36_vm0, %v31_v11, 0  ;;  %v167_v22 = vsel %vm36_vm0, %v161_v10, 0 }
   0x7   :  { %292 = vrot.lane.b32.xlu2 %v72_v8, %s529_s25  ;;  %103 = vmatpush.bf16.msra.mxu3 %v81_v14  ;;  %v38_v18 = vsel %vm36_vm0, %v30_v12, 0  ;;  %v170_v21 = vsel %vm36_vm0, %v162_v20, 0  ;;  %v208_v30 = vpack.c.b16 %v206_v28, %v206_v28  ;;  %v207_v31 = vpack.c.b16 %v205_v29, %v205_v29 }
   0x8   :  { %90 = vmatpush.bf16.msra.mxu2 %v78_v15  ;;  %63 = vmatpush.bf16.msra.mxu1 %v41_v17 }
   0x9   :  { %50 = vmatpush.bf16.msra.mxu0 %v38_v18  ;;  %v216_v35 = vsel %vm36_vm0, %v208_v30, 0  ;;  %v213_v36 = vsel %vm36_vm0, %v207_v31, 0 }
   0xa   :  { %497 = vmatmul.msk.bf16.vlgmr.msra.gmra.mxu3 %vm32_vm1, %v22_v16 }
   0xb   :  { %496 = vmatmul.msk.bf16.vlgmr.msra.gmra.mxu2 %vm32_vm1, %v22_v16  ;;  %495 = vmatmul.msk.bf16.vlgmr.msra.gmra.mxu1 %vm32_vm1, %v493_v19 }
   0xc   :  { %494 = vmatmul.msk.bf16.vlgmr.msra.gmra.mxu0 %vm32_vm1, %v493_v19  ;;  %192 = vmatpush.bf16.msrb.mxu3 %v170_v21 }
   0xd   :  { %179 = vmatpush.bf16.msrb.mxu2 %v167_v22 }
   0xe   :  { %113 = vrot.lane.b32.xlu0 %v73_v9, %s528_s24  ;;  %250 = vrot.lane.b32.xlu1 %v162_v20, %s528_s24 }
   0xf   :  { %294 = vrot.lane.b32.xlu2 %v73_v9, %s529_s25 }
  0x16   :  { %339 = vrot.lane.b32.xlu1 %v31_v11, %s529_s25  ;;  %337 = vrot.lane.b32.xlu0 %v30_v12, %s529_s25 }
  0x17   :  { %381 = vrot.lane.b32.xlu2 %v72_v8, %s530_s30 }
  0x1a   :  { %504 = vmatmul.msk.bf16.vlgmr.msrb.gmra.mxu3 %vm32_vm1, %v502_v23 }
  0x1b   :  { %503 = vmatmul.msk.bf16.vlgmr.msrb.gmra.mxu2 %vm32_vm1, %v502_v23 }
  0x1e   :  { %383 = vrot.lane.b32.xlu0 %v73_v9, %s530_s30 }
  0x61   :  { %v293_v24 = vpop.permute.xlu2 %292 }
  0x69   :  { %v295_v32 = vpop.permute.xlu2 %294 }
  0x6a   :  { %v297_v37 = vsel %vm296_vm2, %v293_v24, %v295_v32  ;;  %v305_v47 = vsel %vm36_vm0, %v295_v32, 0 }
  0x6b   :  { %v302_v46 = vsel %vm36_vm0, %v297_v37, 0 }
  0x71   :  { %v382_v53 = vpop.permute.xlu2 %381 }
  0x78   :  { %v112_v26 = vpop.permute.xlu0 %111  ;;  %v249_v27 = vpop.permute.xlu1 %248 }
  0x80   :  { %v114_v33 = vpop.permute.xlu0 %113  ;;  %v251_v34 = vpop.permute.xlu1 %250 }
  0x81   :  { %v124_v38 = vsel %vm36_vm0, %v114_v33, 0  ;;  %v116_v39 = vsel %vm115_vm3, %v112_v26, %v114_v33  ;;  %v252_v40 = vsel %vm115_vm3, %v249_v27, %v251_v34  ;;  %v260_v41 = vsel %vm36_vm0, %v251_v34, 0  ;;  %v466_v34 = vld [vmem:[%s657_s2] sm:$0xff] }
  0x82   :  { %146 = vmatpush.bf16.msrb.mxu1 %v124_v38  ;;  %v121_v42 = vsel %vm36_vm0, %v116_v39, 0  ;;  %v257_v44 = vsel %vm36_vm0, %v252_v40, 0  ;;  %282 = vmatpush.bf16.msra.mxu3 %v260_v41  ;;  %v474_v41 = vld [vmem:[%s658_s3] sm:$0xff] }
  0x83   :  { %133 = vmatpush.bf16.msrb.mxu0 %v121_v42  ;;  %269 = vmatpush.bf16.msra.mxu2 %v257_v44 }
  0x85   :  { %500 = vmatmul.msk.bf16.vlgmr.msrb.gmra.mxu1 %vm32_vm1, %v498_v43  ;;  %511 = vmatmul.msk.bf16.vlgmr.msra.gmra.mxu3 %vm32_vm1, %v509_v45 }
  0x86   :  { %238 = vmatpush.bf16.msra.mxu1 %v216_v35  ;;  %499 = vmatmul.msk.bf16.vlgmr.msrb.gmra.mxu0 %vm32_vm1, %v498_v43  ;;  %v531_v35 = vmov 0  }
  0x87   :  { %225 = vmatpush.bf16.msra.mxu0 %v213_v36  ;;  %510 = vmatmul.msk.bf16.vlgmr.msra.gmra.mxu2 %vm32_vm1, %v509_v45 }
  0x88   :  { %v340_v48 = vpop.permute.xlu1 %339  ;;  %v338_v49 = vpop.permute.xlu0 %337  ;;  %525 = vset.pattern.permute.xlu0 %v531_v35 }
  0x89   :  { %v349_v50 = vsel %vm36_vm0, %v340_v48, 0  ;;  %v341_v51 = vsel %vm296_vm2, %v338_v49, %v340_v48  ;;  %v65_v60 = vpop.f32.mrf.mxu1  ;;  %v52_v61 = vpop.f32.mrf.mxu0  ;;  %469 = vperm.xlu0 %525, %v466_v34  }
  0x8a   :  { %327 = vmatpush.bf16.msrb.mxu1 %v305_v47  ;;  %v346_v52 = vsel %vm36_vm0, %v341_v51, 0  ;;  %371 = vmatpush.bf16.msrb.mxu3 %v349_v50  ;;  %v429_v51 = vld [vmem:[%s659_s4] sm:$0x3] }
  0x8b   :  { %314 = vmatpush.bf16.msrb.mxu0 %v302_v46  ;;  %358 = vmatpush.bf16.msrb.mxu2 %v346_v52  ;;  %v431_v52 = vperm.slane %v429_v51, 0 }
  0x8d   :  { %v105_v62 = vpop.f32.mrf.mxu3 }
  0x8e   :  { %v92_v63 = vpop.f32.mrf.mxu2  ;;  %v106_v0 = vadd.f32 %v105_v62, %v65_v60 }
  0x8f   :  { %v93_v1 = vadd.f32 %v92_v63, %v52_v61 }
  0x90   :  { %v384_v54 = vpop.permute.xlu0 %383 }
  0x91   :  { %v386_v55 = vsel %vm385_vm4, %v382_v53, %v384_v54  ;;  %v394_v59 = vsel %vm36_vm0, %v384_v54, 0  ;;  %v67_v2 = vpop.f32.mrf.mxu1  ;;  %v54_v3 = vpop.f32.mrf.mxu0  ;;  %477 = vperm.xlu0 %525, %v474_v41   ;;  %v432_v53 = vperm.slane %v429_v51, 1 }
  0x92   :  { %v391_v58 = vsel %vm36_vm0, %v386_v55, 0 }
  0x95   :  { %508 = vmatmul.msk.bf16.vlgmr.msra.gmra.mxu1 %vm32_vm1, %v506_v56  ;;  %517 = vmatmul.msk.bf16.vlgmr.msrb.gmra.mxu3 %vm32_vm1, %v515_v57  ;;  %v107_v4 = vpop.f32.mrf.mxu3 }
  0x96   :  { %507 = vmatmul.msk.bf16.vlgmr.msra.gmra.mxu0 %vm32_vm1, %v506_v56  ;;  %416 = vmatpush.bf16.msra.mxu1 %v394_v59  ;;  %v94_v5 = vpop.f32.mrf.mxu2 }
  0x97   :  { %516 = vmatmul.msk.bf16.vlgmr.msrb.gmra.mxu2 %vm32_vm1, %v515_v57  ;;  %403 = vmatpush.bf16.msra.mxu0 %v391_v58 }
  0x9d   :  { %v194_v8 = vpop.f32.mrf.mxu3 }
  0x9e   :  { %v181_v9 = vpop.f32.mrf.mxu2 }
  0xa5   :  { %514 = vmatmul.msk.bf16.vlgmr.msrb.gmra.mxu1 %vm32_vm1, %v512_v6  ;;  %v196_v10 = vpop.f32.mrf.mxu3 }
  0xa6   :  { %513 = vmatmul.msk.bf16.vlgmr.msrb.gmra.mxu0 %vm32_vm1, %v512_v6  ;;  %v183_v11 = vpop.f32.mrf.mxu2 }
  0xb5   :  { %520 = vmatmul.msk.bf16.vlgmr.msra.gmra.mxu1 %vm32_vm1, %v518_v7 }
  0xb6   :  { %519 = vmatmul.msk.bf16.vlgmr.msra.gmra.mxu0 %vm32_vm1, %v518_v7 }
 0x102   :  { %v148_v12 = vpop.f32.mrf.mxu1 }
 0x103   :  { %v153_v13 = vadd.f32 %v148_v12, %v106_v0  ;;  %v135_v14 = vpop.f32.mrf.mxu0  ;;  %v470_v12 = vpop.permute.xlu0 %469 }
 0x104   :  { %v152_v15 = vadd.f32 %v135_v14, %v93_v1 }
 0x105   :  { %v199_v16 = vadd.f32 %v194_v8, %v153_v13 }
 0x106   :  { %v198_v17 = vadd.f32 %v181_v9, %v152_v15 }
 0x108   :  { %v284_v18 = vpop.f32.mrf.mxu3 }
 0x10a   :  { %v271_v19 = vpop.f32.mrf.mxu2  ;;  %v150_v20 = vpop.f32.mrf.mxu1 }
 0x10b   :  { %v137_v21 = vpop.f32.mrf.mxu0 }
 0x110   :  { %v286_v22 = vpop.f32.mrf.mxu3 }
 0x111   :  { %v478_v22 = vpop.permute.xlu0 %477 }
 0x112   :  { %v273_v23 = vpop.f32.mrf.mxu2  ;;  %v240_v24 = vpop.f32.mrf.mxu1 }
 0x113   :  { %v227_v25 = vpop.f32.mrf.mxu0  ;;  %v245_v36 = vadd.f32 %v240_v24, %v199_v16 }
 0x114   :  { %v244_v37 = vadd.f32 %v227_v25, %v198_v17 }
 0x115   :  { %v289_v39 = vadd.f32 %v284_v18, %v245_v36 }
 0x116   :  { %v288_v42 = vadd.f32 %v271_v19, %v244_v37 }
 0x118   :  { %v373_v26 = vpop.f32.mrf.mxu3 }
 0x11a   :  { %v360_v27 = vpop.f32.mrf.mxu2  ;;  %v242_v28 = vpop.f32.mrf.mxu1 }
 0x11b   :  { %v229_v29 = vpop.f32.mrf.mxu0 }
 0x120   :  { %v375_v30 = vpop.f32.mrf.mxu3 }
 0x122   :  { %v362_v31 = vpop.f32.mrf.mxu2  ;;  %v329_v32 = vpop.f32.mrf.mxu1 }
 0x123   :  { %v316_v33 = vpop.f32.mrf.mxu0  ;;  %v334_v43 = vadd.f32 %v329_v32, %v289_v39 }
 0x124   :  { %v333_v44 = vadd.f32 %v316_v33, %v288_v42 }
 0x125   :  { %v378_v45 = vadd.f32 %v373_v26, %v334_v43 }
 0x126   :  { %v377_v46 = vadd.f32 %v360_v27, %v333_v44 }
 0x12a   :  { %v331_v38 = vpop.f32.mrf.mxu1 }
 0x12b   :  { %v318_v40 = vpop.f32.mrf.mxu0 }
 0x132   :  { %v418_v47 = vpop.f32.mrf.mxu1 }
 0x133   :  { %v423_v48 = vadd.f32 %v418_v47, %v378_v45  ;;  %v405_v49 = vpop.f32.mrf.mxu0 }
 0x134   :  { %v422_v50 = vadd.f32 %v405_v49, %v377_v46 }
 0x135   :  { %426 = vst.msk [vmem:[#allocation2 + $0x8] sm:$0xff] %vm425_vm5, %v423_v48 }
 0x136   :  { %v435_v57 = vmul.f32 %v431_v52, %v422_v50 }
 0x138   :  { %v442_v62 = vmul.f32 %v435_v57, %v435_v57 }
 0x13a   :  { %v420_v54 = vpop.f32.mrf.mxu1 }
 0x13b   :  { %v407_v55 = vpop.f32.mrf.mxu0 }
 0x13c   :  { %v428_v56 = vld [vmem:[#allocation2 + $0x8] sm:$0xff] }
 0x13d   :  { %v436_v58 = vmul.f32 %v432_v53, %v428_v56 }
 0x13f   :  { %v437_v59 = vsel %vm425_vm5, %v436_v58, 0.0  ;;  %v443_v60 = vmul.f32 %v436_v58, %v436_v58 }
 0x140   :  { %v438_v61 = vadd.f32 %v437_v59, %v435_v57 }
 0x141   :  { %v444_v63 = vsel %vm425_vm5, %v443_v60, 0.0 }
 0x142   :  { %439 = vadd.xlane.f32.xlu1 %v438_v61  ;;  %v445_v0 = vadd.f32 %v444_v63, %v442_v62 }
 0x144   :  { %446 = vadd.xlane.f32.xlu2 %v445_v0 }
 0x1b5   :  { %v440_v1 = vpop.xlane.xlu1 %439 }
 0x1b6   :  { %v441_v2 = vmul.f32 0.0078125, %v440_v1 }
 0x1b7   :  { %v447_v3 = vpop.xlane.xlu2 %446 }
 0x1b8   :  { %v448_v4 = vmul.f32 0.0078125, %v447_v3  ;;  %v449_v5 = vmul.f32 %v441_v2, %v441_v2  ;;  %v451_v15 = vsub.f32 %v422_v50, %v441_v2  ;;  %v452_v16 = vsub.f32 %v428_v56, %v441_v2 }
 0x1ba   :  { %v450_v6 = vsub.f32 %v448_v4, %v449_v5 }
 0x1bc   :  { %v453_v7 = vadd.f32 1e-05, %v450_v6 }
 0x1be   :  { %526 = vrsqrt.f32 %v453_v7  ;;  %vm460_vm7 = vweird.f32 %v453_v7 }
 0x1c4   :  { %v527_v8 = vpop.eup %526 }
 0x1c5   :  { %v455_v9 = vmul.f32 %v527_v8, %v453_v7  ;;  %vm461_vm6 = vweird.f32 %v527_v8 }
 0x1c6   :  { %vm462_vm8 = vmor %vm460_vm7, %vm461_vm6 }
 0x1c7   :  { %v456_v10 = vmul.f32 %v527_v8, %v455_v9 }
 0x1c9   :  { %v457_v11 = vmul.f32 0.5, %v456_v10 }
 0x1cb   :  { %v458_v13 = vsub.f32 1.5, %v457_v11 }
 0x1cd   :  { %v459_v14 = vmul.f32 %v527_v8, %v458_v13 }
 0x1cf   :  { %v463_v17 = vsel %vm462_vm8, %v527_v8, %v459_v14 }
 0x1d0   :  { %v464_v18 = vmul.f32 %v463_v17, %v451_v15  ;;  %v465_v19 = vmul.f32 %v463_v17, %v452_v16 }
 0x1d2   :  { %v472_v20 = vmul.f32 %v470_v12, %v464_v18  ;;  %v473_v21 = vmul.f32 %v470_v12, %v465_v19 }
 0x1d4   :  { %v480_v23 = vadd.f32 %v478_v22, %v472_v20  ;;  %v481_v24 = vadd.f32 %v478_v22, %v473_v21 }
 0x1d6   :  { %v482_v25 = vmax.f32 %v480_v23, 0.0  ;;  %v483_v26 = vmax.f32 %v481_v24, 0.0 }
 0x1d8   :  { %v484_v27 = vpack.c.bf16 %v483_v26, %v482_v25 }
 0x1da   :  { %487 = vst.msk [vmem:[%s660_s5] sm:$0xff] %vm486_vm10, %v484_v27 }

// kernel: vae_forward.9
= control target key start
LH: loop header
LB: loop body
LE: loop exit
PB: predicated region body
PF: predicated region fallthrough
CT: control target
= control target key end

     0   :  { %vm38_vm0 = vcmask 1043456   ;;  %vm34_vm1 = vcmask 64512   ;;  %s497_s28 = smov 127   ;;  %s498_s29 = smov 123   ;;  %v500_v22 = vmov 0   ;;  %vm314_vm2 = vcmask 359424   ;;  %s619_s0 = inlined_call_operand.vmem [shape: bf16[4,8,50], index: 0, kind: input, shape index: {}]   ;;  %s620_s1 = inlined_call_operand.vmem [shape: bf16[9,16,8], index: 1, kind: input, shape index: {}]   ;;  %s621_s2 = inlined_call_operand.vmem [shape: f32[16,1], index: 2, kind: input, shape index: {}]   ;;  %s622_s4 = inlined_call_operand.vmem [shape: f32[1,44], index: 4, kind: input, shape index: {}]   ;;  %s623_s3 = inlined_call_operand.vmem [shape: f32[16,1], index: 3, kind: input, shape index: {}]   ;;  %s624_s5 = inlined_call_operand.vmem [shape: bf16[16,44], index: 5, kind: output, shape index: {}]  }
   0x1   :  { %v21_v0 = vld [vmem:[%s619_s0] sm:$0xf]  ;;  %v412_v1 = vld [vmem:[%s619_s0 + $0x4] sm:$0xf]  ;;  %v432_v5 = vld [vmem:[%s619_s0 + $0x8] sm:$0xf]  ;;  %489 = vset.pattern.permute.xlu2 %v500_v22  ;;  %491 = vset.pattern.permute.xlu1 %v500_v22 }
   0x2   :  { %v90_v2 = vunpack.c.l.b16 %v21_v0  ;;  %v256_v3 = vunpack.c.l.b16 %v412_v1  ;;  %v40_v4 = vsel %vm38_vm0, %v412_v1, 0  ;;  %v65_v6 = vsel %vm38_vm0, %v21_v0, 0  ;;  %v477_v7 = vld [vmem:[%s620_s1 + $0x8] sm:$0xff]  ;;  %v476_v10 = vld [vmem:[%s620_s1] sm:$0xff]  ;;  %s499_s30 = smov 122   ;;  %v479_v14 = vld [vmem:[%s620_s1 + $0x18] sm:$0xff]  ;;  %490 = vset.pattern.permute.xlu0 %v500_v22 }
   0x3   :  { %49 = vmatpush.bf16.msra.mxu0 %v40_v4  ;;  %74 = vmatpush.bf16.msra.mxu1 %v65_v6  ;;  %v189_v11 = vunpack.c.l.b16 %v432_v5  ;;  %v130_v13 = vsel %vm38_vm0, %v432_v5, 0  ;;  %v440_v15 = vld [vmem:[%s619_s0 + $0xc] sm:$0xf]  ;;  %v480_v17 = vld [vmem:[%s620_s1 + $0x20] sm:$0xff]  ;;  %v478_v26 = vld [vmem:[%s620_s1 + $0x10] sm:$0xff]  ;;  %vm405_vm9 = vcmask 355328  }
   0x4   :  { %v91_v8 = vpack.c.b16 %v90_v2, %v90_v2  ;;  %v257_v9 = vpack.c.b16 %v256_v3, %v256_v3  ;;  %139 = vmatpush.bf16.msra.mxu3 %v130_v13  ;;  %v162_v16 = vsel %vm38_vm0, %v440_v15, 0  ;;  %v484_v20 = vld [vmem:[%s620_s1 + $0x40] sm:$0xff]  ;;  %v483_v28 = vld [vmem:[%s620_s1 + $0x38] sm:$0xff]  ;;  %v481_v33 = vld [vmem:[%s620_s1 + $0x28] sm:$0xff] }
   0x5   :  { %v190_v12 = vpack.c.b16 %v189_v11, %v189_v11  ;;  %v373_v21 = vld [vmem:[%s621_s2] sm:$0xff]  ;;  %v482_v34 = vld [vmem:[%s620_s1 + $0x30] sm:$0xff] }
   0x6   :  { %92 = vrot.lane.b32.xlu0 %v91_v8, %s497_s28  ;;  %258 = vrot.lane.b32.xlu1 %v257_v9, %s498_s29  ;;  %v492_v3 = vld [vmem:[%s622_s4] ss:$0 sm:$0xff] }
   0x7   :  { %290 = vrot.lane.b32.xlu2 %v91_v8, %s499_s30  ;;  %419 = vmatmul.msk.bf16.vlgmr.msra.gmra.mxu0 %vm34_vm1, %v477_v7 }
   0x8   :  { %424 = vmatmul.msk.bf16.vlgmr.msra.gmra.mxu1 %vm34_vm1, %v476_v10  ;;  %439 = vmatmul.msk.bf16.vlgmr.msra.gmra.mxu3 %vm34_vm1, %v479_v14 }
   0x9   :  { %171 = vmatpush.bf16.msrb.mxu0 %v162_v16  ;;  %v387_v16 = vld [vmem:[%s623_s3] sm:$0xff] }
   0xe   :  { %223 = vrot.lane.b32.xlu0 %v91_v8, %s498_s29  ;;  %191 = vrot.lane.b32.xlu1 %v190_v12, %s497_s28 }
   0xf   :  { %377 = vperm.xlu2 %489, %v373_v21  }
  0x17   :  { %447 = vmatmul.msk.bf16.vlgmr.msrb.gmra.mxu0 %vm34_vm1, %v480_v17  ;;  %v374_v17 = vld [vmem:[%s621_s2 + $0x8] sm:$0xff] }
  0x61   :  { %v291_v18 = vpop.permute.xlu2 %290 }
  0x62   :  { %v296_v19 = vsel %vm38_vm0, %v291_v18, 0  ;;  %v388_v18 = vld [vmem:[%s623_s3 + $0x8] sm:$0xff] }
  0x63   :  { %305 = vmatpush.bf16.msra.mxu0 %v296_v19 }
  0x66   :  { %475 = vmatmul.msk.bf16.vlgmr.msra.gmra.mxu0 %vm34_vm1, %v484_v20 }
  0x69   :  { %v378_v19 = vpop.permute.xlu2 %377 }
  0x78   :  { %v93_v23 = vpop.permute.xlu0 %92  ;;  %v259_v24 = vpop.permute.xlu1 %258 }
  0x79   :  { %v98_v25 = vsel %vm38_vm0, %v93_v23, 0  ;;  %v264_v27 = vsel %vm38_vm0, %v259_v24, 0 }
  0x7a   :  { %107 = vmatpush.bf16.msra.mxu2 %v98_v25  ;;  %273 = vmatpush.bf16.msrb.mxu3 %v264_v27 }
  0x7d   :  { %431 = vmatmul.msk.bf16.vlgmr.msra.gmra.mxu2 %vm34_vm1, %v478_v26  ;;  %468 = vmatmul.msk.bf16.vlgmr.msrb.gmra.mxu3 %vm34_vm1, %v483_v28 }
  0x80   :  { %v224_v29 = vpop.permute.xlu0 %223  ;;  %v192_v30 = vpop.permute.xlu1 %191 }
  0x81   :  { %v229_v31 = vsel %vm38_vm0, %v224_v29, 0  ;;  %v197_v32 = vsel %vm38_vm0, %v192_v30, 0 }
  0x82   :  { %238 = vmatpush.bf16.msrb.mxu2 %v229_v31  ;;  %206 = vmatpush.bf16.msrb.mxu1 %v197_v32 }
  0x84   :  { %v51_v35 = vpop.f32.mrf.mxu0 }
  0x85   :  { %454 = vmatmul.msk.bf16.vlgmr.msrb.gmra.mxu1 %vm34_vm1, %v481_v33  ;;  %v76_v37 = vpop.f32.mrf.mxu1 }
  0x86   :  { %v77_v41 = vadd.f32 %v76_v37, %v51_v35 }
  0x8b   :  { %v141_v38 = vpop.f32.mrf.mxu3 }
  0x8c   :  { %v53_v36 = vpop.f32.mrf.mxu0 }
  0x8d   :  { %461 = vmatmul.msk.bf16.vlgmr.msrb.gmra.mxu2 %vm34_vm1, %v482_v34  ;;  %v78_v42 = vpop.f32.mrf.mxu1 }
  0x8e   :  { %v79_v48 = vadd.f32 %v78_v42, %v53_v36 }
  0x93   :  { %v143_v44 = vpop.f32.mrf.mxu3 }
  0x94   :  { %v173_v39 = vpop.f32.mrf.mxu0 }
  0x9c   :  { %v175_v47 = vpop.f32.mrf.mxu0 }
  0xe3   :  { %v307_v57 = vpop.f32.mrf.mxu0 }
  0xeb   :  { %v309_v4 = vpop.f32.mrf.mxu0 }
 0x100   :  { %v109_v40 = vpop.f32.mrf.mxu2  ;;  %v275_v54 = vpop.f32.mrf.mxu3 }
 0x101   :  { %v114_v43 = vadd.f32 %v109_v40, %v77_v41 }
 0x102   :  { %v208_v49 = vpop.f32.mrf.mxu1 }
 0x103   :  { %v146_v45 = vadd.f32 %v141_v38, %v114_v43 }
 0x105   :  { %v178_v50 = vadd.f32 %v173_v39, %v146_v45 }
 0x107   :  { %v213_v52 = vadd.f32 %v208_v49, %v178_v50 }
 0x108   :  { %v111_v46 = vpop.f32.mrf.mxu2  ;;  %v277_v1 = vpop.f32.mrf.mxu3 }
 0x109   :  { %v115_v51 = vadd.f32 %v111_v46, %v79_v48 }
 0x10a   :  { %v210_v60 = vpop.f32.mrf.mxu1 }
 0x10b   :  { %v147_v53 = vadd.f32 %v143_v44, %v115_v51 }
 0x10d   :  { %v179_v58 = vadd.f32 %v175_v47, %v147_v53 }
 0x10f   :  { %v214_v62 = vadd.f32 %v210_v60, %v179_v58 }
 0x110   :  { %v240_v55 = vpop.f32.mrf.mxu2 }
 0x111   :  { %v245_v56 = vadd.f32 %v240_v55, %v213_v52 }
 0x113   :  { %v280_v59 = vadd.f32 %v275_v54, %v245_v56 }
 0x115   :  { %v312_v61 = vadd.f32 %v307_v57, %v280_v59 }
 0x117   :  { %315 = vst.msk [vmem:[#allocation2] sm:$0xff] %vm314_vm2, %v312_v61 }
 0x118   :  { %v242_v63 = vpop.f32.mrf.mxu2 }
 0x119   :  { %v246_v0 = vadd.f32 %v242_v63, %v214_v62 }
 0x11b   :  { %v281_v2 = vadd.f32 %v277_v1, %v246_v0 }
 0x11d   :  { %v313_v5 = vadd.f32 %v309_v4, %v281_v2 }
 0x11e   :  { %v317_v6 = vld [vmem:[#allocation2] sm:$0xff] }
 0x11f   :  { %316 = vst.msk [vmem:[#allocation2 + $0x8] sm:$0xff] %vm314_vm2, %v313_v5  ;;  %v323_v7 = vmul.f32 %v492_v3, %v317_v6 }
 0x121   :  { %v325_v8 = vsel %vm314_vm2, %v323_v7, 0.0  ;;  %v333_v9 = vmul.f32 %v323_v7, %v323_v7 }
 0x122   :  { %326 = vadd.xlane.f32.xlu2 %v325_v8 }
 0x123   :  { %v335_v10 = vsel %vm314_vm2, %v333_v9, 0.0 }
 0x124   :  { %336 = vadd.xlane.f32.xlu1 %v335_v10 }
 0x126   :  { %v598_v11 = vld [vmem:[#allocation2 + $0x8] sm:$0xff] }
 0x127   :  { %v324_v12 = vmul.f32 %v492_v3, %v598_v11 }
 0x129   :  { %v328_v13 = vsel %vm314_vm2, %v324_v12, 0.0  ;;  %v334_v14 = vmul.f32 %v324_v12, %v324_v12 }
 0x12a   :  { %329 = vadd.xlane.f32.xlu0 %v328_v13 }
 0x12b   :  { %v338_v15 = vsel %vm314_vm2, %v334_v14, 0.0 }
 0x12c   :  { %339 = vadd.xlane.f32.xlu2 %v338_v15 }
 0x13d   :  { %391 = vperm.xlu1 %491, %v387_v16  }
 0x13e   :  { %382 = vperm.xlu0 %490, %v374_v17  }
 0x144   :  { %396 = vperm.xlu2 %489, %v388_v18  }
 0x195   :  { %v327_v20 = vpop.xlane.xlu2 %326 }
 0x196   :  { %v331_v21 = vmul.f32 0.03125, %v327_v20 }
 0x197   :  { %v337_v22 = vpop.xlane.xlu1 %336 }
 0x198   :  { %v343_v23 = vmul.f32 %v331_v21, %v331_v21  ;;  %v341_v24 = vmul.f32 0.03125, %v337_v22  ;;  %v347_v42 = vsub.f32 %v317_v6, %v331_v21 }
 0x19a   :  { %v345_v25 = vsub.f32 %v341_v24, %v343_v23 }
 0x19c   :  { %v349_v26 = vadd.f32 1e-05, %v345_v25 }
 0x19d   :  { %v330_v27 = vpop.xlane.xlu0 %329 }
 0x19e   :  { %493 = vrsqrt.f32 %v349_v26  ;;  %v332_v28 = vmul.f32 0.03125, %v330_v27  ;;  %vm357_vm4 = vweird.f32 %v349_v26 }
 0x19f   :  { %v340_v29 = vpop.xlane.xlu2 %339 }
 0x1a0   :  { %v344_v30 = vmul.f32 %v332_v28, %v332_v28  ;;  %v342_v31 = vmul.f32 0.03125, %v340_v29  ;;  %v348_v52 = vsub.f32 %v598_v11, %v332_v28 }
 0x1a2   :  { %v346_v32 = vsub.f32 %v342_v31, %v344_v30 }
 0x1a4   :  { %v494_v33 = vpop.eup %493  ;;  %v350_v34 = vadd.f32 1e-05, %v346_v32 }
 0x1a5   :  { %v352_v35 = vmul.f32 %v494_v33, %v349_v26  ;;  %vm358_vm3 = vweird.f32 %v494_v33 }
 0x1a6   :  { %495 = vrsqrt.f32 %v350_v34  ;;  %vm359_vm5 = vmor %vm357_vm4, %vm358_vm3  ;;  %vm367_vm7 = vweird.f32 %v350_v34 }
 0x1a7   :  { %v353_v36 = vmul.f32 %v494_v33, %v352_v35  ;;  %v397_v59 = vpop.permute.xlu2 %396 }
 0x1a9   :  { %v354_v37 = vmul.f32 0.5, %v353_v36 }
 0x1ab   :  { %v355_v38 = vsub.f32 1.5, %v354_v37 }
 0x1ac   :  { %v496_v39 = vpop.eup %495 }
 0x1ad   :  { %v362_v40 = vmul.f32 %v496_v39, %v350_v34  ;;  %v356_v41 = vmul.f32 %v494_v33, %v355_v38  ;;  %vm368_vm6 = vweird.f32 %v496_v39 }
 0x1ae   :  { %vm369_vm8 = vmor %vm367_vm7, %vm368_vm6 }
 0x1af   :  { %v363_v43 = vmul.f32 %v496_v39, %v362_v40  ;;  %v360_v44 = vsel %vm359_vm5, %v494_v33, %v356_v41  ;;  %v392_v47 = vpop.permute.xlu1 %391 }
 0x1b0   :  { %v371_v45 = vmul.f32 %v360_v44, %v347_v42  ;;  %v383_v54 = vpop.permute.xlu0 %382 }
 0x1b1   :  { %v364_v46 = vmul.f32 0.5, %v363_v43 }
 0x1b2   :  { %v385_v48 = vmul.f32 %v378_v19, %v371_v45 }
 0x1b3   :  { %v365_v49 = vsub.f32 1.5, %v364_v46 }
 0x1b4   :  { %v399_v50 = vadd.f32 %v392_v47, %v385_v48 }
 0x1b5   :  { %v366_v51 = vmul.f32 %v496_v39, %v365_v49 }
 0x1b6   :  { %v401_v53 = vmax.f32 %v399_v50, 0.0 }
 0x1b7   :  { %v370_v55 = vsel %vm369_vm8, %v496_v39, %v366_v51 }
 0x1b8   :  { %v403_v56 = vpack.c.bf16 %v401_v53, %v401_v53  ;;  %v372_v57 = vmul.f32 %v370_v55, %v348_v52 }
 0x1ba   :  { %406 = vst.msk [vmem:[%s624_s5] sm:$0xf] %vm405_vm9, %v403_v56  ;;  %v386_v58 = vmul.f32 %v383_v54, %v372_v57 }
 0x1bc   :  { %v400_v60 = vadd.f32 %v397_v59, %v386_v58 }
 0x1be   :  { %v402_v61 = vmax.f32 %v400_v60, 0.0 }
 0x1c0   :  { %v404_v62 = vpack.c.bf16 %v402_v61, %v402_v61 }
 0x1c2   :  { %407 = vst.msk [vmem:[%s624_s5 + $0x4] sm:$0xf] %vm405_vm9, %v404_v62 }

// kernel: vae_forward.10
= control target key start
LH: loop header
LB: loop body
LE: loop exit
PB: predicated region body
PF: predicated region fallthrough
CT: control target
= control target key end

     0   :  { %s828_s22 = smov 127   ;;  %s829_s23 = smov 125   ;;  %vm51_vm0 = vcmask 130048   ;;  %v831_v27 = vmov 0   ;;  %vm459_vm1 = vcmask 113664   ;;  %vm636_vm8 = vcmask 109568   ;;  %s1036_s0 = inlined_call_operand.vmem [shape: bf16[4,16,18], index: 0, kind: input, shape index: {}]   ;;  %s1037_s1 = inlined_call_operand.vmem [shape: bf16[9,32,16], index: 1, kind: input, shape index: {}]   ;;  %s1038_s4 = inlined_call_operand.vmem [shape: f32[1,14], index: 4, kind: input, shape index: {}]   ;;  %s1039_s2 = inlined_call_operand.vmem [shape: f32[32,1], index: 2, kind: input, shape index: {}]   ;;  %s1040_s3 = inlined_call_operand.vmem [shape: f32[32,1], index: 3, kind: input, shape index: {}]   ;;  %s1041_s5 = inlined_call_operand.vmem [shape: bf16[32,14], index: 5, kind: output, shape index: {}]  }
   0x1   :  { %v789_v0 = vld [vmem:[%s1036_s0] sm:$0xff]  ;;  %v792_v1 = vld [vmem:[%s1036_s0 + $0x8] sm:$0xff]  ;;  %v794_v2 = vld [vmem:[%s1037_s1 + $0x18] sm:$0xff]  ;;  %s830_s28 = smov 124   ;;  %818 = vset.pattern.permute.xlu2 %v831_v27  ;;  %817 = vset.pattern.permute.xlu1 %v831_v27 }
   0x2   :  { %133 = vrot.lane.b32.xlu0 %v789_v0, %s828_s22  ;;  %380 = vrot.lane.b32.xlu1 %v792_v1, %s829_s23  ;;  %v797_v3 = vld [vmem:[%s1036_s0 + $0x10] sm:$0xff]  ;;  %v790_v5 = vld [vmem:[%s1037_s1] sm:$0xff] }
   0x3   :  { %427 = vrot.lane.b32.xlu2 %v789_v0, %s830_s28  ;;  %811 = vmatpush.bf16.msra.mxu1 %v792_v1  ;;  %v793_v4 = vld [vmem:[%s1037_s1 + $0x10] sm:$0xff]  ;;  %v791_v6 = vld [vmem:[%s1037_s1 + $0x8] sm:$0xff]  ;;  %v800_v8 = vld [vmem:[%s1036_s0 + $0x18] sm:$0xff] }
   0x4   :  { %65 = vmatpush.bf16.msra.mxu0 %v792_v1  ;;  %202 = vmatpush.bf16.msra.mxu3 %v797_v3  ;;  %v798_v7 = vld [vmem:[%s1037_s1 + $0x30] sm:$0xff]  ;;  %v801_v9 = vld [vmem:[%s1037_s1 + $0x40] sm:$0xff]  ;;  %v799_v11 = vld [vmem:[%s1037_s1 + $0x38] sm:$0xff] }
   0x5   :  { %v802_v12 = vld [vmem:[%s1037_s1 + $0x48] sm:$0xff]  ;;  %v795_v15 = vld [vmem:[%s1037_s1 + $0x20] sm:$0xff]  ;;  %v807_v16 = vld [vmem:[%s1037_s1 + $0x70] sm:$0xff]  ;;  %816 = vset.pattern.permute.xlu0 %v831_v27 }
   0x6   :  { %664 = vmatmul.msk.bf16.vlgmr.msra.gmra.mxu1 %vm51_vm0, %v794_v2  ;;  %v809_v17 = vld [vmem:[%s1037_s1 + $0x80] sm:$0xff]  ;;  %v803_v20 = vld [vmem:[%s1037_s1 + $0x50] sm:$0xff]  ;;  %v796_v21 = vld [vmem:[%s1037_s1 + $0x28] sm:$0xff] }
   0x7   :  { %106 = vmatpush.bf16.msrb.mxu1 %v789_v0  ;;  %663 = vmatmul.msk.bf16.vlgmr.msra.gmra.mxu0 %vm51_vm0, %v793_v4  ;;  %v808_v22 = vld [vmem:[%s1037_s1 + $0x78] sm:$0xff]  ;;  %v810_v23 = vld [vmem:[%s1037_s1 + $0x88] sm:$0xff]  ;;  %v805_v25 = vld [vmem:[%s1037_s1 + $0x60] sm:$0xff] }
   0x8   :  { %711 = vmatmul.msk.bf16.vlgmr.msra.gmra.mxu3 %vm51_vm0, %v798_v7  ;;  %255 = vmatpush.bf16.msrb.mxu0 %v800_v8  ;;  %v804_v24 = vld [vmem:[%s1037_s1 + $0x58] sm:$0xff]  ;;  %v806_v26 = vld [vmem:[%s1037_s1 + $0x68] sm:$0xff]  ;;  %v574_v29 = vld [vmem:[%s1039_s2 + $0x10] sm:$0xff] }
   0x9   :  { %v600_v32 = vld [vmem:[%s1040_s3] sm:$0xff]  ;;  %v573_v34 = vld [vmem:[%s1039_s2 + $0x8] sm:$0xff]  ;;  %v575_v39 = vld [vmem:[%s1039_s2 + $0x18] sm:$0xff] }
   0xa   :  { %333 = vrot.lane.b32.xlu0 %v789_v0, %s829_s23  ;;  %286 = vrot.lane.b32.xlu1 %v797_v3, %s828_s22  ;;  %v572_v35 = vld [vmem:[%s1039_s2] sm:$0xff] }
   0xb   :  { %588 = vperm.xlu2 %818, %v574_v29  }
  0x12   :  { %583 = vperm.xlu1 %817, %v573_v34   ;;  %578 = vperm.xlu0 %816, %v572_v35  }
  0x13   :  { %606 = vperm.xlu2 %818, %v600_v32  }
  0x16   :  { %677 = vmatmul.msk.bf16.vlgmr.msrb.gmra.mxu1 %vm51_vm0, %v790_v5 }
  0x17   :  { %731 = vmatmul.msk.bf16.vlgmr.msrb.gmra.mxu0 %vm51_vm0, %v801_v9 }
  0x18   :  { %712 = vmatmul.msk.bf16.gmra.mxu3 %vm51_vm0, %v799_v11 }
  0x1a   :  { %593 = vperm.xlu1 %817, %v575_v39  }
  0x26   :  { %678 = vmatmul.msk.bf16.gmra.mxu1 %vm51_vm0, %v791_v6 }
  0x27   :  { %732 = vmatmul.msk.bf16.gmra.mxu0 %vm51_vm0, %v802_v12 }
  0x5d   :  { %v428_v10 = vpop.permute.xlu2 %427 }
  0x5e   :  { %443 = vmatpush.bf16.msra.mxu0 %v428_v10 }
  0x61   :  { %787 = vmatmul.msk.bf16.vlgmr.msra.gmra.mxu0 %vm51_vm0, %v809_v17 }
  0x71   :  { %788 = vmatmul.msk.bf16.gmra.mxu0 %vm51_vm0, %v810_v23 }
  0x74   :  { %v134_v13 = vpop.permute.xlu0 %133  ;;  %v381_v14 = vpop.permute.xlu1 %380 }
  0x75   :  { %149 = vmatpush.bf16.msra.mxu2 %v134_v13  ;;  %396 = vmatpush.bf16.msrb.mxu3 %v381_v14 }
  0x78   :  { %691 = vmatmul.msk.bf16.vlgmr.msra.gmra.mxu2 %vm51_vm0, %v795_v15  ;;  %773 = vmatmul.msk.bf16.vlgmr.msrb.gmra.mxu3 %vm51_vm0, %v807_v16 }
  0x7c   :  { %v334_v18 = vpop.permute.xlu0 %333  ;;  %v287_v19 = vpop.permute.xlu1 %286 }
  0x7d   :  { %349 = vmatpush.bf16.msrb.mxu2 %v334_v18  ;;  %302 = vmatpush.bf16.msra.mxu1 %v287_v19  ;;  %v819_v19 = vld [vmem:[%s1038_s4] ss:$0 sm:$0xff] }
  0x80   :  { %745 = vmatmul.msk.bf16.vlgmr.msra.gmra.mxu1 %vm51_vm0, %v803_v20 }
  0x83   :  { %v72_v28 = vpop.f32.mrf.mxu1 }
  0x84   :  { %v67_v30 = vpop.f32.mrf.mxu0 }
  0x88   :  { %692 = vmatmul.msk.bf16.gmra.mxu2 %vm51_vm0, %v796_v21  ;;  %774 = vmatmul.msk.bf16.gmra.mxu3 %vm51_vm0, %v808_v22 }
  0x8b   :  { %v74_v31 = vpop.f32.mrf.mxu1  ;;  %v204_v37 = vpop.f32.mrf.mxu3 }
  0x8c   :  { %v69_v33 = vpop.f32.mrf.mxu0 }
  0x90   :  { %746 = vmatmul.msk.bf16.gmra.mxu1 %vm51_vm0, %v804_v24 }
  0x93   :  { %v108_v36 = vpop.f32.mrf.mxu1  ;;  %v206_v41 = vpop.f32.mrf.mxu3 }
  0x94   :  { %v257_v38 = vpop.f32.mrf.mxu0  ;;  %v109_v50 = vadd.f32 %v108_v36, %v67_v30 }
  0x98   :  { %759 = vmatmul.msk.bf16.vlgmr.msrb.gmra.mxu2 %vm51_vm0, %v805_v25 }
  0x9b   :  { %v110_v40 = vpop.f32.mrf.mxu1  ;;  %v209_v46 = vpop.f32.mrf.mxu3 }
  0x9c   :  { %v259_v43 = vpop.f32.mrf.mxu0  ;;  %v111_v57 = vadd.f32 %v110_v40, %v69_v33 }
  0xa3   :  { %v113_v44 = vpop.f32.mrf.mxu1  ;;  %v211_v51 = vpop.f32.mrf.mxu3 }
  0xa4   :  { %v262_v47 = vpop.f32.mrf.mxu0  ;;  %v114_v2 = vadd.f32 %v113_v44, %v72_v28 }
  0xa8   :  { %760 = vmatmul.msk.bf16.gmra.mxu2 %vm51_vm0, %v806_v26 }
  0xab   :  { %v115_v48 = vpop.f32.mrf.mxu1 }
  0xac   :  { %v264_v53 = vpop.f32.mrf.mxu0  ;;  %v116_v13 = vadd.f32 %v115_v48, %v74_v31 }
  0xde   :  { %v445_v61 = vpop.f32.mrf.mxu0 }
  0xe6   :  { %v447_v12 = vpop.f32.mrf.mxu0 }
  0xee   :  { %v450_v29 = vpop.f32.mrf.mxu0 }
  0xf6   :  { %v452_v44 = vpop.f32.mrf.mxu0 }
  0xfb   :  { %v151_v42 = vpop.f32.mrf.mxu2  ;;  %v398_v60 = vpop.f32.mrf.mxu3 }
  0xfc   :  { %v161_v52 = vadd.f32 %v151_v42, %v109_v50 }
  0xfd   :  { %v304_v54 = vpop.f32.mrf.mxu1 }
  0xfe   :  { %v214_v55 = vadd.f32 %v204_v37, %v161_v52 }
 0x100   :  { %v267_v58 = vadd.f32 %v257_v38, %v214_v55 }
 0x102   :  { %v314_v62 = vadd.f32 %v304_v54, %v267_v58  ;;  %v603_v58 = vld [vmem:[%s1040_s3 + $0x18] sm:$0xff] }
 0x103   :  { %v153_v45 = vpop.f32.mrf.mxu2  ;;  %v400_v8 = vpop.f32.mrf.mxu3 }
 0x104   :  { %v162_v59 = vadd.f32 %v153_v45, %v111_v57 }
 0x105   :  { %v306_v0 = vpop.f32.mrf.mxu1 }
 0x106   :  { %v215_v63 = vadd.f32 %v206_v41, %v162_v59  ;;  %v601_v59 = vld [vmem:[%s1040_s3 + $0x8] sm:$0xff] }
 0x108   :  { %v268_v4 = vadd.f32 %v259_v43, %v215_v63  ;;  %v999_v63 = vpop.permute.xlu1 %583 }
 0x10a   :  { %v315_v9 = vadd.f32 %v306_v0, %v268_v4  ;;  %v579_v0 = vpop.permute.xlu0 %578 }
 0x10b   :  { %v156_v49 = vpop.f32.mrf.mxu2  ;;  %v403_v25 = vpop.f32.mrf.mxu3 }
 0x10c   :  { %v163_v5 = vadd.f32 %v156_v49, %v114_v2 }
 0x10d   :  { %v309_v15 = vpop.f32.mrf.mxu1 }
 0x10e   :  { %v216_v10 = vadd.f32 %v209_v46, %v163_v5 }
 0x110   :  { %v269_v16 = vadd.f32 %v262_v47, %v216_v10 }
 0x112   :  { %v316_v22 = vadd.f32 %v309_v15, %v269_v16 }
 0x113   :  { %v158_v56 = vpop.f32.mrf.mxu2  ;;  %v405_v42 = vpop.f32.mrf.mxu3 }
 0x114   :  { %v164_v17 = vadd.f32 %v158_v56, %v116_v13 }
 0x115   :  { %v311_v32 = vpop.f32.mrf.mxu1 }
 0x116   :  { %v217_v23 = vadd.f32 %v211_v51, %v164_v17 }
 0x118   :  { %v270_v30 = vadd.f32 %v264_v53, %v217_v23 }
 0x11a   :  { %v317_v36 = vadd.f32 %v311_v32, %v270_v30 }
 0x11b   :  { %v351_v1 = vpop.f32.mrf.mxu2 }
 0x11c   :  { %v361_v3 = vadd.f32 %v351_v1, %v314_v62 }
 0x11e   :  { %v408_v6 = vadd.f32 %v398_v60, %v361_v3  ;;  %v602_v60 = vld [vmem:[%s1040_s3 + $0x10] sm:$0xff]  ;;  %v1001_v3 = vpop.permute.xlu1 %593 }
 0x120   :  { %v455_v7 = vadd.f32 %v445_v61, %v408_v6  ;;  %v997_v61 = vpop.permute.xlu2 %588 }
 0x122   :  { %460 = vst.msk [vmem:[#allocation2] sm:$0xff] %vm459_vm1, %v455_v7 }
 0x123   :  { %v353_v11 = vpop.f32.mrf.mxu2 }
 0x124   :  { %v362_v14 = vadd.f32 %v353_v11, %v315_v9 }
 0x126   :  { %v409_v18 = vadd.f32 %v400_v8, %v362_v14 }
 0x128   :  { %v456_v20 = vadd.f32 %v447_v12, %v409_v18  ;;  %v607_v62 = vpop.permute.xlu2 %606 }
 0x129   :  { %v965_v21 = vld [vmem:[#allocation2] sm:$0xff] }
 0x12a   :  { %461 = vst.msk [vmem:[#allocation2 + $0x8] sm:$0xff] %vm459_vm1, %v456_v20  ;;  %v472_v24 = vmul.f32 %v819_v19, %v965_v21 }
 0x12b   :  { %v356_v26 = vpop.f32.mrf.mxu2 }
 0x12c   :  { %v363_v27 = vadd.f32 %v356_v26, %v316_v22  ;;  %v476_v28 = vsel %vm459_vm1, %v472_v24, 0.0  ;;  %v492_v34 = vmul.f32 %v472_v24, %v472_v24 }
 0x12d   :  { %477 = vadd.xlane.f32.xlu2 %v476_v28 }
 0x12e   :  { %v410_v31 = vadd.f32 %v403_v25, %v363_v27  ;;  %v496_v41 = vsel %vm459_vm1, %v492_v34, 0.0 }
 0x130   :  { %v457_v33 = vadd.f32 %v450_v29, %v410_v31 }
 0x131   :  { %v970_v35 = vld [vmem:[#allocation2 + $0x8] sm:$0xff] }
 0x132   :  { %462 = vst.msk [vmem:[#allocation2 + $0x10] sm:$0xff] %vm459_vm1, %v457_v33  ;;  %v473_v37 = vmul.f32 %v819_v19, %v970_v35 }
 0x133   :  { %v358_v38 = vpop.f32.mrf.mxu2 }
 0x134   :  { %v364_v39 = vadd.f32 %v358_v38, %v317_v36  ;;  %v479_v40 = vsel %vm459_vm1, %v473_v37, 0.0  ;;  %v493_v46 = vmul.f32 %v473_v37, %v473_v37 }
 0x135   :  { %480 = vadd.xlane.f32.xlu0 %v479_v40  ;;  %497 = vadd.xlane.f32.xlu2 %v496_v41 }
 0x136   :  { %v411_v43 = vadd.f32 %v405_v42, %v364_v39  ;;  %v499_v50 = vsel %vm459_vm1, %v493_v46, 0.0 }
 0x138   :  { %v458_v45 = vadd.f32 %v452_v44, %v411_v43 }
 0x139   :  { %v976_v47 = vld [vmem:[#allocation2 + $0x10] sm:$0xff] }
 0x13a   :  { %463 = vst.msk [vmem:[#allocation2 + $0x18] sm:$0xff] %vm459_vm1, %v458_v45  ;;  %v474_v48 = vmul.f32 %v819_v19, %v976_v47 }
 0x13c   :  { %v482_v49 = vsel %vm459_vm1, %v474_v48, 0.0  ;;  %v494_v51 = vmul.f32 %v474_v48, %v474_v48 }
 0x13d   :  { %483 = vadd.xlane.f32.xlu1 %v482_v49  ;;  %500 = vadd.xlane.f32.xlu0 %v499_v50 }
 0x13e   :  { %v502_v54 = vsel %vm459_vm1, %v494_v51, 0.0 }
 0x141   :  { %v982_v52 = vld [vmem:[#allocation2 + $0x18] sm:$0xff] }
 0x142   :  { %v475_v53 = vmul.f32 %v819_v19, %v982_v52 }
 0x144   :  { %v485_v55 = vsel %vm459_vm1, %v475_v53, 0.0  ;;  %v495_v56 = vmul.f32 %v475_v53, %v475_v53 }
 0x145   :  { %503 = vadd.xlane.f32.xlu1 %v502_v54  ;;  %486 = vadd.xlane.f32.xlu2 %v485_v55 }
 0x146   :  { %v505_v57 = vsel %vm459_vm1, %v495_v56, 0.0 }
 0x14d   :  { %506 = vadd.xlane.f32.xlu2 %v505_v57 }
 0x151   :  { %621 = vperm.xlu0 %816, %v603_v58  }
 0x15e   :  { %611 = vperm.xlu1 %817, %v601_v59  }
 0x165   :  { %616 = vperm.xlu2 %818, %v602_v60  }
 0x1a0   :  { %v478_v1 = vpop.xlane.xlu2 %477 }
 0x1a1   :  { %v488_v2 = vmul.f32 0.125, %v478_v1 }
 0x1a3   :  { %v512_v6 = vmul.f32 %v488_v2, %v488_v2  ;;  %v520_v34 = vsub.f32 %v965_v21, %v488_v2 }
 0x1a8   :  { %v481_v4 = vpop.xlane.xlu0 %480  ;;  %v498_v5 = vpop.xlane.xlu2 %497 }
 0x1a9   :  { %v508_v7 = vmul.f32 0.125, %v498_v5  ;;  %v489_v9 = vmul.f32 0.125, %v481_v4 }
 0x1ab   :  { %v516_v8 = vsub.f32 %v508_v7, %v512_v6  ;;  %v513_v13 = vmul.f32 %v489_v9, %v489_v9  ;;  %v521_v55 = vsub.f32 %v970_v35, %v489_v9 }
 0x1ad   :  { %v524_v10 = vadd.f32 1e-05, %v516_v8 }
 0x1af   :  { %820 = vrsqrt.f32 %v524_v10  ;;  %vm534_vm3 = vweird.f32 %v524_v10 }
 0x1b0   :  { %v484_v11 = vpop.xlane.xlu1 %483  ;;  %v501_v12 = vpop.xlane.xlu0 %500 }
 0x1b1   :  { %v509_v14 = vmul.f32 0.125, %v501_v12  ;;  %v1003_v17 = vmul.f32 0.125, %v484_v11 }
 0x1b3   :  { %v517_v15 = vsub.f32 %v509_v14, %v513_v13  ;;  %v514_v24 = vmul.f32 %v1003_v17, %v1003_v17  ;;  %v522_v1 = vsub.f32 %v976_v47, %v1003_v17 }
 0x1b5   :  { %v821_v16 = vpop.eup %820  ;;  %v525_v18 = vadd.f32 1e-05, %v517_v15 }
 0x1b6   :  { %v529_v19 = vmul.f32 %v821_v16, %v524_v10  ;;  %vm535_vm2 = vweird.f32 %v821_v16 }
 0x1b7   :  { %822 = vrsqrt.f32 %v525_v18  ;;  %vm536_vm4 = vmor %vm534_vm3, %vm535_vm2  ;;  %vm544_vm6 = vweird.f32 %v525_v18 }
 0x1b8   :  { %v530_v20 = vmul.f32 %v821_v16, %v529_v19  ;;  %v504_v22 = vpop.xlane.xlu1 %503  ;;  %v487_v23 = vpop.xlane.xlu2 %486 }
 0x1b9   :  { %v510_v25 = vmul.f32 0.125, %v504_v22  ;;  %v1007_v31 = vmul.f32 0.125, %v487_v23 }
 0x1ba   :  { %v531_v26 = vmul.f32 0.5, %v530_v20 }
 0x1bb   :  { %v518_v27 = vsub.f32 %v510_v25, %v514_v24  ;;  %v515_v40 = vmul.f32 %v1007_v31, %v1007_v31  ;;  %v523_v47 = vsub.f32 %v982_v52, %v1007_v31 }
 0x1bc   :  { %v532_v28 = vsub.f32 1.5, %v531_v26 }
 0x1bd   :  { %v823_v29 = vpop.eup %822  ;;  %v526_v30 = vadd.f32 1e-05, %v518_v27 }
 0x1be   :  { %v533_v32 = vmul.f32 %v821_v16, %v532_v28  ;;  %v539_v33 = vmul.f32 %v823_v29, %v525_v18  ;;  %vm545_vm5 = vweird.f32 %v823_v29 }
 0x1bf   :  { %824 = vrsqrt.f32 %v526_v30  ;;  %vm546_vm7 = vmor %vm544_vm6, %vm545_vm5  ;;  %vm554_vm10 = vweird.f32 %v526_v30 }
 0x1c0   :  { %v537_v36 = vsel %vm536_vm4, %v821_v16, %v533_v32  ;;  %v540_v37 = vmul.f32 %v823_v29, %v539_v33  ;;  %v507_v38 = vpop.xlane.xlu2 %506 }
 0x1c1   :  { %v568_v39 = vmul.f32 %v537_v36, %v520_v34  ;;  %v511_v41 = vmul.f32 0.125, %v507_v38 }
 0x1c2   :  { %v541_v42 = vmul.f32 0.5, %v540_v37 }
 0x1c3   :  { %v596_v43 = vmul.f32 %v579_v0, %v568_v39  ;;  %v519_v44 = vsub.f32 %v511_v41, %v515_v40  ;;  %v622_v19 = vpop.permute.xlu0 %621 }
 0x1c4   :  { %v542_v45 = vsub.f32 1.5, %v541_v42 }
 0x1c5   :  { %v825_v46 = vpop.eup %824  ;;  %v624_v48 = vadd.f32 %v607_v62, %v596_v43  ;;  %v527_v49 = vadd.f32 1e-05, %v519_v44 }
 0x1c6   :  { %v549_v21 = vmul.f32 %v825_v46, %v526_v30  ;;  %v543_v50 = vmul.f32 %v823_v29, %v542_v45  ;;  %vm555_vm9 = vweird.f32 %v825_v46 }
 0x1c7   :  { %v628_v51 = vmax.f32 %v624_v48, 0.0  ;;  %826 = vrsqrt.f32 %v527_v49  ;;  %vm556_vm11 = vmor %vm554_vm10, %vm555_vm9  ;;  %vm564_vm13 = vweird.f32 %v527_v49 }
 0x1c8   :  { %v550_v53 = vmul.f32 %v825_v46, %v549_v21  ;;  %v547_v54 = vsel %vm546_vm7, %v823_v29, %v543_v50  ;;  %v617_v12 = vpop.permute.xlu2 %616 }
 0x1c9   :  { %v632_v56 = vpack.c.bf16 %v628_v51, %v628_v51  ;;  %v569_v58 = vmul.f32 %v547_v54, %v521_v55 }
 0x1ca   :  { %v551_v57 = vmul.f32 0.5, %v550_v53 }
 0x1cb   :  { %637 = vst.msk [vmem:[%s1041_s5] sm:$0xf] %vm636_vm8, %v632_v56  ;;  %v597_v35 = vmul.f32 %v999_v63, %v569_v58 }
 0x1cc   :  { %v552_v59 = vsub.f32 1.5, %v551_v57 }
 0x1cd   :  { %v827_v60 = vpop.eup %826 }
 0x1ce   :  { %v559_v62 = vmul.f32 %v827_v60, %v527_v49  ;;  %v553_v0 = vmul.f32 %v825_v46, %v552_v59  ;;  %vm565_vm12 = vweird.f32 %v827_v60 }
 0x1cf   :  { %vm566_vm14 = vmor %vm564_vm13, %vm565_vm12 }
 0x1d0   :  { %v560_v2 = vmul.f32 %v827_v60, %v559_v62  ;;  %v557_v4 = vsel %vm556_vm11, %v825_v46, %v553_v0  ;;  %v612_v5 = vpop.permute.xlu1 %611 }
 0x1d1   :  { %v570_v6 = vmul.f32 %v557_v4, %v522_v1  ;;  %v625_v7 = vadd.f32 %v612_v5, %v597_v35 }
 0x1d2   :  { %v561_v8 = vmul.f32 0.5, %v560_v2 }
 0x1d3   :  { %v598_v9 = vmul.f32 %v997_v61, %v570_v6  ;;  %v629_v10 = vmax.f32 %v625_v7, 0.0 }
 0x1d4   :  { %v562_v11 = vsub.f32 1.5, %v561_v8 }
 0x1d5   :  { %v626_v13 = vadd.f32 %v617_v12, %v598_v9  ;;  %v633_v14 = vpack.c.bf16 %v629_v10, %v629_v10 }
 0x1d6   :  { %v563_v15 = vmul.f32 %v827_v60, %v562_v11 }
 0x1d7   :  { %v630_v63 = vmax.f32 %v626_v13, 0.0  ;;  %638 = vst.msk [vmem:[%s1041_s5 + $0x4] sm:$0xf] %vm636_vm8, %v633_v14 }
 0x1d8   :  { %v567_v16 = vsel %vm566_vm14, %v827_v60, %v563_v15 }
 0x1d9   :  { %v571_v61 = vmul.f32 %v567_v16, %v523_v47  ;;  %v634_v17 = vpack.c.bf16 %v630_v63, %v630_v63 }
 0x1db   :  { %v599_v18 = vmul.f32 %v1001_v3, %v571_v61  ;;  %639 = vst.msk [vmem:[%s1041_s5 + $0x8] sm:$0xf] %vm636_vm8, %v634_v17 }
 0x1dd   :  { %v627_v20 = vadd.f32 %v622_v19, %v599_v18 }
 0x1df   :  { %v631_v52 = vmax.f32 %v627_v20, 0.0 }
 0x1e1   :  { %v635_v22 = vpack.c.bf16 %v631_v52, %v631_v52 }
 0x1e3   :  { %640 = vst.msk [vmem:[%s1041_s5 + $0xc] sm:$0xf] %vm636_vm8, %v635_v22 }

// kernel: vae_forward.12
= control target key start
LH: loop header
LB: loop body
LE: loop exit
PB: predicated region body
PF: predicated region fallthrough
CT: control target
= control target key end

     0   :  { %s511_s20 = smov 125   ;;  %s512_s21 = smov 127   ;;  %vm44_vm0 = vcmask 261120   ;;  %vm62_vm1 = vcmask 113664   ;;  %v517_v46 = vmov 0   ;;  %vm129_vm2 = vcmask 228464   ;;  %s615_s0 = inlined_call_operand.vmem [shape: bf16[1,32,18], index: 0, kind: input, shape index: {}]   ;;  %s616_s1 = inlined_call_operand.vmem [shape: bf16[9,16,32], index: 1, kind: input, shape index: {}]   ;;  %s617_s4 = inlined_call_operand.vmem [shape: f32[1,56], index: 4, kind: input, shape index: {}]   ;;  %s618_s2 = inlined_call_operand.vmem [shape: f32[16,1], index: 2, kind: input, shape index: {}]   ;;  %s619_s3 = inlined_call_operand.vmem [shape: f32[16,1], index: 3, kind: input, shape index: {}]   ;;  %s620_s5 = inlined_call_operand.vmem [shape: bf16[16,56], index: 5, kind: output, shape index: {}]  }
   0x1   :  { %v486_v0 = vld [vmem:[%s615_s0 + $0x8] sm:$0xff]  ;;  %s513_s22 = smov 124   ;;  %v485_v1 = vld [vmem:[%s615_s0] sm:$0xff]  ;;  %v489_v4 = vld [vmem:[%s616_s1 + $0x10] sm:$0xff]  ;;  %s514_s17 = smov 28   ;;  %504 = vset.pattern.permute.xlu1 %v517_v46  ;;  %503 = vset.pattern.permute.xlu0 %v517_v46  ;;  %vm196_vm3 = vcmask 343264  }
   0x2   :  { %167 = vrot.lane.b32.xlu1 %v486_v0, %s511_s20  ;;  %100 = vrot.lane.b32.xlu0 %v486_v0, %s512_s21  ;;  %v487_v2 = vld [vmem:[%s616_s1] sm:$0xff]  ;;  %v488_v10 = vld [vmem:[%s616_s1 + $0x8] sm:$0xff]  ;;  %s515_s18 = smov 14   ;;  %vm317_vm4 = vcmask 458064   ;;  %vm328_vm5 = vcmask 457728   ;;  %vm409_vm12 = vcmask 453632  }
   0x3   :  { %234 = vrot.lane.b32.xlu2 %v486_v0, %s513_s22  ;;  %54 = vmatpush.bf16.msra.mxu0 %v486_v0  ;;  %v491_v3 = vld [vmem:[%s616_s1 + $0x20] sm:$0xff]  ;;  %v490_v11 = vld [vmem:[%s616_s1 + $0x18] sm:$0xff]  ;;  %v493_v13 = vld [vmem:[%s616_s1 + $0x30] sm:$0xff] }
   0x4   :  { %152 = vmatpush.bf16.msra.mxu3 %v486_v0  ;;  %85 = vmatpush.bf16.msra.mxu1 %v486_v0  ;;  %v494_v12 = vld [vmem:[%s616_s1 + $0x38] sm:$0xff]  ;;  %v492_v16 = vld [vmem:[%s616_s1 + $0x28] sm:$0xff]  ;;  %v495_v17 = vld [vmem:[%s616_s1 + $0x40] sm:$0xff]  ;;  %s516_s1 = smov 42  }
   0x5   :  { %v378_v45 = vld [vmem:[%s618_s2 + $0x8] sm:$0xff]  ;;  %505 = vset.pattern.permute.xlu2 %v517_v46  ;;  %v506_v52 = vld [vmem:[%s617_s4] ss:$0 sm:$0xff] }
   0x7   :  { %55 = vmatpush.bf16.msra.mxu0 %v485_v1 }
   0x8   :  { %153 = vmatpush.bf16.msra.mxu3 %v485_v1  ;;  %86 = vmatpush.bf16.msra.mxu1 %v485_v1 }
   0xa   :  { %165 = vrot.lane.b32.xlu1 %v485_v1, %s511_s20  ;;  %98 = vrot.lane.b32.xlu0 %v485_v1, %s512_s21 }
   0xb   :  { %232 = vrot.lane.b32.xlu2 %v485_v1, %s513_s22  ;;  %428 = vmatmul.msk.bf16.vlgmr.msra.gmra.mxu0 %vm44_vm0, %v487_v2  ;;  %v391_v2 = vld [vmem:[%s619_s3] sm:$0xff] }
   0xc   :  { %451 = vmatmul.msk.bf16.vlgmr.msra.gmra.mxu3 %vm44_vm0, %v491_v3  ;;  %437 = vmatmul.msk.bf16.vlgmr.msra.gmra.mxu1 %vm44_vm0, %v489_v4 }
  0x5d   :  { %v235_v7 = vpop.permute.xlu2 %234 }
  0x65   :  { %v233_v14 = vpop.permute.xlu2 %232 }
  0x74   :  { %v168_v5 = vpop.permute.xlu1 %167  ;;  %v101_v6 = vpop.permute.xlu0 %100 }
  0x75   :  { %113 = vmatpush.bf16.msra.mxu2 %v101_v6  ;;  %272 = vmatpush.bf16.msrb.mxu3 %v101_v6 }
  0x76   :  { %180 = vmatpush.bf16.msrb.mxu0 %v168_v5  ;;  %219 = vmatpush.bf16.msrb.mxu1 %v168_v5 }
  0x7c   :  { %v166_v8 = vpop.permute.xlu1 %165  ;;  %v99_v9 = vpop.permute.xlu0 %98 }
  0x7d   :  { %114 = vmatpush.bf16.msra.mxu2 %v99_v9  ;;  %181 = vmatpush.bf16.msrb.mxu0 %v166_v8 }
  0x7e   :  { %273 = vmatpush.bf16.msrb.mxu3 %v99_v9  ;;  %220 = vmatpush.bf16.msrb.mxu1 %v166_v8 }
  0x80   :  { %442 = vmatmul.msk.bf16.vlgmr.msra.gmra.mxu2 %vm44_vm0, %v488_v10  ;;  %456 = vmatmul.msk.bf16.vlgmr.msrb.gmra.mxu0 %vm44_vm0, %v490_v11 }
  0x81   :  { %247 = vmatpush.bf16.msrb.mxu2 %v235_v7  ;;  %299 = vmatpush.bf16.msra.mxu0 %v486_v0  ;;  %v392_v0 = vld [vmem:[%s619_s3 + $0x8] sm:$0xff] }
  0x82   :  { %477 = vmatmul.msk.bf16.vlgmr.msrb.gmra.mxu3 %vm44_vm0, %v494_v12  ;;  %465 = vmatmul.msk.bf16.vlgmr.msrb.gmra.mxu1 %vm44_vm0, %v493_v13 }
  0x85   :  { %248 = vmatpush.bf16.msrb.mxu2 %v233_v14  ;;  %300 = vmatpush.bf16.msra.mxu0 %v485_v1  ;;  %v377_v1 = vld [vmem:[%s618_s2] sm:$0xff] }
  0x88   :  { %v57_v15 = vpop.f32.mrf.mxu0 }
  0x89   :  { %63 = vst.msk [vmem:[#allocation2] sm:$0xff] %vm62_vm1, %v57_v15  ;;  %v88_v20 = vpop.f32.mrf.mxu1 }
  0x8f   :  { %v155_v19 = vpop.f32.mrf.mxu3 }
  0x90   :  { %470 = vmatmul.msk.bf16.vlgmr.msrb.gmra.mxu2 %vm44_vm0, %v492_v16  ;;  %484 = vmatmul.msk.bf16.vlgmr.msra.gmra.mxu0 %vm44_vm0, %v495_v17  ;;  %v59_v18 = vpop.f32.mrf.mxu0 }
  0x91   :  { %64 = vst.msk [vmem:[#allocation2 + $0x8] sm:$0xff] %vm62_vm1, %v59_v18  ;;  %v90_v25 = vpop.f32.mrf.mxu1 }
  0x97   :  { %v157_v26 = vpop.f32.mrf.mxu3 }
  0xfd   :  { %v183_v21 = vpop.f32.mrf.mxu0 }
  0xfe   :  { %v184_v22 = vadd.f32 %v183_v21, %v155_v19 }
  0xff   :  { %v222_v31 = vpop.f32.mrf.mxu1 }
 0x100   :  { %190 = vrot.lane.b32.xlu2 %v184_v22, %s514_s17 }
 0x103   :  { %v116_v23 = vpop.f32.mrf.mxu2 }
 0x104   :  { %v117_v24 = vadd.f32 %v116_v23, %v88_v20 }
 0x105   :  { %v185_v27 = vpop.f32.mrf.mxu0  ;;  %v275_v32 = vpop.f32.mrf.mxu3 }
 0x106   :  { %123 = vrot.lane.b32.xlu0 %v117_v24, %s515_s18  ;;  %v186_v29 = vadd.f32 %v185_v27, %v157_v26 }
 0x107   :  { %v224_v38 = vpop.f32.mrf.mxu1 }
 0x10b   :  { %v118_v28 = vpop.f32.mrf.mxu2 }
 0x10c   :  { %v119_v30 = vadd.f32 %v118_v28, %v90_v25 }
 0x10d   :  { %v302_v35 = vpop.f32.mrf.mxu0  ;;  %v277_v41 = vpop.f32.mrf.mxu3 }
 0x10e   :  { %125 = vrot.lane.b32.xlu1 %v119_v30, %s515_s18  ;;  %192 = vrot.lane.b32.xlu0 %v186_v29, %s514_s17 }
 0x113   :  { %v250_v33 = vpop.f32.mrf.mxu2 }
 0x114   :  { %v251_v34 = vadd.f32 %v250_v33, %v222_v31 }
 0x115   :  { %v304_v43 = vpop.f32.mrf.mxu0 }
 0x116   :  { %v280_v36 = vadd.f32 %v275_v32, %v251_v34 }
 0x118   :  { %v307_v37 = vadd.f32 %v302_v35, %v280_v36 }
 0x11a   :  { %311 = vrot.lane.b32.xlu1 %v307_v37, %s516_s1 }
 0x11b   :  { %v252_v39 = vpop.f32.mrf.mxu2 }
 0x11c   :  { %v253_v40 = vadd.f32 %v252_v39, %v224_v38 }
 0x11e   :  { %v281_v42 = vadd.f32 %v277_v41, %v253_v40 }
 0x120   :  { %v308_v44 = vadd.f32 %v304_v43, %v281_v42 }
 0x122   :  { %313 = vrot.lane.b32.xlu2 %v308_v44, %s516_s1  ;;  %386 = vperm.xlu1 %504, %v378_v45  }
 0x15a   :  { %v191_v48 = vpop.permute.xlu2 %190 }
 0x178   :  { %v124_v47 = vpop.permute.xlu0 %123 }
 0x179   :  { %130 = vst.msk [vmem:[#allocation2] sm:$0xff] %vm129_vm2, %v124_v47 }
 0x17a   :  { %197 = vst.msk [vmem:[#allocation2] sm:$0xff] %vm196_vm3, %v191_v48 }
 0x17c   :  { %v314_v51 = vpop.permute.xlu2 %313 }
 0x180   :  { %v126_v49 = vpop.permute.xlu1 %125  ;;  %v193_v50 = vpop.permute.xlu0 %192 }
 0x181   :  { %131 = vst.msk [vmem:[#allocation2 + $0x8] sm:$0xff] %vm129_vm2, %v126_v49 }
 0x182   :  { %198 = vst.msk [vmem:[#allocation2 + $0x8] sm:$0xff] %vm196_vm3, %v193_v50 }
 0x183   :  { %319 = vst.msk [vmem:[#allocation2 + $0x8] sm:$0xff] %vm317_vm4, %v314_v51 }
 0x18a   :  { %v596_v53 = vld [vmem:[#allocation2 + $0x8] sm:$0xff] }
 0x18b   :  { %v327_v54 = vmul.f32 %v506_v52, %v596_v53 }
 0x18c   :  { %v312_v55 = vpop.permute.xlu1 %311 }
 0x18d   :  { %318 = vst.msk [vmem:[#allocation2] sm:$0xff] %vm317_vm4, %v312_v55  ;;  %v332_v56 = vsel %vm328_vm5, %v327_v54, 0.0  ;;  %v338_v62 = vmul.f32 %v327_v54, %v327_v54 }
 0x18e   :  { %333 = vadd.xlane.f32.xlu1 %v332_v56 }
 0x18f   :  { %v342_v63 = vsel %vm328_vm5, %v338_v62, 0.0 }
 0x194   :  { %v320_v57 = vld [vmem:[#allocation2] sm:$0xff]  ;;  %v387_v3 = vpop.permute.xlu1 %386 }
 0x195   :  { %v326_v58 = vmul.f32 %v506_v52, %v320_v57 }
 0x197   :  { %v329_v59 = vsel %vm328_vm5, %v326_v58, 0.0  ;;  %v337_v60 = vmul.f32 %v326_v58, %v326_v58 }
 0x198   :  { %330 = vadd.xlane.f32.xlu0 %v329_v59 }
 0x199   :  { %v339_v61 = vsel %vm328_vm5, %v337_v60, 0.0 }
 0x19a   :  { %340 = vadd.xlane.f32.xlu2 %v339_v61 }
 0x1a2   :  { %343 = vadd.xlane.f32.xlu2 %v342_v63 }
 0x1a7   :  { %400 = vperm.xlu1 %504, %v392_v0  }
 0x1ac   :  { %381 = vperm.xlu0 %503, %v377_v1  }
 0x1ba   :  { %395 = vperm.xlu2 %505, %v391_v2  }
 0x201   :  { %v334_v9 = vpop.xlane.xlu1 %333 }
 0x202   :  { %v336_v11 = vmul.f32 0.03125, %v334_v9 }
 0x204   :  { %v348_v14 = vmul.f32 %v336_v11, %v336_v11  ;;  %v352_v37 = vsub.f32 %v596_v53, %v336_v11 }
 0x20b   :  { %v331_v4 = vpop.xlane.xlu0 %330 }
 0x20c   :  { %v335_v5 = vmul.f32 0.03125, %v331_v4 }
 0x20d   :  { %v341_v6 = vpop.xlane.xlu2 %340 }
 0x20e   :  { %v347_v7 = vmul.f32 %v335_v5, %v335_v5  ;;  %v345_v8 = vmul.f32 0.03125, %v341_v6  ;;  %v351_v26 = vsub.f32 %v320_v57, %v335_v5 }
 0x210   :  { %v349_v10 = vsub.f32 %v345_v8, %v347_v7 }
 0x212   :  { %v353_v12 = vadd.f32 1e-05, %v349_v10 }
 0x214   :  { %507 = vrsqrt.f32 %v353_v12  ;;  %vm361_vm7 = vweird.f32 %v353_v12 }
 0x215   :  { %v344_v13 = vpop.xlane.xlu2 %343 }
 0x216   :  { %v346_v15 = vmul.f32 0.03125, %v344_v13 }
 0x218   :  { %v350_v16 = vsub.f32 %v346_v15, %v348_v14 }
 0x219   :  { %v401_v43 = vpop.permute.xlu1 %400 }
 0x21a   :  { %v508_v17 = vpop.eup %507  ;;  %v354_v18 = vadd.f32 1e-05, %v350_v16 }
 0x21b   :  { %v356_v19 = vmul.f32 %v508_v17, %v353_v12  ;;  %vm362_vm6 = vweird.f32 %v508_v17 }
 0x21c   :  { %509 = vrsqrt.f32 %v354_v18  ;;  %vm363_vm8 = vmor %vm361_vm7, %vm362_vm6  ;;  %vm371_vm10 = vweird.f32 %v354_v18 }
 0x21d   :  { %v357_v20 = vmul.f32 %v508_v17, %v356_v19  ;;  %v396_v32 = vpop.permute.xlu2 %395 }
 0x21e   :  { %v382_v28 = vpop.permute.xlu0 %381 }
 0x21f   :  { %v358_v21 = vmul.f32 0.5, %v357_v20 }
 0x221   :  { %v359_v22 = vsub.f32 1.5, %v358_v21 }
 0x222   :  { %v510_v23 = vpop.eup %509 }
 0x223   :  { %v366_v24 = vmul.f32 %v510_v23, %v354_v18  ;;  %v360_v25 = vmul.f32 %v508_v17, %v359_v22  ;;  %vm372_vm9 = vweird.f32 %v510_v23 }
 0x224   :  { %vm373_vm11 = vmor %vm371_vm10, %vm372_vm9 }
 0x225   :  { %v367_v27 = vmul.f32 %v510_v23, %v366_v24  ;;  %v364_v29 = vsel %vm363_vm8, %v508_v17, %v360_v25 }
 0x226   :  { %v375_v30 = vmul.f32 %v364_v29, %v351_v26 }
 0x227   :  { %v368_v31 = vmul.f32 0.5, %v367_v27 }
 0x228   :  { %v389_v33 = vmul.f32 %v382_v28, %v375_v30 }
 0x229   :  { %v369_v34 = vsub.f32 1.5, %v368_v31 }
 0x22a   :  { %v403_v35 = vadd.f32 %v396_v32, %v389_v33 }
 0x22b   :  { %v370_v36 = vmul.f32 %v510_v23, %v369_v34 }
 0x22c   :  { %v405_v38 = vmax.f32 %v403_v35, 0.0 }
 0x22d   :  { %v374_v39 = vsel %vm373_vm11, %v510_v23, %v370_v36 }
 0x22e   :  { %v376_v40 = vmul.f32 %v374_v39, %v352_v37  ;;  %v407_v41 = vpack.c.bf16 %v405_v38, %v405_v38 }
 0x230   :  { %v390_v42 = vmul.f32 %v387_v3, %v376_v40  ;;  %410 = vst.msk [vmem:[%s620_s5] sm:$0xf] %vm409_vm12, %v407_v41 }
 0x232   :  { %v404_v44 = vadd.f32 %v401_v43, %v390_v42 }
 0x234   :  { %v406_v45 = vmax.f32 %v404_v44, 0.0 }
 0x236   :  { %v408_v46 = vpack.c.bf16 %v406_v45, %v406_v45 }
 0x238   :  { %411 = vst.msk [vmem:[%s620_s5 + $0x4] sm:$0xf] %vm409_vm12, %v408_v46 }

// kernel: vae_forward.11
= control target key start
LH: loop header
LB: loop body
LE: loop exit
PB: predicated region body
PF: predicated region fallthrough
CT: control target
= control target key end

     0   :  { %v532_v1 = vmov 0   ;;  %vm389_vm0 = vcmask 15360   ;;  %vm315_vm1 = vcmask 130048   ;;  %s794_s0 = inlined_call_operand.vmem [shape: bf16[128,2], index: 0, kind: input, shape index: {}]   ;;  %s795_s2 = inlined_call_operand.vmem [shape: f32[32,1], index: 2, kind: input, shape index: {}]   ;;  %s796_s5 = inlined_call_operand.vmem [shape: f32[128,1], index: 5, kind: input, shape index: {}]   ;;  %s797_s1 = inlined_call_operand.vmem [shape: bf16[32,128], index: 1, kind: input, shape index: {}]   ;;  %s798_s6 = inlined_call_operand.vmem [shape: f32[32,2], index: 6, kind: output, shape index: {0}]   ;;  %s799_s3 = inlined_call_operand.vmem [shape: f32[16,2], index: 3, kind: input, shape index: {}]   ;;  %s800_s7 = inlined_call_operand.vmem [shape: f32[16,2], index: 7, kind: output, shape index: {1}]   ;;  %s801_s4 = inlined_call_operand.vmem [shape: bf16[128,16], index: 4, kind: input, shape index: {}]   ;;  %s802_s8 = inlined_call_operand.vmem [shape: f32[128,2], index: 8, kind: output, shape index: {2}]  }
   0x1   :  { %v513_v0 = vld [vmem:[%s794_s0 + $0x38] sm:$0xff]  ;;  %525 = vset.pattern.permute.xlu0 %v532_v1  ;;  %526 = vset.pattern.permute.xlu1 %v532_v1  ;;  %v49_v2 = vld [vmem:[%s795_s2 + $0x10] sm:$0xff]  ;;  %v47_v4 = vld [vmem:[%s795_s2] sm:$0xff] }
   0x2   :  { %527 = vset.pattern.permute.xlu2 %v532_v1  ;;  %131 = vmatpush.bf16.msra.mxu0 %v513_v0  ;;  %v512_v3 = vld [vmem:[%s794_s0 + $0x30] sm:$0xff]  ;;  %v511_v5 = vld [vmem:[%s794_s0 + $0x28] sm:$0xff]  ;;  %v50_v6 = vld [vmem:[%s795_s2 + $0x18] sm:$0xff] }
   0x3   :  { %63 = vperm.xlu0 %525, %v49_v2   ;;  %53 = vperm.xlu1 %526, %v47_v4   ;;  %v48_v7 = vld [vmem:[%s795_s2 + $0x8] sm:$0xff]  ;;  %v510_v8 = vld [vmem:[%s794_s0 + $0x20] sm:$0xff]  ;;  %v509_v9 = vld [vmem:[%s794_s0 + $0x18] sm:$0xff] }
   0x4   :  { %v181_v10 = vld [vmem:[%s796_s5 + $0x10] sm:$0xff]  ;;  %v182_v11 = vld [vmem:[%s796_s5 + $0x18] sm:$0xff]  ;;  %v507_v13 = vld [vmem:[%s794_s0 + $0x8] sm:$0xff] }
   0x5   :  { %v508_v12 = vld [vmem:[%s794_s0 + $0x10] sm:$0xff]  ;;  %v184_v14 = vld [vmem:[%s796_s5 + $0x28] sm:$0xff]  ;;  %v506_v16 = vld [vmem:[%s794_s0] sm:$0xff] }
   0x6   :  { %132 = vmatpush.bf16.msra.mxu0 %v512_v3  ;;  %v185_v15 = vld [vmem:[%s796_s5 + $0x30] sm:$0xff]  ;;  %v504_v17 = vld [vmem:[%s797_s1] sm:$0xff]  ;;  %v188_v19 = vld [vmem:[%s796_s5 + $0x48] sm:$0xff] }
   0x7   :  { %v187_v18 = vld [vmem:[%s796_s5 + $0x40] sm:$0xff]  ;;  %v190_v20 = vld [vmem:[%s796_s5 + $0x58] sm:$0xff]  ;;  %v505_v22 = vld [vmem:[%s797_s1 + $0x8] sm:$0xff] }
   0x8   :  { %v191_v21 = vld [vmem:[%s796_s5 + $0x60] sm:$0xff]  ;;  %v193_v23 = vld [vmem:[%s796_s5 + $0x70] sm:$0xff]  ;;  %v194_v24 = vld [vmem:[%s796_s5 + $0x78] sm:$0xff] }
   0x9   :  { %v179_v33 = vld [vmem:[%s796_s5] sm:$0xff]  ;;  %v180_v37 = vld [vmem:[%s796_s5 + $0x8] sm:$0xff]  ;;  %v186_v51 = vld [vmem:[%s796_s5 + $0x38] sm:$0xff] }
   0xa   :  { %133 = vmatpush.bf16.msra.mxu0 %v511_v5  ;;  %197 = vperm.xlu2 %527, %v179_v33   ;;  %v150_v42 = vld [vmem:[%s799_s3] sm:$0xff]  ;;  %v151_v48 = vld [vmem:[%s799_s3 + $0x8] sm:$0xff]  ;;  %v517_v55 = vld [vmem:[%s801_s4 + $0x18] sm:$0xff] }
   0xb   :  { %68 = vperm.xlu0 %525, %v50_v6   ;;  %58 = vperm.xlu1 %526, %v48_v7   ;;  %v183_v47 = vld [vmem:[%s796_s5 + $0x20] sm:$0xff]  ;;  %v520_v56 = vld [vmem:[%s801_s4 + $0x30] sm:$0xff]  ;;  %v192_v58 = vld [vmem:[%s796_s5 + $0x68] sm:$0xff] }
   0xc   :  { %v514_v54 = vld [vmem:[%s801_s4] sm:$0xff]  ;;  %v189_v57 = vld [vmem:[%s796_s5 + $0x50] sm:$0xff]  ;;  %v515_v59 = vld [vmem:[%s801_s4 + $0x8] sm:$0xff] }
   0xd   :  { %v518_v60 = vld [vmem:[%s801_s4 + $0x20] sm:$0xff]  ;;  %v521_v61 = vld [vmem:[%s801_s4 + $0x38] sm:$0xff]  ;;  %v516_v62 = vld [vmem:[%s801_s4 + $0x10] sm:$0xff] }
   0xe   :  { %134 = vmatpush.bf16.msra.mxu0 %v510_v8  ;;  %v519_v63 = vld [vmem:[%s801_s4 + $0x28] sm:$0xff] }
  0x12   :  { %135 = vmatpush.bf16.msra.mxu0 %v509_v9  ;;  %202 = vperm.xlu2 %527, %v180_v37  }
  0x13   :  { %207 = vperm.xlu0 %525, %v181_v10   ;;  %212 = vperm.xlu1 %526, %v182_v11  }
  0x16   :  { %136 = vmatpush.bf16.msra.mxu0 %v508_v12 }
  0x1a   :  { %137 = vmatpush.bf16.msra.mxu0 %v507_v13  ;;  %217 = vperm.xlu2 %527, %v183_v47  }
  0x1b   :  { %222 = vperm.xlu0 %525, %v184_v14   ;;  %227 = vperm.xlu1 %526, %v185_v15  }
  0x1e   :  { %138 = vmatpush.bf16.msra.mxu0 %v506_v16 }
  0x21   :  { %139 = vmatmul.bf16.vlgmr.msra.gmra.mxu0 %v504_v17 }
  0x22   :  { %232 = vperm.xlu2 %527, %v186_v51  }
  0x23   :  { %237 = vperm.xlu0 %525, %v187_v18   ;;  %242 = vperm.xlu1 %526, %v188_v19  }
  0x2a   :  { %247 = vperm.xlu2 %527, %v189_v57  }
  0x2b   :  { %252 = vperm.xlu0 %525, %v190_v20   ;;  %257 = vperm.xlu1 %526, %v191_v21  }
  0x31   :  { %144 = vmatmul.bf16.gmra.mxu0 %v505_v22 }
  0x32   :  { %262 = vperm.xlu2 %527, %v192_v58  }
  0x33   :  { %267 = vperm.xlu0 %525, %v193_v23   ;;  %272 = vperm.xlu1 %526, %v194_v24  }
  0x64   :  { %v198_v0 = vpop.permute.xlu2 %197 }
  0x6c   :  { %v203_v1 = vpop.permute.xlu2 %202 }
  0x74   :  { %v218_v4 = vpop.permute.xlu2 %217 }
  0x75   :  { %v54_v25 = vpop.permute.xlu1 %53  ;;  %v64_v31 = vpop.permute.xlu0 %63 }
  0x7c   :  { %v233_v7 = vpop.permute.xlu2 %232 }
  0x7d   :  { %v59_v28 = vpop.permute.xlu1 %58  ;;  %v69_v38 = vpop.permute.xlu0 %68 }
  0x84   :  { %v248_v12 = vpop.permute.xlu2 %247 }
  0x85   :  { %v213_v2 = vpop.permute.xlu1 %212  ;;  %v208_v3 = vpop.permute.xlu0 %207 }
  0x8c   :  { %v263_v22 = vpop.permute.xlu2 %262 }
  0x8d   :  { %v228_v5 = vpop.permute.xlu1 %227  ;;  %v223_v6 = vpop.permute.xlu0 %222 }
  0x95   :  { %v243_v8 = vpop.permute.xlu1 %242  ;;  %v238_v11 = vpop.permute.xlu0 %237 }
  0x9d   :  { %v258_v14 = vpop.permute.xlu1 %257  ;;  %v253_v20 = vpop.permute.xlu0 %252 }
  0x9e   :  { %v140_v26 = vpop.f32.mrf.mxu0 }
  0x9f   :  { %v141_v27 = vadd.f32 %v140_v26, %v54_v25 }
  0xa1   :  { %390 = vst.msk [vmem:[%s798_s6] sm:$0xff] %vm389_vm0, %v141_v27 }
  0xa6   :  { %v142_v29 = vpop.f32.mrf.mxu0 }
  0xa7   :  { %v143_v30 = vadd.f32 %v142_v29, %v59_v28  ;;  %v268_v29 = vpop.permute.xlu0 %267 }
  0xa9   :  { %391 = vst.msk [vmem:[%s798_s6 + $0x8] sm:$0xff] %vm389_vm0, %v143_v30 }
  0xae   :  { %v145_v32 = vpop.f32.mrf.mxu0 }
  0xaf   :  { %v146_v34 = vadd.f32 %v145_v32, %v64_v31 }
  0xb1   :  { %v152_v35 = vmul.f32 0.5, %v146_v34  ;;  %392 = vst.msk [vmem:[%s798_s6 + $0x10] sm:$0xff] %vm389_vm0, %v146_v34 }
  0xb3   :  { %v154_v36 = vmul.f32 1.442695, %v152_v35 }
  0xb5   :  { %528 = vpow2.f32 %v154_v36  ;;  %v273_v36 = vpop.permute.xlu1 %272 }
  0xb6   :  { %v147_v39 = vpop.f32.mrf.mxu0 }
  0xb7   :  { %v148_v40 = vadd.f32 %v147_v39, %v69_v38 }
  0xb9   :  { %v153_v41 = vmul.f32 0.5, %v148_v40  ;;  %393 = vst.msk [vmem:[%s798_s6 + $0x18] sm:$0xff] %vm389_vm0, %v148_v40 }
  0xbb   :  { %v529_v43 = vpop.eup %528  ;;  %v156_v44 = vmul.f32 1.442695, %v153_v41 }
  0xbc   :  { %v158_v45 = vmul.f32 %v529_v43, %v150_v42 }
  0xbd   :  { %530 = vpow2.f32 %v156_v44 }
  0xbe   :  { %v160_v46 = vadd.f32 %v158_v45, %v141_v27 }
  0xc0   :  { %394 = vst.msk [vmem:[%s800_s7] sm:$0xff] %vm389_vm0, %v160_v46 }
  0xc3   :  { %v531_v49 = vpop.eup %530 }
  0xc4   :  { %v159_v50 = vmul.f32 %v531_v49, %v151_v48 }
  0xc6   :  { %v161_v52 = vadd.f32 %v159_v50, %v143_v30 }
  0xc8   :  { %v178_v53 = vpack.c.bf16 %v161_v52, %v160_v46  ;;  %395 = vst.msk [vmem:[%s800_s7 + $0x8] sm:$0xff] %vm389_vm0, %v161_v52 }
  0xca   :  { %347 = vmatpush.bf16.msra.mxu1 %v178_v53  ;;  %522 = vmatpush.bf16.msra.mxu2 %v178_v53 }
  0xcb   :  { %523 = vmatpush.bf16.msra.mxu3 %v178_v53 }
  0xcd   :  { %496 = vmatmul.msk.bf16.vlgmr.msra.gmra.mxu1 %vm315_vm1, %v514_v54  ;;  %499 = vmatmul.msk.bf16.vlgmr.msra.gmra.mxu2 %vm315_vm1, %v517_v55 }
  0xce   :  { %502 = vmatmul.msk.bf16.vlgmr.msra.gmra.mxu3 %vm315_vm1, %v520_v56 }
  0xdd   :  { %497 = vmatmul.msk.bf16.gmra.mxu1 %vm315_vm1, %v515_v59  ;;  %500 = vmatmul.msk.bf16.gmra.mxu2 %vm315_vm1, %v518_v60 }
  0xde   :  { %503 = vmatmul.msk.bf16.gmra.mxu3 %vm315_vm1, %v521_v61 }
  0xed   :  { %498 = vmatmul.msk.bf16.gmra.mxu1 %vm315_vm1, %v516_v62  ;;  %501 = vmatmul.msk.bf16.gmra.mxu2 %vm315_vm1, %v519_v63 }
 0x14a   :  { %v349_v9 = vpop.f32.mrf.mxu1 }
 0x14b   :  { %v350_v10 = vadd.f32 %v349_v9, %v198_v0 }
 0x14d   :  { %396 = vst.msk [vmem:[%s802_s8] sm:$0xff] %vm389_vm0, %v350_v10 }
 0x150   :  { %v364_v13 = vpop.f32.mrf.mxu2 }
 0x151   :  { %v365_v15 = vadd.f32 %v364_v13, %v228_v5  ;;  %v379_v16 = vpop.f32.mrf.mxu3 }
 0x152   :  { %v380_v17 = vadd.f32 %v379_v16, %v258_v14  ;;  %v351_v18 = vpop.f32.mrf.mxu1 }
 0x153   :  { %402 = vst.msk [vmem:[%s802_s8 + $0x30] sm:$0xff] %vm389_vm0, %v365_v15  ;;  %v352_v19 = vadd.f32 %v351_v18, %v203_v1 }
 0x154   :  { %408 = vst.msk [vmem:[%s802_s8 + $0x60] sm:$0xff] %vm389_vm0, %v380_v17 }
 0x155   :  { %397 = vst.msk [vmem:[%s802_s8 + $0x8] sm:$0xff] %vm389_vm0, %v352_v19 }
 0x158   :  { %v366_v21 = vpop.f32.mrf.mxu2 }
 0x159   :  { %v367_v23 = vadd.f32 %v366_v21, %v233_v7  ;;  %v381_v24 = vpop.f32.mrf.mxu3 }
 0x15a   :  { %v382_v25 = vadd.f32 %v381_v24, %v263_v22  ;;  %v354_v26 = vpop.f32.mrf.mxu1 }
 0x15b   :  { %403 = vst.msk [vmem:[%s802_s8 + $0x38] sm:$0xff] %vm389_vm0, %v367_v23  ;;  %v355_v27 = vadd.f32 %v354_v26, %v208_v3 }
 0x15c   :  { %409 = vst.msk [vmem:[%s802_s8 + $0x68] sm:$0xff] %vm389_vm0, %v382_v25 }
 0x15d   :  { %398 = vst.msk [vmem:[%s802_s8 + $0x10] sm:$0xff] %vm389_vm0, %v355_v27 }
 0x160   :  { %v369_v28 = vpop.f32.mrf.mxu2 }
 0x161   :  { %v370_v30 = vadd.f32 %v369_v28, %v238_v11  ;;  %v384_v31 = vpop.f32.mrf.mxu3 }
 0x162   :  { %v385_v32 = vadd.f32 %v384_v31, %v268_v29  ;;  %v356_v33 = vpop.f32.mrf.mxu1 }
 0x163   :  { %404 = vst.msk [vmem:[%s802_s8 + $0x40] sm:$0xff] %vm389_vm0, %v370_v30  ;;  %v357_v34 = vadd.f32 %v356_v33, %v213_v2 }
 0x164   :  { %410 = vst.msk [vmem:[%s802_s8 + $0x70] sm:$0xff] %vm389_vm0, %v385_v32 }
 0x165   :  { %399 = vst.msk [vmem:[%s802_s8 + $0x18] sm:$0xff] %vm389_vm0, %v357_v34 }
 0x168   :  { %v371_v35 = vpop.f32.mrf.mxu2 }
 0x169   :  { %v372_v37 = vadd.f32 %v371_v35, %v243_v8  ;;  %v386_v38 = vpop.f32.mrf.mxu3 }
 0x16a   :  { %v387_v39 = vadd.f32 %v386_v38, %v273_v36  ;;  %v359_v40 = vpop.f32.mrf.mxu1 }
 0x16b   :  { %405 = vst.msk [vmem:[%s802_s8 + $0x48] sm:$0xff] %vm389_vm0, %v372_v37  ;;  %v360_v41 = vadd.f32 %v359_v40, %v218_v4 }
 0x16c   :  { %411 = vst.msk [vmem:[%s802_s8 + $0x78] sm:$0xff] %vm389_vm0, %v387_v39 }
 0x16d   :  { %400 = vst.msk [vmem:[%s802_s8 + $0x20] sm:$0xff] %vm389_vm0, %v360_v41 }
 0x170   :  { %v374_v42 = vpop.f32.mrf.mxu2 }
 0x171   :  { %v375_v43 = vadd.f32 %v374_v42, %v248_v12 }
 0x172   :  { %v361_v44 = vpop.f32.mrf.mxu1 }
 0x173   :  { %406 = vst.msk [vmem:[%s802_s8 + $0x50] sm:$0xff] %vm389_vm0, %v375_v43  ;;  %v362_v45 = vadd.f32 %v361_v44, %v223_v6 }
 0x175   :  { %401 = vst.msk [vmem:[%s802_s8 + $0x28] sm:$0xff] %vm389_vm0, %v362_v45 }
 0x178   :  { %v376_v46 = vpop.f32.mrf.mxu2 }
 0x179   :  { %v377_v47 = vadd.f32 %v376_v46, %v253_v20 }
 0x17b   :  { %407 = vst.msk [vmem:[%s802_s8 + $0x58] sm:$0xff] %vm389_vm0, %v377_v47 }

// kernel: vae_forward.13
= control target key start
LH: loop header
LB: loop body
LE: loop exit
PB: predicated region body
PF: predicated region fallthrough
CT: control target
= control target key end

     0   :  { %s324_s20 = smov 127   ;;  %s325_s21 = smov 122   ;;  %vm30_vm0 = vcmask 130048   ;;  %vm47_vm1 = vcmask 359424   ;;  %vm92_vm2 = vcmask 720224   ;;  %v330_v38 = vmov 0   ;;  %s412_s0 = inlined_call_operand.vmem [shape: bf16[1,16,50], index: 0, kind: input, shape index: {}]   ;;  %s413_s1 = inlined_call_operand.vmem [shape: bf16[9,8,16], index: 1, kind: input, shape index: {}]   ;;  %s414_s2 = inlined_call_operand.vmem [shape: f32[8,1], index: 2, kind: input, shape index: {}]   ;;  %s415_s3 = inlined_call_operand.vmem [shape: f32[8,1], index: 3, kind: input, shape index: {}]   ;;  %s416_s4 = inlined_call_operand.vmem [shape: f32[1,176], index: 4, kind: input, shape index: {}]   ;;  %s417_s5 = inlined_call_operand.vmem [shape: bf16[8,176], index: 5, kind: output, shape index: {}]  }
   0x1   :  { %v312_v0 = vld [vmem:[%s412_s0] sm:$0xff]  ;;  %s326_s24 = smov 123   ;;  %v301_v2 = vld [vmem:[%s413_s1 + $0x10] sm:$0xf]  ;;  %v297_v3 = vld [vmem:[%s413_s1 + $0x8] sm:$0xf]  ;;  %320 = vset.pattern.permute.xlu2 %v330_v38  ;;  %321 = vset.pattern.permute.xlu0 %v330_v38 }
   0x2   :  { %69 = vrot.lane.b32.xlu0 %v312_v0, %s324_s20  ;;  %161 = vrot.lane.b32.xlu1 %v312_v0, %s325_s21  ;;  %v23_v1 = vld [vmem:[%s413_s1] sm:$0xf]  ;;  %v296_v6 = vld [vmem:[%s413_s1 + $0x4] sm:$0xf]  ;;  %s327_s15 = smov 44   ;;  %s328_s16 = smov 88  }
   0x3   :  { %41 = vmatpush.bf16.msra.mxu0 %v312_v0  ;;  %108 = vmatpush.bf16.msra.mxu3 %v312_v0  ;;  %v308_v7 = vld [vmem:[%s413_s1 + $0x1c] sm:$0xf]  ;;  %v300_v9 = vld [vmem:[%s413_s1 + $0xc] sm:$0xf]  ;;  %v305_v10 = vld [vmem:[%s413_s1 + $0x18] sm:$0xf] }
   0x4   :  { %63 = vmatpush.bf16.msra.mxu1 %v312_v0  ;;  %v304_v12 = vld [vmem:[%s413_s1 + $0x14] sm:$0xf]  ;;  %v310_v14 = vld [vmem:[%s413_s1 + $0x20] sm:$0xf]  ;;  %s329_s1 = smov 4   ;;  %vm137_vm3 = vcmask 1048256  }
   0x5   :  { %v264_v37 = vld [vmem:[%s414_s2] sm:$0xff]  ;;  %vm139_vm4 = vcmask 31744   ;;  %vm222_vm5 = vcmask 392224   ;;  %vm234_vm6 = vcmask 392192   ;;  %vm283_vm10 = vcmask 1043456  }
   0x6   :  { %295 = vmatmul.msk.bf16.vlgmr.msra.gmra.mxu0 %vm30_vm0, %v23_v1  ;;  %302 = vmatmul.msk.bf16.vlgmr.msra.gmra.mxu3 %vm30_vm0, %v301_v2  ;;  %v272_v39 = vld [vmem:[%s415_s3] sm:$0xff]  ;;  %vm284_vm11 = vcmask 392196  }
   0x7   :  { %298 = vmatmul.msk.bf16.vlgmr.msra.gmra.mxu1 %vm30_vm0, %v297_v3  ;;  %v226_v42 = vld [vmem:[%s416_s4] sm:$0x3]  ;;  %vm285_vm12 = vmor %vm284_vm11, %vm283_vm10 }
   0x8   :  { %v228_v43 = vperm.slane %v226_v42, 0  ;;  %v229_v44 = vperm.slane %v226_v42, 1 }
   0xa   :  { %114 = vrot.lane.b32.xlu0 %v312_v0, %s326_s24 }
  0x74   :  { %v70_v4 = vpop.permute.xlu0 %69  ;;  %v162_v5 = vpop.permute.xlu1 %161 }
  0x75   :  { %82 = vmatpush.bf16.msra.mxu2 %v70_v4  ;;  %192 = vmatpush.bf16.msrb.mxu3 %v70_v4 }
  0x78   :  { %299 = vmatmul.msk.bf16.vlgmr.msra.gmra.mxu2 %vm30_vm0, %v296_v6  ;;  %309 = vmatmul.msk.bf16.vlgmr.msrb.gmra.mxu3 %vm30_vm0, %v308_v7 }
  0x79   :  { %174 = vmatpush.bf16.msrb.mxu2 %v162_v5 }
  0x7c   :  { %v115_v8 = vpop.permute.xlu0 %114 }
  0x7d   :  { %127 = vmatpush.bf16.msrb.mxu0 %v115_v8  ;;  %155 = vmatpush.bf16.msrb.mxu1 %v115_v8 }
  0x80   :  { %303 = vmatmul.msk.bf16.vlgmr.msrb.gmra.mxu0 %vm30_vm0, %v300_v9  ;;  %306 = vmatmul.msk.bf16.vlgmr.msrb.gmra.mxu1 %vm30_vm0, %v305_v10 }
  0x81   :  { %211 = vmatpush.bf16.msra.mxu0 %v312_v0 }
  0x83   :  { %v43_v11 = vpop.f32.mrf.mxu0 }
  0x84   :  { %48 = vst.msk [vmem:[#allocation2] sm:$0xff] %vm47_vm1, %v43_v11  ;;  %v65_v16 = vpop.f32.mrf.mxu1 }
  0x88   :  { %307 = vmatmul.msk.bf16.vlgmr.msrb.gmra.mxu2 %vm30_vm0, %v304_v12 }
  0x89   :  { %v110_v15 = vpop.f32.mrf.mxu3 }
  0x8b   :  { %v45_v13 = vpop.f32.mrf.mxu0 }
  0x8c   :  { %v67_v18 = vpop.f32.mrf.mxu1 }
  0x90   :  { %311 = vmatmul.msk.bf16.vlgmr.msra.gmra.mxu0 %vm30_vm0, %v310_v14 }
  0x91   :  { %v112_v17 = vpop.f32.mrf.mxu3 }
  0xfb   :  { %v84_v19 = vpop.f32.mrf.mxu2  ;;  %v194_v20 = vpop.f32.mrf.mxu3 }
  0xfc   :  { %v85_v21 = vadd.f32 %v84_v19, %v65_v16 }
  0xfd   :  { %v129_v22 = vpop.f32.mrf.mxu0  ;;  %v157_v23 = vpop.f32.mrf.mxu1 }
  0xfe   :  { %v130_v24 = vadd.f32 %v129_v22, %v110_v15  ;;  %89 = vrot.lane.b32.xlu2 %v85_v21, %s327_s15 }
 0x100   :  { %134 = vrot.lane.b32.xlu1 %v130_v24, %s328_s16 }
 0x103   :  { %v86_v25 = vpop.f32.mrf.mxu2  ;;  %v196_v26 = vpop.f32.mrf.mxu3 }
 0x105   :  { %v131_v27 = vpop.f32.mrf.mxu0  ;;  %v159_v28 = vpop.f32.mrf.mxu1 }
 0x10b   :  { %v176_v29 = vpop.f32.mrf.mxu2 }
 0x10c   :  { %v177_v30 = vadd.f32 %v176_v29, %v157_v23 }
 0x10d   :  { %v213_v31 = vpop.f32.mrf.mxu0 }
 0x10e   :  { %v198_v32 = vadd.f32 %v194_v20, %v177_v30 }
 0x110   :  { %v217_v33 = vadd.f32 %v213_v31, %v198_v32 }
 0x112   :  { %219 = vrot.lane.b32.xlu2 %v217_v33, %s329_s1 }
 0x113   :  { %v178_v34 = vpop.f32.mrf.mxu2 }
 0x115   :  { %v215_v35 = vpop.f32.mrf.mxu0 }
 0x11a   :  { %267 = vperm.xlu2 %320, %v264_v37  }
 0x122   :  { %275 = vperm.xlu2 %320, %v272_v39  }
 0x158   :  { %v90_v36 = vpop.permute.xlu2 %89 }
 0x159   :  { %93 = vst.msk [vmem:[#allocation2] sm:$0xff] %vm92_vm2, %v90_v36 }
 0x16c   :  { %v220_v41 = vpop.permute.xlu2 %219 }
 0x172   :  { %v135_v40 = vpop.permute.xlu1 %134 }
 0x173   :  { %138 = vst.msk [vmem:[#allocation2] sm:$0xff] %vm137_vm3, %v135_v40 }
 0x174   :  { %140 = vst.msk [vmem:[#allocation2 + $0x8] sm:$0xff] %vm139_vm4, %v135_v40  ;;  %v268_v2 = vpop.permute.xlu2 %267 }
 0x175   :  { %223 = vst.msk [vmem:[#allocation2 + $0x8] sm:$0xff] %vm222_vm5, %v220_v41 }
 0x17a   :  { %v224_v45 = vld [vmem:[#allocation2] sm:$0xff] }
 0x17b   :  { %v232_v47 = vmul.f32 %v228_v43, %v224_v45 }
 0x17c   :  { %v225_v46 = vld [vmem:[#allocation2 + $0x8] sm:$0xff]  ;;  %v276_v12 = vpop.permute.xlu2 %275 }
 0x17d   :  { %v233_v48 = vmul.f32 %v229_v44, %v225_v46  ;;  %v240_v52 = vmul.f32 %v232_v47, %v232_v47 }
 0x17f   :  { %v235_v49 = vsel %vm234_vm6, %v233_v48, 0.0  ;;  %v241_v50 = vmul.f32 %v233_v48, %v233_v48 }
 0x180   :  { %v236_v51 = vadd.f32 %v235_v49, %v232_v47 }
 0x181   :  { %v242_v53 = vsel %vm234_vm6, %v241_v50, 0.0 }
 0x182   :  { %237 = vadd.xlane.f32.xlu0 %v236_v51  ;;  %v243_v54 = vadd.f32 %v242_v53, %v240_v52 }
 0x184   :  { %244 = vadd.xlane.f32.xlu1 %v243_v54 }
 0x1f5   :  { %v238_v55 = vpop.xlane.xlu0 %237 }
 0x1f6   :  { %v239_v56 = vmul.f32 0.0078125, %v238_v55 }
 0x1f7   :  { %v245_v57 = vpop.xlane.xlu1 %244 }
 0x1f8   :  { %v246_v58 = vmul.f32 0.0078125, %v245_v57  ;;  %v247_v59 = vmul.f32 %v239_v56, %v239_v56  ;;  %v249_v5 = vsub.f32 %v224_v45, %v239_v56  ;;  %v250_v6 = vsub.f32 %v225_v46, %v239_v56 }
 0x1fa   :  { %v248_v60 = vsub.f32 %v246_v58, %v247_v59 }
 0x1fc   :  { %v251_v61 = vadd.f32 1e-05, %v248_v60 }
 0x1fe   :  { %322 = vrsqrt.f32 %v251_v61  ;;  %vm258_vm8 = vweird.f32 %v251_v61 }
 0x204   :  { %v323_v62 = vpop.eup %322 }
 0x205   :  { %v253_v63 = vmul.f32 %v323_v62, %v251_v61  ;;  %vm259_vm7 = vweird.f32 %v323_v62 }
 0x206   :  { %vm260_vm9 = vmor %vm258_vm8, %vm259_vm7 }
 0x207   :  { %v254_v0 = vmul.f32 %v323_v62, %v253_v63 }
 0x209   :  { %v255_v1 = vmul.f32 0.5, %v254_v0 }
 0x20b   :  { %v256_v3 = vsub.f32 1.5, %v255_v1 }
 0x20d   :  { %v257_v4 = vmul.f32 %v323_v62, %v256_v3 }
 0x20f   :  { %v261_v7 = vsel %vm260_vm9, %v323_v62, %v257_v4 }
 0x210   :  { %v262_v8 = vmul.f32 %v261_v7, %v249_v5  ;;  %v263_v9 = vmul.f32 %v261_v7, %v250_v6 }
 0x212   :  { %v270_v10 = vmul.f32 %v268_v2, %v262_v8  ;;  %v271_v11 = vmul.f32 %v268_v2, %v263_v9 }
 0x214   :  { %v278_v13 = vadd.f32 %v276_v12, %v270_v10  ;;  %v279_v14 = vadd.f32 %v276_v12, %v271_v11 }
 0x216   :  { %v280_v15 = vmax.f32 %v278_v13, 0.0  ;;  %v281_v16 = vmax.f32 %v279_v14, 0.0 }
 0x218   :  { %v282_v17 = vpack.c.bf16 %v281_v16, %v280_v15 }
 0x21a   :  { %286 = vst.msk [vmem:[%s417_s5] sm:$0xff] %vm285_vm12, %v282_v17 }

// kernel: vae_forward.14
= control target key start
LH: loop header
LB: loop body
LE: loop exit
PB: predicated region body
PF: predicated region fallthrough
CT: control target
= control target key end

     0   :  { %vm32_vm0 = vcmask 1043456   ;;  %s536_s20 = smov 119   ;;  %s537_s21 = smov 127   ;;  %vm28_vm1 = vcmask 64512   ;;  %vm279_vm2 = vcmask 965632   ;;  %vm192_vm3 = vcmask 973824   ;;  %s668_s0 = inlined_call_operand.vmem [shape: bf16[1,8,162], index: 0, kind: input, shape index: {}]   ;;  %s669_s1 = inlined_call_operand.vmem [shape: bf16[9,8,8], index: 1, kind: input, shape index: {}]   ;;  %s670_s2 = inlined_call_operand.vmem [shape: f32[8,1], index: 2, kind: input, shape index: {}]   ;;  %s671_s3 = inlined_call_operand.vmem [shape: f32[8,1], index: 3, kind: input, shape index: {}]   ;;  %s672_s4 = inlined_call_operand.vmem [shape: f32[1,608], index: 4, kind: input, shape index: {}]   ;;  %s673_s5 = inlined_call_operand.vmem [shape: bf16[8,608], index: 5, kind: output, shape index: {}]  }
   0x1   :  { %v21_v0 = vld [vmem:[%s668_s0] sm:$0xff]  ;;  %s538_s22 = smov 118   ;;  %v502_v7 = vld [vmem:[%s669_s1 + $0x8] sm:$0xf]  ;;  %v508_v9 = vld [vmem:[%s669_s1 + $0x10] sm:$0xf] }
   0x2   :  { %v24_v1 = vunpack.c.l.b16 %v21_v0  ;;  %v25_v2 = vunpack.c.h.b16 %v21_v0  ;;  %v22_v8 = vld [vmem:[%s669_s1] sm:$0xf]  ;;  %vm105_vm4 = vcmask 1039360   ;;  %v501_v23 = vld [vmem:[%s669_s1 + $0x4] sm:$0xf]  ;;  %vm66_vm5 = vcmask 195584  }
   0x3   :  { %v514_v25 = vld [vmem:[%s669_s1 + $0x18] sm:$0xf]  ;;  %v507_v27 = vld [vmem:[%s669_s1 + $0xc] sm:$0xf]  ;;  %v519_v28 = vld [vmem:[%s669_s1 + $0x1c] sm:$0xf] }
   0x4   :  { %v26_v3 = vpack.c.b16 %v24_v1, %v24_v1  ;;  %v27_v4 = vpack.c.b16 %v25_v2, %v25_v2  ;;  %v513_v37 = vld [vmem:[%s669_s1 + $0x14] sm:$0xf]  ;;  %v522_v38 = vld [vmem:[%s669_s1 + $0x20] sm:$0xf]  ;;  %s539_s15 = smov 24   ;;  %s540_s1 = smov 48  }
   0x5   :  { %s541_s16 = smov 72   ;;  %vm151_vm6 = vcmask 1047744   ;;  %vm153_vm7 = vcmask 392192   ;;  %vm238_vm8 = vcmask 1047936   ;;  %vm240_vm9 = vcmask 588800  }
   0x6   :  { %188 = vrot.lane.b32.xlu1 %v26_v3, %s536_s20  ;;  %101 = vrot.lane.b32.xlu0 %v26_v3, %s537_s21  ;;  %v37_v5 = vsel %vm32_vm0, %v27_v4, 0  ;;  %v578_v6 = vsel %vm32_vm0, %v26_v3, 0  ;;  %vm391_vm10 = vcmask 1048128   ;;  %vm393_vm11 = vcmask 785408  }
   0x7   :  { %275 = vrot.lane.b32.xlu2 %v26_v3, %s538_s22  ;;  %95 = vmatpush.bf16.msra.mxu3 %v37_v5  ;;  %vm493_vm15 = vcmask 781312  }
   0x8   :  { %82 = vmatpush.bf16.msra.mxu2 %v578_v6  ;;  %59 = vmatpush.bf16.msra.mxu1 %v37_v5 }
   0x9   :  { %46 = vmatpush.bf16.msra.mxu0 %v578_v6 }
   0xa   :  { %504 = vmatmul.msk.bf16.vlgmr.msra.gmra.mxu3 %vm28_vm1, %v502_v7 }
   0xb   :  { %182 = vmatpush.bf16.msrb.mxu3 %v37_v5  ;;  %503 = vmatmul.msk.bf16.vlgmr.msra.gmra.mxu2 %vm28_vm1, %v502_v7 }
   0xc   :  { %169 = vmatpush.bf16.msrb.mxu2 %v578_v6  ;;  %500 = vmatmul.msk.bf16.vlgmr.msra.gmra.mxu1 %vm28_vm1, %v22_v8 }
   0xd   :  { %499 = vmatmul.msk.bf16.vlgmr.msra.gmra.mxu0 %vm28_vm1, %v22_v8 }
   0xe   :  { %190 = vrot.lane.b32.xlu1 %v27_v4, %s536_s20  ;;  %103 = vrot.lane.b32.xlu0 %v27_v4, %s537_s21 }
   0xf   :  { %277 = vrot.lane.b32.xlu2 %v27_v4, %s538_s22 }
  0x1a   :  { %510 = vmatmul.msk.bf16.vlgmr.msrb.gmra.mxu3 %vm28_vm1, %v508_v9 }
  0x1b   :  { %509 = vmatmul.msk.bf16.vlgmr.msrb.gmra.mxu2 %vm28_vm1, %v508_v9 }
  0x61   :  { %v276_v10 = vpop.permute.xlu2 %275 }
  0x69   :  { %v278_v13 = vpop.permute.xlu2 %277 }
  0x6a   :  { %v280_v16 = vsel %vm279_vm2, %v276_v10, %v278_v13  ;;  %v288_v26 = vsel %vm32_vm0, %v278_v13, 0 }
  0x6b   :  { %v285_v24 = vsel %vm32_vm0, %v280_v16, 0 }
  0x78   :  { %v189_v11 = vpop.permute.xlu1 %188  ;;  %v102_v12 = vpop.permute.xlu0 %101 }
  0x80   :  { %v191_v14 = vpop.permute.xlu1 %190  ;;  %v104_v15 = vpop.permute.xlu0 %103 }
  0x81   :  { %v193_v17 = vsel %vm192_vm3, %v189_v11, %v191_v14  ;;  %v201_v18 = vsel %vm32_vm0, %v191_v14, 0  ;;  %v114_v19 = vsel %vm32_vm0, %v104_v15, 0  ;;  %v106_v20 = vsel %vm105_vm4, %v102_v12, %v104_v15 }
  0x82   :  { %v198_v21 = vsel %vm32_vm0, %v193_v17, 0  ;;  %136 = vmatpush.bf16.msrb.mxu1 %v114_v19  ;;  %269 = vmatpush.bf16.msra.mxu3 %v201_v18  ;;  %v111_v22 = vsel %vm32_vm0, %v106_v20, 0  ;;  %v542_v20 = vmov 0  }
  0x83   :  { %123 = vmatpush.bf16.msrb.mxu0 %v111_v22  ;;  %256 = vmatpush.bf16.msra.mxu2 %v198_v21 }
  0x84   :  { %532 = vset.pattern.permute.xlu2 %v542_v20  ;;  %533 = vset.pattern.permute.xlu0 %v542_v20 }
  0x85   :  { %506 = vmatmul.msk.bf16.vlgmr.msrb.gmra.mxu1 %vm28_vm1, %v501_v23  ;;  %516 = vmatmul.msk.bf16.vlgmr.msra.gmra.mxu3 %vm28_vm1, %v514_v25 }
  0x86   :  { %341 = vmatpush.bf16.msrb.mxu3 %v114_v19  ;;  %505 = vmatmul.msk.bf16.vlgmr.msrb.gmra.mxu0 %vm28_vm1, %v501_v23  ;;  %v461_v19 = vld [vmem:[%s670_s2] sm:$0xff] }
  0x87   :  { %328 = vmatpush.bf16.msrb.mxu2 %v111_v22  ;;  %210 = vmatpush.bf16.msra.mxu0 %v198_v21  ;;  %v472_v21 = vld [vmem:[%s671_s3] sm:$0xff] }
  0x88   :  { %223 = vmatpush.bf16.msra.mxu1 %v201_v18  ;;  %515 = vmatmul.msk.bf16.vlgmr.msra.gmra.mxu2 %vm28_vm1, %v514_v25  ;;  %v400_v22 = vld [vmem:[%s672_s4] sm:$0x1f] }
  0x89   :  { %v61_v29 = vpop.f32.mrf.mxu1  ;;  %v403_v23 = vperm.slane %v400_v22, 1  ;;  %v402_v25 = vperm.slane %v400_v22, 0 }
  0x8a   :  { %v622_v30 = vpop.f32.mrf.mxu0  ;;  %67 = vst.msk [vmem:[#allocation2 + $0x8] sm:$0xff] %vm66_vm5, %v61_v29 }
  0x8b   :  { %297 = vmatpush.bf16.msrb.mxu0 %v285_v24 }
  0x8c   :  { %310 = vmatpush.bf16.msrb.mxu1 %v288_v26  ;;  %v404_v26 = vperm.slane %v400_v22, 2 }
  0x8d   :  { %v97_v32 = vpop.f32.mrf.mxu3 }
  0x8e   :  { %v84_v31 = vpop.f32.mrf.mxu2 }
  0x91   :  { %v63_v33 = vpop.f32.mrf.mxu1 }
  0x92   :  { %v50_v34 = vpop.f32.mrf.mxu0  ;;  %v412_v33 = vmul.f32 %v402_v25, %v622_v30 }
  0x95   :  { %512 = vmatmul.msk.bf16.vlgmr.msra.gmra.mxu1 %vm28_vm1, %v507_v27  ;;  %521 = vmatmul.msk.bf16.vlgmr.msrb.gmra.mxu3 %vm28_vm1, %v519_v28  ;;  %v99_v36 = vpop.f32.mrf.mxu3 }
  0x96   :  { %511 = vmatmul.msk.bf16.vlgmr.msra.gmra.mxu0 %vm28_vm1, %v507_v27  ;;  %374 = vmatpush.bf16.msra.mxu1 %v37_v5  ;;  %v86_v35 = vpop.f32.mrf.mxu2  ;;  %v405_v36 = vperm.slane %v400_v22, 3 }
  0x97   :  { %361 = vmatpush.bf16.msra.mxu0 %v578_v6 }
  0x98   :  { %520 = vmatmul.msk.bf16.vlgmr.msrb.gmra.mxu2 %vm28_vm1, %v519_v28 }
  0x9d   :  { %v184_v40 = vpop.f32.mrf.mxu3 }
  0x9e   :  { %v171_v39 = vpop.f32.mrf.mxu2 }
  0xa5   :  { %518 = vmatmul.msk.bf16.vlgmr.msrb.gmra.mxu1 %vm28_vm1, %v513_v37  ;;  %v186_v42 = vpop.f32.mrf.mxu3 }
  0xa6   :  { %517 = vmatmul.msk.bf16.vlgmr.msrb.gmra.mxu0 %vm28_vm1, %v513_v37  ;;  %v173_v41 = vpop.f32.mrf.mxu2 }
  0xb5   :  { %524 = vmatmul.msk.bf16.vlgmr.msra.gmra.mxu1 %vm28_vm1, %v522_v38 }
  0xb6   :  { %523 = vmatmul.msk.bf16.vlgmr.msra.gmra.mxu0 %vm28_vm1, %v522_v38  ;;  %v425_v38 = vmul.f32 %v412_v33, %v412_v33 }
 0x102   :  { %v138_v43 = vpop.f32.mrf.mxu1 }
 0x103   :  { %v139_v44 = vadd.f32 %v138_v43, %v97_v32  ;;  %v125_v45 = vpop.f32.mrf.mxu0 }
 0x104   :  { %v126_v46 = vadd.f32 %v125_v45, %v84_v31 }
 0x105   :  { %146 = vrot.lane.b32.xlu1 %v139_v44, %s539_s15 }
 0x106   :  { %144 = vrot.lane.b32.xlu0 %v126_v46, %s539_s15 }
 0x108   :  { %v271_v50 = vpop.f32.mrf.mxu3 }
 0x10a   :  { %v140_v47 = vpop.f32.mrf.mxu1 }
 0x10b   :  { %v258_v48 = vpop.f32.mrf.mxu2  ;;  %v127_v49 = vpop.f32.mrf.mxu0 }
 0x110   :  { %v273_v56 = vpop.f32.mrf.mxu3 }
 0x112   :  { %v225_v51 = vpop.f32.mrf.mxu1 }
 0x113   :  { %v260_v52 = vpop.f32.mrf.mxu2  ;;  %v226_v53 = vadd.f32 %v225_v51, %v184_v40  ;;  %v212_v54 = vpop.f32.mrf.mxu0 }
 0x114   :  { %v213_v55 = vadd.f32 %v212_v54, %v171_v39  ;;  %v406_v39 = vperm.slane %v400_v22, 4 }
 0x115   :  { %233 = vrot.lane.b32.xlu0 %v226_v53, %s540_s1 }
 0x116   :  { %231 = vrot.lane.b32.xlu2 %v213_v55, %s540_s1 }
 0x118   :  { %v343_v60 = vpop.f32.mrf.mxu3 }
 0x11a   :  { %v227_v58 = vpop.f32.mrf.mxu1 }
 0x11b   :  { %v330_v57 = vpop.f32.mrf.mxu2  ;;  %v214_v59 = vpop.f32.mrf.mxu0 }
 0x120   :  { %v345_v0 = vpop.f32.mrf.mxu3 }
 0x122   :  { %v312_v61 = vpop.f32.mrf.mxu1 }
 0x123   :  { %v332_v62 = vpop.f32.mrf.mxu2  ;;  %v299_v63 = vpop.f32.mrf.mxu0  ;;  %v313_v3 = vadd.f32 %v312_v61, %v271_v50 }
 0x124   :  { %v300_v4 = vadd.f32 %v299_v63, %v258_v48 }
 0x125   :  { %v348_v5 = vadd.f32 %v343_v60, %v313_v3 }
 0x126   :  { %v347_v6 = vadd.f32 %v330_v57, %v300_v4 }
 0x12a   :  { %v314_v1 = vpop.f32.mrf.mxu1 }
 0x12b   :  { %v301_v2 = vpop.f32.mrf.mxu0 }
 0x132   :  { %v376_v7 = vpop.f32.mrf.mxu1 }
 0x133   :  { %v363_v8 = vpop.f32.mrf.mxu0  ;;  %v381_v9 = vadd.f32 %v376_v7, %v348_v5 }
 0x134   :  { %v380_v10 = vadd.f32 %v363_v8, %v347_v6 }
 0x135   :  { %386 = vrot.lane.b32.xlu2 %v381_v9, %s541_s16 }
 0x136   :  { %384 = vrot.lane.b32.xlu1 %v380_v10, %s541_s16 }
 0x13a   :  { %v378_v11 = vpop.f32.mrf.mxu1 }
 0x13b   :  { %v365_v12 = vpop.f32.mrf.mxu0 }
 0x13d   :  { %464 = vperm.xlu2 %532, %v461_v19  }
 0x145   :  { %475 = vperm.xlu2 %532, %v472_v21  }
 0x170   :  { %v232_v16 = vpop.permute.xlu2 %231 }
 0x177   :  { %v147_v13 = vpop.permute.xlu1 %146 }
 0x178   :  { %v145_v14 = vpop.permute.xlu0 %144 }
 0x179   :  { %v148_v15 = vsel %vm66_vm5, %v145_v14, %v147_v13  ;;  %152 = vst.msk [vmem:[#allocation2 + $0x8] sm:$0xff] %vm151_vm6, %v145_v14 }
 0x17a   :  { %154 = vst.msk [vmem:[#allocation2 + $0x10] sm:$0xff] %vm153_vm7, %v148_v15 }
 0x17b   :  { %239 = vst.msk [vmem:[#allocation2 + $0x10] sm:$0xff] %vm238_vm8, %v232_v16 }
 0x180   :  { %v649_v24 = vld [vmem:[#allocation2 + $0x8] sm:$0xff] }
 0x181   :  { %v413_v27 = vmul.f32 %v403_v23, %v649_v24 }
 0x182   :  { %v397_v31 = vld [vmem:[#allocation2 + $0x10] sm:$0xff] }
 0x183   :  { %v414_v34 = vmul.f32 %v404_v26, %v397_v31  ;;  %v426_v35 = vmul.f32 %v413_v27, %v413_v27  ;;  %v417_v37 = vadd.f32 %v413_v27, %v412_v33 }
 0x185   :  { %v427_v40 = vmul.f32 %v414_v34, %v414_v34  ;;  %v430_v41 = vadd.f32 %v426_v35, %v425_v38  ;;  %v418_v45 = vadd.f32 %v417_v37, %v414_v34 }
 0x187   :  { %v234_v17 = vpop.permute.xlu0 %233  ;;  %v431_v49 = vadd.f32 %v430_v41, %v427_v40 }
 0x188   :  { %v235_v18 = vsel %vm153_vm7, %v232_v16, %v234_v17 }
 0x189   :  { %241 = vst.msk [vmem:[#allocation2 + $0x18] sm:$0xff] %vm240_vm9, %v235_v18 }
 0x18f   :  { %v387_v28 = vpop.permute.xlu2 %386 }
 0x197   :  { %v465_v3 = vpop.permute.xlu2 %464 }
 0x19f   :  { %v476_v21 = vpop.permute.xlu2 %475 }
 0x1a8   :  { %v385_v29 = vpop.permute.xlu1 %384 }
 0x1a9   :  { %v388_v32 = vsel %vm240_vm9, %v385_v29, %v387_v28  ;;  %392 = vst.msk [vmem:[#allocation2 + $0x18] sm:$0xff] %vm391_vm10, %v385_v29 }
 0x1aa   :  { %394 = vst.msk [vmem:[#allocation2 + $0x20] sm:$0xff] %vm393_vm11, %v388_v32 }
 0x1b0   :  { %v398_v42 = vld [vmem:[#allocation2 + $0x18] sm:$0xff] }
 0x1b1   :  { %v399_v43 = vld [vmem:[#allocation2 + $0x20] sm:$0xff]  ;;  %v415_v44 = vmul.f32 %v405_v36, %v398_v42 }
 0x1b2   :  { %v416_v46 = vmul.f32 %v406_v39, %v399_v43 }
 0x1b3   :  { %v419_v47 = vadd.f32 %v418_v45, %v415_v44  ;;  %v428_v48 = vmul.f32 %v415_v44, %v415_v44 }
 0x1b4   :  { %v420_v50 = vsel %vm393_vm11, %v416_v46, 0.0  ;;  %v429_v51 = vmul.f32 %v416_v46, %v416_v46 }
 0x1b5   :  { %v421_v52 = vadd.f32 %v420_v50, %v419_v47  ;;  %v432_v53 = vadd.f32 %v431_v49, %v428_v48 }
 0x1b6   :  { %v433_v54 = vsel %vm393_vm11, %v429_v51, 0.0 }
 0x1b7   :  { %422 = vadd.xlane.f32.xlu0 %v421_v52  ;;  %v434_v55 = vadd.f32 %v433_v54, %v432_v53 }
 0x1b9   :  { %435 = vadd.xlane.f32.xlu1 %v434_v55 }
 0x22a   :  { %v423_v56 = vpop.xlane.xlu0 %422 }
 0x22b   :  { %v424_v57 = vmul.f32 0.001953125, %v423_v56 }
 0x22c   :  { %v436_v58 = vpop.xlane.xlu1 %435 }
 0x22d   :  { %v437_v59 = vmul.f32 0.001953125, %v436_v58  ;;  %v438_v60 = vmul.f32 %v424_v57, %v424_v57  ;;  %v440_v6 = vsub.f32 %v622_v30, %v424_v57  ;;  %v441_v7 = vsub.f32 %v649_v24, %v424_v57 }
 0x22e   :  { %v442_v8 = vsub.f32 %v397_v31, %v424_v57  ;;  %v443_v9 = vsub.f32 %v398_v42, %v424_v57  ;;  %v444_v11 = vsub.f32 %v399_v43, %v424_v57 }
 0x22f   :  { %v439_v61 = vsub.f32 %v437_v59, %v438_v60 }
 0x231   :  { %v445_v62 = vadd.f32 1e-05, %v439_v61 }
 0x233   :  { %534 = vrsqrt.f32 %v445_v62  ;;  %vm452_vm13 = vweird.f32 %v445_v62 }
 0x239   :  { %v535_v63 = vpop.eup %534 }
 0x23a   :  { %v447_v0 = vmul.f32 %v535_v63, %v445_v62  ;;  %vm453_vm12 = vweird.f32 %v535_v63 }
 0x23b   :  { %vm454_vm14 = vmor %vm452_vm13, %vm453_vm12 }
 0x23c   :  { %v448_v1 = vmul.f32 %v535_v63, %v447_v0 }
 0x23e   :  { %v449_v2 = vmul.f32 0.5, %v448_v1 }
 0x240   :  { %v450_v4 = vsub.f32 1.5, %v449_v2 }
 0x242   :  { %v451_v5 = vmul.f32 %v535_v63, %v450_v4 }
 0x244   :  { %v455_v10 = vsel %vm454_vm14, %v535_v63, %v451_v5 }
 0x245   :  { %v456_v12 = vmul.f32 %v455_v10, %v440_v6  ;;  %v457_v13 = vmul.f32 %v455_v10, %v441_v7  ;;  %v458_v14 = vmul.f32 %v455_v10, %v442_v8  ;;  %v459_v15 = vmul.f32 %v455_v10, %v443_v9 }
 0x246   :  { %v460_v16 = vmul.f32 %v455_v10, %v444_v11 }
 0x247   :  { %v467_v17 = vmul.f32 %v465_v3, %v456_v12  ;;  %v468_v18 = vmul.f32 %v465_v3, %v457_v13  ;;  %v469_v19 = vmul.f32 %v465_v3, %v458_v14  ;;  %v470_v20 = vmul.f32 %v465_v3, %v459_v15 }
 0x248   :  { %v471_v22 = vmul.f32 %v465_v3, %v460_v16 }
 0x249   :  { %v478_v23 = vadd.f32 %v476_v21, %v467_v17  ;;  %v479_v25 = vadd.f32 %v476_v21, %v468_v18  ;;  %v480_v30 = vadd.f32 %v476_v21, %v469_v19  ;;  %v481_v26 = vadd.f32 %v476_v21, %v470_v20 }
 0x24a   :  { %v482_v24 = vadd.f32 %v476_v21, %v471_v22 }
 0x24b   :  { %v483_v27 = vmax.f32 %v478_v23, 0.0  ;;  %v484_v28 = vmax.f32 %v479_v25, 0.0  ;;  %v485_v29 = vmax.f32 %v480_v30, 0.0  ;;  %v486_v31 = vmax.f32 %v481_v26, 0.0 }
 0x24c   :  { %v487_v32 = vmax.f32 %v482_v24, 0.0 }
 0x24d   :  { %v488_v33 = vpack.c.bf16 %v484_v28, %v483_v27  ;;  %v489_v34 = vpack.c.bf16 %v486_v31, %v485_v29 }
 0x24e   :  { %v490_v35 = vpack.c.bf16 %v487_v32, %v487_v32 }
 0x24f   :  { %491 = vst [vmem:[%s673_s5] sm:$0xff] %v488_v33 }
 0x250   :  { %492 = vst [vmem:[%s673_s5 + $0x8] sm:$0xff] %v489_v34 }
 0x251   :  { %494 = vst.msk [vmem:[%s673_s5 + $0x10] sm:$0xf] %vm493_vm15, %v490_v35 }

// kernel: vae_forward.15
= control target key start
LH: loop header
LB: loop body
LE: loop exit
PB: predicated region body
PF: predicated region fallthrough
CT: control target
= control target key end

     0   :  { %s1143_s22 = smov 127   ;;  %s1145_s23 = smov 110   ;;  %vm50_vm0 = vcmask 1039360   ;;  %vm59_vm1 = vcmask 1043456   ;;  %vm55_vm2 = vcmask 64512   ;;  %vm235_vm3 = vcmask 1031168   ;;  %s1433_s0 = inlined_call_operand.vmem [shape: bf16[1,8,648], index: 0, kind: input, shape index: {}]   ;;  %s1434_s3 = inlined_call_operand.vmem [shape: f32[3,1], index: 3, kind: input, shape index: {}]   ;;  %s1435_s4 = inlined_call_operand.vmem [shape: f32[1,610], index: 4, kind: input, shape index: {}]   ;;  %s1436_s1 = inlined_call_operand.vmem [shape: bf16[9,3,8], index: 1, kind: input, shape index: {}]   ;;  %s1437_s2 = inlined_call_operand.vmem [shape: f32[3,1], index: 2, kind: input, shape index: {}]   ;;  %s1438_s5 = inlined_call_operand.vmem [shape: f32[3,610], index: 5, kind: output, shape index: {}]  }
   0x1   :  { %v22_v0 = vld [vmem:[%s1433_s0 + $0x8] sm:$0xff]  ;;  %v21_v1 = vld [vmem:[%s1433_s0] sm:$0xff]  ;;  %v1192_v4 = vld [vmem:[%s1433_s0 + $0x10] sm:$0xff]  ;;  %s1144_s0 = smov 126   ;;  %s1146_s24 = smov 109   ;;  %vm340_vm4 = vcmask 900096  }
   0x2   :  { %v33_v2 = vunpack.c.h.b16 %v22_v0  ;;  %v30_v3 = vunpack.c.l.b16 %v21_v1  ;;  %v32_v5 = vunpack.c.l.b16 %v22_v0  ;;  %v34_v9 = vunpack.c.l.b16 %v1192_v4  ;;  %s1147_s25 = smov 108   ;;  %s1148_s26 = smov 92   ;;  %v1063_v22 = vld [vmem:[%s1436_s1 + $0x2] sm:$0x3]  ;;  %v24_v44 = vld [vmem:[%s1436_s1] sm:$0x3] }
   0x3   :  { %v31_v10 = vunpack.c.h.b16 %v21_v1  ;;  %s1149_s27 = smov 91   ;;  %s1150_s28 = smov 90   ;;  %v645_v15 = vunpack.c.h.b16 %v1192_v4  ;;  %v1074_v58 = vld [vmem:[%s1436_s1 + $0x4] sm:$0x3]  ;;  %vm445_vm5 = vcmask 891904   ;;  %vm550_vm6 = vcmask 883712  }
   0x4   :  { %v1194_v6 = vpack.c.b16 %v33_v2, %v33_v2  ;;  %v1196_v7 = vpack.c.b16 %v30_v3, %v30_v3  ;;  %v1198_v8 = vpack.c.b16 %v32_v5, %v32_v5  ;;  %v1204_v11 = vpack.c.b16 %v34_v9, %v34_v9 }
   0x5   :  { %v1206_v12 = vpack.c.b16 %v31_v10, %v31_v10  ;;  %v646_v20 = vpack.c.b16 %v645_v15, %v645_v15  ;;  %vm659_vm7 = vcmask 752640   ;;  %vm767_vm8 = vcmask 744448  }
   0x6   :  { %46 = vrot.lane.b32.xlu1 %v1194_v6, %s1143_s22  ;;  %40 = vrot.lane.b32.xlu0 %v1196_v7, %s1143_s22  ;;  %v150_v26 = vsel %vm59_vm1, %v1198_v8, 0  ;;  %v144_v34 = vsel %vm59_vm1, %v1196_v7, 0  ;;  %v153_v35 = vsel %vm59_vm1, %v1194_v6, 0  ;;  %v156_v36 = vsel %vm59_vm1, %v1204_v11, 0 }
   0x7   :  { %44 = vrot.lane.b32.xlu2 %v1198_v8, %s1143_s22  ;;  %v147_v19 = vsel %vm59_vm1, %v1206_v12, 0  ;;  %vm875_vm9 = vcmask 736256   ;;  %vm981_vm10 = vcmask 796672  }
   0xe   :  { %48 = vrot.lane.b32.xlu1 %v1204_v11, %s1143_s22  ;;  %42 = vrot.lane.b32.xlu0 %v1206_v12, %s1143_s22 }
   0xf   :  { %227 = vrot.lane.b32.xlu2 %v1206_v12, %s1144_s0 }
  0x16   :  { %225 = vrot.lane.b32.xlu1 %v1196_v7, %s1144_s0  ;;  %229 = vrot.lane.b32.xlu0 %v1198_v8, %s1144_s0 }
  0x17   :  { %231 = vrot.lane.b32.xlu2 %v1194_v6, %s1144_s0 }
  0x1e   :  { %330 = vrot.lane.b32.xlu0 %v1196_v7, %s1145_s23  ;;  %332 = vrot.lane.b32.xlu1 %v1206_v12, %s1145_s23 }
  0x1f   :  { %233 = vrot.lane.b32.xlu2 %v1204_v11, %s1144_s0 }
  0x26   :  { %334 = vrot.lane.b32.xlu0 %v1198_v8, %s1145_s23  ;;  %338 = vrot.lane.b32.xlu1 %v1204_v11, %s1145_s23 }
  0x27   :  { %336 = vrot.lane.b32.xlu2 %v1194_v6, %s1145_s23 }
  0x2e   :  { %437 = vrot.lane.b32.xlu1 %v1206_v12, %s1146_s24  ;;  %435 = vrot.lane.b32.xlu0 %v1196_v7, %s1146_s24 }
  0x2f   :  { %441 = vrot.lane.b32.xlu2 %v1194_v6, %s1146_s24 }
  0x36   :  { %439 = vrot.lane.b32.xlu1 %v1198_v8, %s1146_s24  ;;  %443 = vrot.lane.b32.xlu0 %v1204_v11, %s1146_s24 }
  0x37   :  { %544 = vrot.lane.b32.xlu2 %v1198_v8, %s1147_s25 }
  0x3e   :  { %546 = vrot.lane.b32.xlu0 %v1194_v6, %s1147_s25  ;;  %542 = vrot.lane.b32.xlu1 %v1206_v12, %s1147_s25 }
  0x3f   :  { %540 = vrot.lane.b32.xlu2 %v1196_v7, %s1147_s25 }
  0x46   :  { %548 = vrot.lane.b32.xlu0 %v1204_v11, %s1147_s25  ;;  %649 = vrot.lane.b32.xlu1 %v1206_v12, %s1148_s26 }
  0x47   :  { %651 = vrot.lane.b32.xlu2 %v1198_v8, %s1148_s26 }
  0x4e   :  { %647 = vrot.lane.b32.xlu0 %v1196_v7, %s1148_s26  ;;  %653 = vrot.lane.b32.xlu1 %v1194_v6, %s1148_s26 }
  0x4f   :  { %755 = vrot.lane.b32.xlu2 %v1196_v7, %s1149_s27 }
  0x56   :  { %757 = vrot.lane.b32.xlu0 %v1206_v12, %s1149_s27  ;;  %655 = vrot.lane.b32.xlu1 %v1204_v11, %s1148_s26 }
  0x57   :  { %657 = vrot.lane.b32.xlu2 %v646_v20, %s1148_s26 }
  0x5e   :  { %759 = vrot.lane.b32.xlu0 %v1198_v8, %s1149_s27  ;;  %763 = vrot.lane.b32.xlu1 %v1204_v11, %s1149_s27 }
  0x5f   :  { %765 = vrot.lane.b32.xlu2 %v646_v20, %s1149_s27 }
  0x61   :  { %v45_v13 = vpop.permute.xlu2 %44 }
  0x66   :  { %761 = vrot.lane.b32.xlu0 %v1194_v6, %s1149_s27  ;;  %863 = vrot.lane.b32.xlu1 %v1196_v7, %s1150_s28 }
  0x67   :  { %865 = vrot.lane.b32.xlu2 %v1206_v12, %s1150_s28 }
  0x69   :  { %v228_v14 = vpop.permute.xlu2 %227 }
  0x6e   :  { %869 = vrot.lane.b32.xlu0 %v1194_v6, %s1150_s28  ;;  %871 = vrot.lane.b32.xlu1 %v1204_v11, %s1150_s28 }
  0x6f   :  { %867 = vrot.lane.b32.xlu2 %v1198_v8, %s1150_s28 }
  0x71   :  { %v232_v23 = vpop.permute.xlu2 %231 }
  0x76   :  { %873 = vrot.lane.b32.xlu0 %v646_v20, %s1150_s28 }
  0x78   :  { %v47_v16 = vpop.permute.xlu1 %46  ;;  %v41_v17 = vpop.permute.xlu0 %40 }
  0x79   :  { %v53_v18 = vsel %vm50_vm0, %v45_v13, %v47_v16  ;;  %v234_v41 = vpop.permute.xlu2 %233 }
  0x7a   :  { %v67_v21 = vsel %vm59_vm1, %v53_v18, 0  ;;  %v256_v45 = vsel %vm59_vm1, %v234_v41, 0  ;;  %v239_v49 = vsel %vm235_vm3, %v232_v23, %v234_v41 }
  0x7b   :  { %108 = vmatpush.bf16.msra.mxu2 %v67_v21  ;;  %v253_v52 = vsel %vm59_vm1, %v239_v49, 0 }
  0x7e   :  { %1066 = vmatmul.msk.bf16.vlgmr.msra.gmra.mxu2 %vm55_vm2, %v1063_v22 }
  0x7f   :  { %178 = vmatpush.bf16.msrb.mxu2 %v147_v19 }
  0x80   :  { %v49_v24 = vpop.permute.xlu1 %48  ;;  %v43_v25 = vpop.permute.xlu0 %42 }
  0x81   :  { %v51_v27 = vsel %vm50_vm0, %v41_v17, %v43_v25  ;;  %v52_v28 = vsel %vm50_vm0, %v43_v25, %v45_v13  ;;  %v54_v29 = vsel %vm50_vm0, %v47_v16, %v49_v24  ;;  %v73_v30 = vsel %vm59_vm1, %v49_v24, 0  ;;  %v337_v54 = vpop.permute.xlu2 %336  ;;  %v1080_v13 = vld [vmem:[%s1436_s1 + $0x6] sm:$0x3] }
  0x82   :  { %v61_v31 = vsel %vm59_vm1, %v51_v27, 0  ;;  %v64_v32 = vsel %vm59_vm1, %v52_v28, 0  ;;  %v70_v33 = vsel %vm59_vm1, %v54_v29, 0 }
  0x83   :  { %82 = vmatpush.bf16.msra.mxu0 %v61_v31  ;;  %95 = vmatpush.bf16.msra.mxu1 %v64_v32  ;;  %v1086_v31 = vld [vmem:[%s1436_s1 + $0x8] sm:$0x3] }
  0x84   :  { %121 = vmatpush.bf16.msra.mxu3 %v70_v33 }
  0x86   :  { %1064 = vmatmul.msk.bf16.vlgmr.msra.gmra.mxu0 %vm55_vm2, %v1063_v22  ;;  %1065 = vmatmul.msk.bf16.vlgmr.msra.gmra.mxu1 %vm55_vm2, %v1063_v22 }
  0x87   :  { %134 = vmatpush.bf16.msrb.mxu0 %v73_v30  ;;  %165 = vmatpush.bf16.msrb.mxu1 %v144_v34 }
  0x88   :  { %191 = vmatpush.bf16.msrb.mxu3 %v150_v26  ;;  %v226_v37 = vpop.permute.xlu1 %225  ;;  %v230_v38 = vpop.permute.xlu0 %229 }
  0x89   :  { %1067 = vmatmul.msk.bf16.vlgmr.msra.gmra.mxu3 %vm55_vm2, %v1063_v22  ;;  %v236_v39 = vsel %vm235_vm3, %v226_v37, %v228_v14  ;;  %v237_v40 = vsel %vm235_vm3, %v228_v14, %v230_v38  ;;  %v238_v48 = vsel %vm235_vm3, %v230_v38, %v232_v23  ;;  %v442_v3 = vpop.permute.xlu2 %441 }
  0x8a   :  { %v244_v42 = vsel %vm59_vm1, %v236_v39, 0  ;;  %v247_v43 = vsel %vm59_vm1, %v237_v40, 0  ;;  %v250_v51 = vsel %vm59_vm1, %v238_v48, 0 }
  0x8b   :  { %204 = vmatpush.bf16.msra.mxu0 %v153_v35  ;;  %217 = vmatpush.bf16.msra.mxu1 %v156_v36 }
  0x8c   :  { %265 = vmatpush.bf16.msra.mxu2 %v244_v42  ;;  %278 = vmatpush.bf16.msra.mxu3 %v247_v43 }
  0x8e   :  { %1070 = vmatmul.msk.bf16.vlgmr.msrb.gmra.mxu2 %vm55_vm2, %v24_v44 }
  0x90   :  { %317 = vmatpush.bf16.msrb.mxu2 %v256_v45  ;;  %v331_v46 = vpop.permute.xlu0 %330  ;;  %v333_v47 = vpop.permute.xlu1 %332 }
  0x91   :  { %v341_v50 = vsel %vm340_vm4, %v331_v46, %v333_v47  ;;  %v545_v12 = vpop.permute.xlu2 %544 }
  0x92   :  { %v349_v53 = vsel %vm59_vm1, %v341_v50, 0 }
  0x96   :  { %1068 = vmatmul.msk.bf16.vlgmr.msrb.gmra.mxu0 %vm55_vm2, %v1063_v22  ;;  %1069 = vmatmul.msk.bf16.vlgmr.msrb.gmra.mxu1 %vm55_vm2, %v24_v44 }
  0x97   :  { %291 = vmatpush.bf16.msrb.mxu0 %v250_v51  ;;  %304 = vmatpush.bf16.msrb.mxu1 %v253_v52 }
  0x98   :  { %v335_v55 = vpop.permute.xlu0 %334  ;;  %v339_v56 = vpop.permute.xlu1 %338 }
  0x99   :  { %1071 = vmatmul.msk.bf16.vlgmr.msrb.gmra.mxu3 %vm55_vm2, %v24_v44  ;;  %v344_v57 = vsel %vm340_vm4, %v337_v54, %v339_v56  ;;  %v342_v62 = vsel %vm340_vm4, %v333_v47, %v335_v55  ;;  %v343_v63 = vsel %vm340_vm4, %v335_v55, %v337_v54  ;;  %v361_v2 = vsel %vm59_vm1, %v339_v56, 0  ;;  %v541_v21 = vpop.permute.xlu2 %540 }
  0x9a   :  { %370 = vmatpush.bf16.msrb.mxu3 %v349_v53  ;;  %v358_v59 = vsel %vm59_vm1, %v344_v57, 0  ;;  %v352_v0 = vsel %vm59_vm1, %v342_v62, 0  ;;  %v355_v1 = vsel %vm59_vm1, %v343_v63, 0  ;;  %v1098_v57 = vld [vmem:[%s1436_s1 + $0xc] sm:$0x3] }
  0x9e   :  { %1075 = vmatmul.msk.bf16.vlgmr.msra.gmra.mxu2 %vm55_vm2, %v1074_v58 }
  0x9f   :  { %409 = vmatpush.bf16.msra.mxu2 %v358_v59 }
  0xa0   :  { %v438_v60 = vpop.permute.xlu1 %437  ;;  %v436_v61 = vpop.permute.xlu0 %435 }
  0xa1   :  { %v446_v8 = vsel %vm445_vm5, %v436_v61, %v438_v60  ;;  %v652_v28 = vpop.permute.xlu2 %651 }
  0xa2   :  { %v454_v14 = vsel %vm59_vm1, %v446_v8, 0 }
  0xa6   :  { %1072 = vmatmul.msk.bf16.vlgmr.msra.gmra.mxu0 %vm55_vm2, %v24_v44  ;;  %1073 = vmatmul.msk.bf16.vlgmr.msra.gmra.mxu1 %vm55_vm2, %v24_v44  ;;  %v1092_v44 = vld [vmem:[%s1436_s1 + $0xa] sm:$0x3] }
  0xa7   :  { %383 = vmatpush.bf16.msra.mxu0 %v352_v0  ;;  %396 = vmatpush.bf16.msra.mxu1 %v355_v1 }
  0xa8   :  { %v440_v4 = vpop.permute.xlu1 %439  ;;  %v444_v6 = vpop.permute.xlu0 %443 }
  0xa9   :  { %1076 = vmatmul.msk.bf16.vlgmr.msra.gmra.mxu3 %vm55_vm2, %v1074_v58  ;;  %v448_v5 = vsel %vm445_vm5, %v440_v4, %v442_v3  ;;  %v447_v9 = vsel %vm445_vm5, %v438_v60, %v440_v4  ;;  %v449_v10 = vsel %vm445_vm5, %v442_v3, %v444_v6  ;;  %v466_v25 = vsel %vm59_vm1, %v444_v6, 0  ;;  %v756_v34 = vpop.permute.xlu2 %755 }
  0xaa   :  { %422 = vmatpush.bf16.msra.mxu3 %v361_v2  ;;  %v460_v7 = vsel %vm59_vm1, %v448_v5, 0  ;;  %v457_v15 = vsel %vm59_vm1, %v447_v9, 0  ;;  %v463_v16 = vsel %vm59_vm1, %v449_v10, 0 }
  0xae   :  { %1079 = vmatmul.msk.bf16.vlgmr.msrb.gmra.mxu2 %vm55_vm2, %v1074_v58 }
  0xaf   :  { %501 = vmatpush.bf16.msrb.mxu2 %v460_v7 }
  0xb0   :  { %v547_v11 = vpop.permute.xlu0 %546  ;;  %v543_v17 = vpop.permute.xlu1 %542 }
  0xb1   :  { %v552_v18 = vsel %vm550_vm6, %v543_v17, %v545_v12  ;;  %v553_v22 = vsel %vm550_vm6, %v545_v12, %v547_v11  ;;  %v551_v23 = vsel %vm550_vm6, %v541_v21, %v543_v17  ;;  %v658_v42 = vpop.permute.xlu2 %657 }
  0xb2   :  { %v562_v19 = vsel %vm59_vm1, %v552_v18, 0  ;;  %v565_v26 = vsel %vm59_vm1, %v553_v22, 0  ;;  %v559_v27 = vsel %vm59_vm1, %v551_v23, 0 }
  0xb6   :  { %1077 = vmatmul.msk.bf16.vlgmr.msrb.gmra.mxu0 %vm55_vm2, %v1074_v58  ;;  %1078 = vmatmul.msk.bf16.vlgmr.msrb.gmra.mxu1 %vm55_vm2, %v1074_v58 }
  0xb7   :  { %475 = vmatpush.bf16.msrb.mxu0 %v454_v14  ;;  %488 = vmatpush.bf16.msrb.mxu1 %v457_v15  ;;  %v1104_v14 = vld [vmem:[%s1436_s1 + $0xe] sm:$0x3] }
  0xb8   :  { %v549_v20 = vpop.permute.xlu0 %548  ;;  %v650_v24 = vpop.permute.xlu1 %649 }
  0xb9   :  { %1081 = vmatmul.msk.bf16.vlgmr.msrb.gmra.mxu3 %vm55_vm2, %v1080_v13  ;;  %v554_v35 = vsel %vm550_vm6, %v547_v11, %v549_v20  ;;  %v661_v36 = vsel %vm659_vm7, %v650_v24, %v652_v28  ;;  %v571_v39 = vsel %vm59_vm1, %v549_v20, 0  ;;  %v766_v50 = vpop.permute.xlu2 %765 }
  0xba   :  { %514 = vmatpush.bf16.msrb.mxu3 %v463_v16  ;;  %v568_v38 = vsel %vm59_vm1, %v554_v35, 0  ;;  %v672_v40 = vsel %vm59_vm1, %v661_v36, 0  ;;  %v1110_v36 = vld [vmem:[%s1436_s1 + $0x10] sm:$0x3] }
  0xbe   :  { %1084 = vmatmul.msk.bf16.vlgmr.msra.gmra.mxu2 %vm55_vm2, %v1080_v13 }
  0xbf   :  { %593 = vmatpush.bf16.msra.mxu2 %v562_v19 }
  0xc0   :  { %v648_v29 = vpop.permute.xlu0 %647  ;;  %v654_v33 = vpop.permute.xlu1 %653 }
  0xc1   :  { %v660_v30 = vsel %vm659_vm7, %v648_v29, %v650_v24  ;;  %v662_v47 = vsel %vm659_vm7, %v652_v28, %v654_v33  ;;  %v866_v59 = vpop.permute.xlu2 %865 }
  0xc2   :  { %v669_v32 = vsel %vm59_vm1, %v660_v30, 0  ;;  %v675_v51 = vsel %vm59_vm1, %v662_v47, 0 }
  0xc6   :  { %1082 = vmatmul.msk.bf16.vlgmr.msra.gmra.mxu0 %vm55_vm2, %v1080_v13  ;;  %1083 = vmatmul.msk.bf16.vlgmr.msra.gmra.mxu1 %vm55_vm2, %v1080_v13 }
  0xc7   :  { %527 = vmatpush.bf16.msra.mxu0 %v466_v25  ;;  %580 = vmatpush.bf16.msra.mxu1 %v559_v27 }
  0xc8   :  { %v758_v37 = vpop.permute.xlu0 %757  ;;  %v656_v41 = vpop.permute.xlu1 %655 }
  0xc9   :  { %1085 = vmatmul.msk.bf16.vlgmr.msra.gmra.mxu3 %vm55_vm2, %v1080_v13  ;;  %v664_v43 = vsel %vm659_vm7, %v656_v41, %v658_v42  ;;  %v768_v48 = vsel %vm767_vm8, %v756_v34, %v758_v37  ;;  %v663_v49 = vsel %vm659_vm7, %v654_v33, %v656_v41  ;;  %v868_v4 = vpop.permute.xlu2 %867 }
  0xca   :  { %606 = vmatpush.bf16.msra.mxu3 %v565_v26  ;;  %v681_v45 = vsel %vm59_vm1, %v664_v43, 0  ;;  %v777_v52 = vsel %vm59_vm1, %v768_v48, 0  ;;  %v678_v53 = vsel %vm59_vm1, %v663_v49, 0  ;;  %v877_v10 = vsel %vm875_vm9, %v866_v59, %v868_v4 }
  0xcb   :  { %v888_v16 = vsel %vm59_vm1, %v877_v10, 0 }
  0xce   :  { %1089 = vmatmul.msk.bf16.vlgmr.msrb.gmra.mxu2 %vm55_vm2, %v1086_v31 }
  0xcf   :  { %690 = vmatpush.bf16.msrb.mxu2 %v669_v32 }
  0xd0   :  { %v760_v46 = vpop.permute.xlu0 %759  ;;  %v764_v55 = vpop.permute.xlu1 %763 }
  0xd1   :  { %v769_v60 = vsel %vm767_vm8, %v758_v37, %v760_v46  ;;  %v772_v62 = vsel %vm767_vm8, %v764_v55, %v766_v50  ;;  %v986_v37 = vld [vmem:[%s1437_s2] sm:$0x7] }
  0xd2   :  { %v780_v63 = vsel %vm59_vm1, %v769_v60, 0  ;;  %v789_v1 = vsel %vm59_vm1, %v772_v62, 0 }
  0xd6   :  { %1087 = vmatmul.msk.bf16.vlgmr.msrb.gmra.mxu0 %vm55_vm2, %v1086_v31  ;;  %1088 = vmatmul.msk.bf16.vlgmr.msrb.gmra.mxu1 %vm55_vm2, %v1086_v31 }
  0xd7   :  { %619 = vmatpush.bf16.msrb.mxu0 %v568_v38  ;;  %632 = vmatpush.bf16.msrb.mxu1 %v571_v39  ;;  %v1151_v38 = vmov 0  }
  0xd8   :  { %v762_v54 = vpop.permute.xlu0 %761  ;;  %v864_v2 = vpop.permute.xlu1 %863  ;;  %1129 = vset.pattern.permute.xlu1 %v1151_v38  ;;  %1130 = vset.pattern.permute.xlu0 %v1151_v38 }
  0xd9   :  { %1090 = vmatmul.msk.bf16.vlgmr.msrb.gmra.mxu3 %vm55_vm2, %v1086_v31  ;;  %v771_v56 = vsel %vm767_vm8, %v762_v54, %v764_v55  ;;  %v770_v61 = vsel %vm767_vm8, %v760_v46, %v762_v54  ;;  %v876_v9 = vsel %vm875_vm9, %v864_v2, %v866_v59  ;;  %989 = vperm.xlu1 %1129, %v986_v37  }
  0xda   :  { %703 = vmatpush.bf16.msrb.mxu3 %v672_v40  ;;  %v786_v58 = vsel %vm59_vm1, %v771_v56, 0  ;;  %v783_v0 = vsel %vm59_vm1, %v770_v61, 0  ;;  %v885_v15 = vsel %vm59_vm1, %v876_v9, 0 }
  0xde   :  { %1094 = vmatmul.msk.bf16.vlgmr.msra.gmra.mxu2 %vm55_vm2, %v1092_v44 }
  0xdf   :  { %742 = vmatpush.bf16.msra.mxu2 %v681_v45 }
  0xe0   :  { %v870_v3 = vpop.permute.xlu0 %869  ;;  %v872_v7 = vpop.permute.xlu1 %871 }
  0xe1   :  { %v878_v5 = vsel %vm875_vm9, %v868_v4, %v870_v3  ;;  %v879_v11 = vsel %vm875_vm9, %v870_v3, %v872_v7 }
  0xe2   :  { %v891_v6 = vsel %vm59_vm1, %v878_v5, 0  ;;  %v894_v17 = vsel %vm59_vm1, %v879_v11, 0 }
  0xe6   :  { %1091 = vmatmul.msk.bf16.vlgmr.msra.gmra.mxu0 %vm55_vm2, %v1086_v31  ;;  %1093 = vmatmul.msk.bf16.vlgmr.msra.gmra.mxu1 %vm55_vm2, %v1092_v44 }
  0xe7   :  { %716 = vmatpush.bf16.msra.mxu0 %v675_v51  ;;  %729 = vmatpush.bf16.msra.mxu1 %v678_v53 }
  0xe8   :  { %v874_v22 = vpop.permute.xlu0 %873 }
  0xe9   :  { %1095 = vmatmul.msk.bf16.vlgmr.msra.gmra.mxu3 %vm55_vm2, %v1092_v44  ;;  %v880_v24 = vsel %vm875_vm9, %v872_v7, %v874_v22 }
  0xea   :  { %798 = vmatpush.bf16.msra.mxu3 %v777_v52  ;;  %v897_v30 = vsel %vm59_vm1, %v880_v24, 0 }
  0xee   :  { %1099 = vmatmul.msk.bf16.vlgmr.msrb.gmra.mxu2 %vm55_vm2, %v1098_v57 }
  0xef   :  { %837 = vmatpush.bf16.msrb.mxu2 %v786_v58 }
  0xf6   :  { %1096 = vmatmul.msk.bf16.vlgmr.msrb.gmra.mxu0 %vm55_vm2, %v1092_v44  ;;  %1097 = vmatmul.msk.bf16.vlgmr.msrb.gmra.mxu1 %vm55_vm2, %v1092_v44 }
  0xf7   :  { %811 = vmatpush.bf16.msrb.mxu0 %v780_v63  ;;  %824 = vmatpush.bf16.msrb.mxu1 %v783_v0 }
  0xf9   :  { %1100 = vmatmul.msk.bf16.vlgmr.msrb.gmra.mxu3 %vm55_vm2, %v1098_v57 }
  0xfa   :  { %850 = vmatpush.bf16.msrb.mxu3 %v789_v1 }
  0xfe   :  { %1103 = vmatmul.msk.bf16.vlgmr.msra.gmra.mxu2 %vm55_vm2, %v1098_v57 }
  0xff   :  { %932 = vmatpush.bf16.msra.mxu2 %v891_v6 }
 0x101   :  { %v110_v8 = vpop.f32.mrf.mxu2 }
 0x103   :  { %v84_v12 = vpop.f32.mrf.mxu0  ;;  %v97_v13 = vpop.f32.mrf.mxu1 }
 0x106   :  { %1101 = vmatmul.msk.bf16.vlgmr.msra.gmra.mxu0 %vm55_vm2, %v1098_v57  ;;  %1102 = vmatmul.msk.bf16.vlgmr.msra.gmra.mxu1 %vm55_vm2, %v1098_v57 }
 0x107   :  { %906 = vmatpush.bf16.msra.mxu0 %v885_v15  ;;  %919 = vmatpush.bf16.msra.mxu1 %v888_v16 }
 0x109   :  { %1105 = vmatmul.msk.bf16.vlgmr.msra.gmra.mxu3 %vm55_vm2, %v1104_v14  ;;  %v112_v18 = vpop.f32.mrf.mxu2 }
 0x10a   :  { %945 = vmatpush.bf16.msra.mxu3 %v894_v17 }
 0x10b   :  { %v86_v20 = vpop.f32.mrf.mxu0  ;;  %v99_v21 = vpop.f32.mrf.mxu1 }
 0x10c   :  { %v123_v19 = vpop.f32.mrf.mxu3 }
 0x10e   :  { %1108 = vmatmul.msk.bf16.vlgmr.msrb.gmra.mxu2 %vm55_vm2, %v1104_v14 }
 0x111   :  { %v180_v23 = vpop.f32.mrf.mxu2 }
 0x112   :  { %v181_v26 = vadd.f32 %v180_v23, %v97_v13 }
 0x113   :  { %v136_v27 = vpop.f32.mrf.mxu0  ;;  %v167_v28 = vpop.f32.mrf.mxu1 }
 0x114   :  { %v125_v25 = vpop.f32.mrf.mxu3  ;;  %v168_v29 = vadd.f32 %v167_v28, %v84_v12 }
 0x116   :  { %1106 = vmatmul.msk.bf16.vlgmr.msrb.gmra.mxu0 %vm55_vm2, %v1104_v14  ;;  %1107 = vmatmul.msk.bf16.vlgmr.msrb.gmra.mxu1 %vm55_vm2, %v1104_v14 }
 0x117   :  { %958 = vmatpush.bf16.msrb.mxu0 %v897_v30 }
 0x119   :  { %1109 = vmatmul.msk.bf16.vlgmr.msrb.gmra.mxu3 %vm55_vm2, %v1104_v14  ;;  %v182_v31 = vpop.f32.mrf.mxu2 }
 0x11b   :  { %v138_v34 = vpop.f32.mrf.mxu0  ;;  %v169_v35 = vpop.f32.mrf.mxu1 }
 0x11c   :  { %v193_v32 = vpop.f32.mrf.mxu3 }
 0x11d   :  { %v194_v33 = vadd.f32 %v193_v32, %v110_v8 }
 0x11e   :  { %1113 = vmatmul.msk.bf16.vlgmr.msra.gmra.mxu2 %vm55_vm2, %v1110_v36 }
 0x121   :  { %v267_v39 = vpop.f32.mrf.mxu2 }
 0x122   :  { %v323_v41 = vadd.f32 %v267_v39, %v168_v29 }
 0x123   :  { %v206_v42 = vpop.f32.mrf.mxu0  ;;  %v219_v43 = vpop.f32.mrf.mxu1 }
 0x124   :  { %v195_v40 = vpop.f32.mrf.mxu3  ;;  %v207_v44 = vadd.f32 %v206_v42, %v123_v19  ;;  %v220_v45 = vadd.f32 %v219_v43, %v136_v27 }
 0x126   :  { %1111 = vmatmul.msk.bf16.vlgmr.msra.gmra.mxu0 %vm55_vm2, %v1110_v36  ;;  %1112 = vmatmul.msk.bf16.vlgmr.msra.gmra.mxu1 %vm55_vm2, %v1110_v36 }
 0x129   :  { %1114 = vmatmul.msk.bf16.vlgmr.msra.gmra.mxu3 %vm55_vm2, %v1110_v36  ;;  %v269_v46 = vpop.f32.mrf.mxu2 }
 0x12b   :  { %v208_v49 = vpop.f32.mrf.mxu0  ;;  %v221_v50 = vpop.f32.mrf.mxu1 }
 0x12c   :  { %v280_v47 = vpop.f32.mrf.mxu3 }
 0x12d   :  { %v324_v48 = vadd.f32 %v280_v47, %v181_v26 }
 0x131   :  { %v319_v51 = vpop.f32.mrf.mxu2 }
 0x132   :  { %v327_v53 = vadd.f32 %v319_v51, %v220_v45 }
 0x133   :  { %v293_v54 = vpop.f32.mrf.mxu0  ;;  %v306_v55 = vpop.f32.mrf.mxu1 }
 0x134   :  { %v282_v52 = vpop.f32.mrf.mxu3  ;;  %v325_v56 = vadd.f32 %v293_v54, %v194_v33  ;;  %v326_v57 = vadd.f32 %v306_v55, %v207_v44 }
 0x136   :  { %1115 = vmatmul.msk.bf16.vlgmr.msrb.gmra.mxu0 %vm55_vm2, %v1110_v36 }
 0x139   :  { %v321_v58 = vpop.f32.mrf.mxu2 }
 0x13b   :  { %v295_v61 = vpop.f32.mrf.mxu0  ;;  %v308_v62 = vpop.f32.mrf.mxu1 }
 0x13c   :  { %v372_v59 = vpop.f32.mrf.mxu3 }
 0x13d   :  { %v428_v60 = vadd.f32 %v372_v59, %v323_v41 }
 0x141   :  { %v411_v63 = vpop.f32.mrf.mxu2 }
 0x142   :  { %v431_v1 = vadd.f32 %v411_v63, %v326_v57 }
 0x143   :  { %v385_v2 = vpop.f32.mrf.mxu0  ;;  %v398_v3 = vpop.f32.mrf.mxu1 }
 0x144   :  { %v374_v0 = vpop.f32.mrf.mxu3  ;;  %v429_v4 = vadd.f32 %v385_v2, %v324_v48  ;;  %v430_v5 = vadd.f32 %v398_v3, %v325_v56 }
 0x149   :  { %v413_v6 = vpop.f32.mrf.mxu2 }
 0x14b   :  { %v387_v9 = vpop.f32.mrf.mxu0  ;;  %v400_v10 = vpop.f32.mrf.mxu1 }
 0x14c   :  { %v424_v7 = vpop.f32.mrf.mxu3 }
 0x14d   :  { %v432_v8 = vadd.f32 %v424_v7, %v327_v53 }
 0x151   :  { %v503_v11 = vpop.f32.mrf.mxu2 }
 0x152   :  { %v535_v13 = vadd.f32 %v503_v11, %v430_v5 }
 0x153   :  { %v477_v14 = vpop.f32.mrf.mxu0  ;;  %v490_v15 = vpop.f32.mrf.mxu1 }
 0x154   :  { %v426_v12 = vpop.f32.mrf.mxu3  ;;  %v533_v16 = vadd.f32 %v477_v14, %v428_v60  ;;  %v534_v17 = vadd.f32 %v490_v15, %v429_v4  ;;  %v1152_v4 = vmov 839922192  }
 0x155   :  { %v992_v5 = vunpack.c.l.s4 %v1152_v4 }
 0x157   :  { %v993_v14 = vunpack.c.0.s8 %v992_v5 }
 0x159   :  { %v505_v18 = vpop.f32.mrf.mxu2 }
 0x15b   :  { %v479_v21 = vpop.f32.mrf.mxu0  ;;  %v492_v22 = vpop.f32.mrf.mxu1 }
 0x15c   :  { %v516_v19 = vpop.f32.mrf.mxu3 }
 0x15d   :  { %v536_v20 = vadd.f32 %v516_v19, %v431_v1 }
 0x161   :  { %v595_v23 = vpop.f32.mrf.mxu2 }
 0x162   :  { %v639_v56 = vadd.f32 %v595_v23, %v534_v17  ;;  %v990_v17 = vpop.permute.xlu1 %989 }
 0x163   :  { %v529_v25 = vpop.f32.mrf.mxu0  ;;  %v582_v26 = vpop.f32.mrf.mxu1 }
 0x164   :  { %v518_v24 = vpop.f32.mrf.mxu3  ;;  %v537_v27 = vadd.f32 %v529_v25, %v432_v8  ;;  %v638_v57 = vadd.f32 %v582_v26, %v533_v16 }
 0x165   :  { %v994_v24 = vperm.slane %v990_v17, %v993_v14 }
 0x169   :  { %v597_v28 = vpop.f32.mrf.mxu2 }
 0x16b   :  { %v531_v30 = vpop.f32.mrf.mxu0  ;;  %v584_v31 = vpop.f32.mrf.mxu1 }
 0x16c   :  { %v608_v29 = vpop.f32.mrf.mxu3 }
 0x16d   :  { %v640_v8 = vadd.f32 %v608_v29, %v535_v13 }
 0x171   :  { %v692_v32 = vpop.f32.mrf.mxu2 }
 0x172   :  { %v748_v60 = vadd.f32 %v692_v32, %v638_v57 }
 0x173   :  { %v621_v34 = vpop.f32.mrf.mxu0  ;;  %v634_v35 = vpop.f32.mrf.mxu1 }
 0x174   :  { %v610_v33 = vpop.f32.mrf.mxu3  ;;  %v641_v3 = vadd.f32 %v621_v34, %v536_v20  ;;  %v642_v25 = vadd.f32 %v634_v35, %v537_v27 }
 0x179   :  { %v694_v36 = vpop.f32.mrf.mxu2 }
 0x17b   :  { %v623_v38 = vpop.f32.mrf.mxu0  ;;  %v636_v39 = vpop.f32.mrf.mxu1 }
 0x17c   :  { %v705_v37 = vpop.f32.mrf.mxu3 }
 0x17d   :  { %v749_v58 = vadd.f32 %v705_v37, %v639_v56 }
 0x181   :  { %v744_v40 = vpop.f32.mrf.mxu2 }
 0x182   :  { %v752_v26 = vadd.f32 %v744_v40, %v642_v25 }
 0x183   :  { %v718_v42 = vpop.f32.mrf.mxu0  ;;  %v731_v43 = vpop.f32.mrf.mxu1 }
 0x184   :  { %v707_v41 = vpop.f32.mrf.mxu3  ;;  %v751_v9 = vadd.f32 %v731_v43, %v641_v3  ;;  %v750_v11 = vadd.f32 %v718_v42, %v640_v8 }
 0x189   :  { %v746_v44 = vpop.f32.mrf.mxu2 }
 0x18b   :  { %v720_v46 = vpop.f32.mrf.mxu0  ;;  %v733_v47 = vpop.f32.mrf.mxu1 }
 0x18c   :  { %v800_v45 = vpop.f32.mrf.mxu3 }
 0x18d   :  { %v856_v1 = vadd.f32 %v800_v45, %v748_v60 }
 0x191   :  { %v839_v48 = vpop.f32.mrf.mxu2 }
 0x192   :  { %v859_v12 = vadd.f32 %v839_v48, %v751_v9 }
 0x193   :  { %v813_v50 = vpop.f32.mrf.mxu0  ;;  %v826_v51 = vpop.f32.mrf.mxu1 }
 0x194   :  { %v802_v49 = vpop.f32.mrf.mxu3  ;;  %v857_v61 = vadd.f32 %v813_v50, %v749_v58  ;;  %v858_v18 = vadd.f32 %v826_v51, %v750_v11 }
 0x199   :  { %v841_v52 = vpop.f32.mrf.mxu2 }
 0x19b   :  { %v815_v54 = vpop.f32.mrf.mxu0  ;;  %v828_v55 = vpop.f32.mrf.mxu1 }
 0x19c   :  { %v852_v53 = vpop.f32.mrf.mxu3 }
 0x19d   :  { %v860_v30 = vadd.f32 %v852_v53, %v752_v26 }
 0x1a1   :  { %v934_v59 = vpop.f32.mrf.mxu2 }
 0x1a2   :  { %v966_v20 = vadd.f32 %v934_v59, %v858_v18 }
 0x1a3   :  { %v908_v63 = vpop.f32.mrf.mxu0  ;;  %v921_v0 = vpop.f32.mrf.mxu1 }
 0x1a4   :  { %v854_v62 = vpop.f32.mrf.mxu3  ;;  %v965_v2 = vadd.f32 %v921_v0, %v857_v61  ;;  %v964_v6 = vadd.f32 %v908_v63, %v856_v1 }
 0x1a6   :  { %v973_v7 = vrot.slane %v965_v2, 4 }
 0x1a8   :  { %v975_v10 = vsel %vm59_vm1, %v964_v6, %v973_v7 }
 0x1a9   :  { %979 = vst [vmem:[#allocation2] sm:$0x77] %v975_v10  ;;  %v936_v15 = vpop.f32.mrf.mxu2 }
 0x1ab   :  { %v910_v21 = vpop.f32.mrf.mxu0  ;;  %v923_v22 = vpop.f32.mrf.mxu1 }
 0x1ac   :  { %v947_v16 = vpop.f32.mrf.mxu3 }
 0x1ad   :  { %v967_v19 = vadd.f32 %v947_v16, %v859_v12 }
 0x1af   :  { %v974_v23 = vrot.slane %v967_v19, 4 }
 0x1b0   :  { %v983_v28 = vld [vmem:[#allocation2] sm:$0x77] }
 0x1b1   :  { %v976_v13 = vsel %vm59_vm1, %v966_v20, %v974_v23  ;;  %v996_v29 = vadd.f32 %v994_v24, %v983_v28 }
 0x1b2   :  { %980 = vst [vmem:[#allocation2 + $0x8] sm:$0x77] %v976_v13 }
 0x1b3   :  { %v1116_v32 = vmul.f32 -1.442695, %v996_v29  ;;  %v960_v33 = vpop.f32.mrf.mxu0 }
 0x1b4   :  { %v949_v31 = vpop.f32.mrf.mxu3  ;;  %v968_v34 = vadd.f32 %v960_v33, %v860_v30 }
 0x1b5   :  { %1131 = vpow2.f32 %v1116_v32 }
 0x1b6   :  { %982 = vst.msk [vmem:[#allocation2 + $0x10] sm:$0x7] %vm981_vm10, %v968_v34 }
 0x1b9   :  { %v984_v36 = vld [vmem:[#allocation2 + $0x8] sm:$0x77] }
 0x1ba   :  { %v997_v37 = vadd.f32 %v994_v24, %v984_v36 }
 0x1bb   :  { %v1132_v39 = vpop.eup %1131  ;;  %v962_v27 = vpop.f32.mrf.mxu0 }
 0x1bc   :  { %v1117_v38 = vmul.f32 -1.442695, %v997_v37  ;;  %v1008_v35 = vadd.f32 1.0, %v1132_v39 }
 0x1bd   :  { %v985_v40 = vld [vmem:[#allocation2 + $0x10] sm:$0x7] }
 0x1be   :  { %1133 = vpow2.f32 %v1117_v38  ;;  %v998_v41 = vadd.f32 %v994_v24, %v985_v40  ;;  %v1022_v49 = vand.u32 2147483648, %v1008_v35  ;;  %v1020_v52 = vand.u32 2147483647, %v1008_v35 }
 0x1bf   :  { %1135 = vrcp.f32 %v1008_v35  ;;  %vm1016_vm12 = vweird.f32 %v1008_v35 }
 0x1c0   :  { %v1118_v42 = vmul.f32 -1.442695, %v998_v41  ;;  %v1023_v56 = vor.u32 1.1754944e-38, %v1022_v49  ;;  %vm1021_vm14 = vcmp.eq.f32.partialorder %v1020_v52, 8.507059e+37 }
 0x1c2   :  { %1137 = vpow2.f32 %v1118_v42 }
 0x1c4   :  { %v1134_v43 = vpop.eup %1133 }
 0x1c5   :  { %v1009_v44 = vadd.f32 1.0, %v1134_v43  ;;  %v1136_v45 = vpop.eup %1135 }
 0x1c6   :  { %v1012_v46 = vmul.f32 %v1136_v45, %v1008_v35  ;;  %vm1017_vm11 = vweird.f32 %v1136_v45 }
 0x1c7   :  { %1139 = vrcp.f32 %v1009_v44  ;;  %vm1018_vm13 = vmor %vm1016_vm12, %vm1017_vm11  ;;  %v1037_v60 = vand.u32 2147483648, %v1009_v44  ;;  %v1035_v62 = vand.u32 2147483647, %v1009_v44  ;;  %vm1031_vm0 = vweird.f32 %v1009_v44 }
 0x1c8   :  { %v1013_v47 = vsub.f32 1.0, %v1012_v46  ;;  %v1138_v48 = vpop.eup %1137 }
 0x1c9   :  { %v1010_v50 = vadd.f32 1.0, %v1138_v48  ;;  %v1038_v2 = vor.u32 1.1754944e-38, %v1037_v60  ;;  %vm1036_vm2 = vcmp.eq.f32.partialorder %v1035_v62, 8.507059e+37 }
 0x1ca   :  { %v1014_v51 = vmul.f32 %v1136_v45, %v1013_v47 }
 0x1cb   :  { %1141 = vrcp.f32 %v1010_v50  ;;  %v1052_v6 = vand.u32 2147483648, %v1010_v50  ;;  %v1050_v8 = vand.u32 2147483647, %v1010_v50  ;;  %vm1046_vm4 = vweird.f32 %v1010_v50 }
 0x1cc   :  { %v1015_v54 = vadd.f32 %v1136_v45, %v1014_v51 }
 0x1cd   :  { %v1140_v53 = vpop.eup %1139  ;;  %v1053_v10 = vor.u32 1.1754944e-38, %v1052_v6  ;;  %vm1051_vm6 = vcmp.eq.f32.partialorder %v1050_v8, 8.507059e+37 }
 0x1ce   :  { %v1027_v55 = vmul.f32 %v1140_v53, %v1009_v44  ;;  %v1019_v57 = vsel %vm1018_vm13, %v1136_v45, %v1015_v54  ;;  %vm1032_vm15 = vweird.f32 %v1140_v53 }
 0x1cf   :  { %v1024_v59 = vsel %vm1021_vm14, %v1023_v56, %v1019_v57  ;;  %vm1033_vm1 = vmor %vm1031_vm0, %vm1032_vm15 }
 0x1d0   :  { %v1028_v58 = vsub.f32 1.0, %v1027_v55  ;;  %1056 = vst [vmem:[%s1438_s5] sm:$0x77] %v1024_v59 }
 0x1d1   :  { %v1142_v63 = vpop.eup %1141 }
 0x1d2   :  { %v1029_v61 = vmul.f32 %v1140_v53, %v1028_v58  ;;  %v1042_v1 = vmul.f32 %v1142_v63, %v1010_v50  ;;  %vm1047_vm3 = vweird.f32 %v1142_v63 }
 0x1d3   :  { %vm1048_vm5 = vmor %vm1046_vm4, %vm1047_vm3 }
 0x1d4   :  { %v1030_v0 = vadd.f32 %v1140_v53, %v1029_v61  ;;  %v1043_v4 = vsub.f32 1.0, %v1042_v1 }
 0x1d6   :  { %v1034_v3 = vsel %vm1033_vm1, %v1140_v53, %v1030_v0  ;;  %v1044_v7 = vmul.f32 %v1142_v63, %v1043_v4 }
 0x1d7   :  { %v1039_v5 = vsel %vm1036_vm2, %v1038_v2, %v1034_v3 }
 0x1d8   :  { %1057 = vst [vmem:[%s1438_s5 + $0x8] sm:$0x77] %v1039_v5  ;;  %v1045_v9 = vadd.f32 %v1142_v63, %v1044_v7 }
 0x1da   :  { %v1049_v11 = vsel %vm1048_vm5, %v1142_v63, %v1045_v9 }
 0x1db   :  { %v1054_v12 = vsel %vm1051_vm6, %v1053_v10, %v1049_v11 }
 0x1dc   :  { %1058 = vst.msk [vmem:[%s1438_s5 + $0x10] sm:$0x7] %vm981_vm10, %v1054_v12 }

</bundles_post_ra>
